<compile_context>
chip_gen: v7x
topology: tpu7x:2x2x1
jax: 0.10.0
libtpu: 0.0.40
codegen_flags: <defaults>
</compile_context>

<pallas_src>
import functools

import jax
import jax.numpy as jnp
from jax.experimental import pallas as pl
from jax.experimental.pallas import tpu as pltpu


# --------------------------------------------------------------------------- #
# Kernel
# --------------------------------------------------------------------------- #
def _distill_kernel(sf_ref, sft_ref, tf_ref, sl_ref, tl_ref, sqj_ref,
                    tcol_ref, trow_ref, kd_ref, tri_ref, sim_ref,
                    *, temp, margin, gram_dtype):
    """One TB-row block of the fused distillation loss.

    sf_ref  : (TB, D) student features, native dtype           (blocked)
    sft_ref : (D, N)  student features^T, gram dtype            (resident)
    tf_ref  : (TB, D) teacher features                          (blocked)
    sl_ref  : (TB, C) student logits                            (blocked)
    tl_ref  : (TB, C) teacher logits                            (blocked)
    sqj_ref : (1, N)  f32 ||x_j||^2 per column (hoisted to XLA) (resident)
    tcol_ref: (TB, 1) int32 targets, column layout              (blocked)
    trow_ref: (1, N)  int32 targets, row layout                 (resident)
    kd_ref / tri_ref / sim_ref : (TB, 1) f32 per-row partial losses
    """
    inv_temp = jnp.float32(1.0 / temp)

    # Masks straight from the targets (pad sentinel -1; real labels are >= 0).
    tcol = tcol_ref[...]
    trow = trow_ref[...]
    vcol = (tcol >= 0).astype(jnp.float32)                       # valid rows (TB, 1)

    # ------------------- KL-divergence distillation ------------------------- #
    s = sl_ref[...].astype(jnp.float32) * inv_temp
    t = tl_ref[...].astype(jnp.float32) * inv_temp

    m_s = jnp.max(s, axis=1, keepdims=True)
    e_s = jnp.exp(s - m_s)
    log_s = (s - m_s) - jnp.log(jnp.sum(e_s, axis=1, keepdims=True))

    m_t = jnp.max(t, axis=1, keepdims=True)
    e_t = jnp.exp(t - m_t)
    sum_t = jnp.sum(e_t, axis=1, keepdims=True)
    log_t = (t - m_t) - jnp.log(sum_t)
    # Reuse e_t for the teacher softmax; TB reciprocals + a VPU multiply instead of
    # a (TB, C) broadcast divide (approx=True possible if tolerance allows).
    p_t = e_t * pl.reciprocal(sum_t)

    # Padded classes have p_t == 0 exactly; padded rows are zeroed by vcol.
    kd_ref[...] = jnp.sum(p_t * (log_t - log_s), axis=1, keepdims=True) * vcol

    # ------------------- Triplet loss with hard mining ---------------------- #
    x_blk = sf_ref[...]                                   # (TB, D) native dtype
    xf_blk = x_blk.astype(jnp.float32)
    # (TB, D) x (D, N) on the MXU; contraction sits on the RHS sublanes -> no vxpose.
    gram = jnp.dot(x_blk.astype(gram_dtype), sft_ref[...],
                   preferred_element_type=jnp.float32)    # (TB, N) f32 accumulation
    sq_i = jnp.sum(xf_blk * xf_blk, axis=1, keepdims=True)        # (TB, 1) f32
    dist2 = sq_i + sqj_ref[...] - 2.0 * gram                      # (TB, N)

    same = tcol == trow                   # identity mask (broadcast int32 compare)
    pad_col = trow < 0                    # padded columns
    big = jnp.float32(1e30)
    # Mine on squared distances (sqrt is monotone): only 2*TB sqrts per block.
    d2_ap = jnp.max(jnp.where(same, dist2, -big), axis=1, keepdims=True)
    d2_an = jnp.min(jnp.where(jnp.logical_or(same, pad_col), big, dist2),
                    axis=1, keepdims=True)
    dist_ap = jnp.sqrt(jnp.maximum(d2_ap, 1e-12))
    dist_an = jnp.sqrt(jnp.maximum(d2_an, 1e-12))
    # MarginRankingLoss(dist_an, dist_ap, y=1) = relu(dist_ap - dist_an + margin).
    tri_ref[...] = jnp.maximum(dist_ap - dist_an + margin, 0.0) * vcol

    # ------------------- Feature similarity (MSE) --------------------------- #
    diff = xf_blk - tf_ref[...].astype(jnp.float32)
    sim_ref[...] = jnp.sum(diff * diff, axis=1, keepdims=True)


# --------------------------------------------------------------------------- #
# Host-side helpers
# --------------------------------------------------------------------------- #
def _round_up(x, m):
    return (x + m - 1) // m * m


def _pad2(x, rows, cols, col_val=0.0):
    r, c = x.shape
    if c < cols:
        x = jnp.pad(x, ((0, 0), (0, cols - c)), constant_values=col_val)
    if r < rows:
        x = jnp.pad(x, ((0, rows - r), (0, 0)), constant_values=0)
    return x


def _vmem_budget_bytes():
    """Per-core VMEM capacity with ~20% headroom for compiler scratch."""
    try:
        cap = int(pltpu.get_tpu_info().vmem_capacity_bytes)
    except Exception:
        cap = 64 * 1024 * 1024            # conservative default (v7x per-TensorCore)
    return max(int(cap * 0.8), 32 * 1024 * 1024)


def _mxu_is_wide():
    """True on generations with a 2x256x256 MXU (v6e / v7x)."""
    try:
        kind = jax.devices()[0].device_kind.lower()
    except Exception:
        return False
    return ("v6" in kind) or ("v7" in kind) or ("7x" in kind)


def _vmem_estimate(n_pad, d_pad, c_pad, tb, feat_bytes, gram_bytes, logit_bytes):
    resident = d_pad * n_pad * gram_bytes + 3 * n_pad * 4         # feats^T + sq_j + trow
    per_step = (2 * tb * d_pad * feat_bytes                       # student/teacher blocks
                + 2 * tb * c_pad * logit_bytes                    # logits blocks
                + 4 * tb * 4)                                     # tcol + 3 outputs
    interm = (3 * tb * n_pad * 4                                  # gram / dist2 / selects
              + 6 * tb * c_pad * 4                                # softmax temporaries
              + 3 * tb * d_pad * 4)                               # f32 casts / diff
    return resident + 2 * per_step + interm                       # x2: double buffering


# --------------------------------------------------------------------------- #
# Public wrapper
# --------------------------------------------------------------------------- #
def distillation_loss(student_feats, student_logits, teacher_feats, teacher_logits,
                      targets, *, temp=4.0, margin=0.3, lambda_kd=1.0, lambda_tri=1.0,
                      gram_dtype=jnp.bfloat16):
    """Fused DistillationLoss forward.

    Returns (total_loss, {'kd_loss', 'tri_loss', 'sim_loss'}).

    gram_dtype: dtype for the feature Gram matmul on the MXU.  bf16 (default) runs at
    MXU-native rate with f32 accumulation; pass jnp.float32 for bit-tight parity with
    an f32 reference.  Norms, softmax and the MSE always run in f32.
    Targets must be non-negative class ids (-1 is reserved as the padding sentinel).
    """
    n, d = student_feats.shape
    c = student_logits.shape[1]
    if jnp.dtype(student_feats.dtype).itemsize < 4:
        gram_dtype = student_feats.dtype            # inputs already reduced precision
    gram_dtype = jnp.dtype(gram_dtype)

    feat_bytes = jnp.dtype(student_feats.dtype).itemsize
    logit_bytes = jnp.dtype(student_logits.dtype).itemsize
    gram_bytes = gram_dtype.itemsize
    budget = _vmem_budget_bytes()

    # Generation-aware tile / padding selection (256 on v6e/v7x if it fits, else 128).
    lane_options = (256, 128) if _mxu_is_wide() else (128,)
    lane = lane_options[-1]
    for cand in lane_options:
        est_c = _vmem_estimate(_round_up(n, cand), _round_up(d, cand),
                               _round_up(c, cand), min(_round_up(n, cand), cand),
                               feat_bytes, gram_bytes, logit_bytes)
        if est_c <= budget:
            lane = cand
            break
    n_pad = _round_up(n, lane)
    d_pad = _round_up(d, lane)
    c_pad = _round_up(c, lane)
    tb = min(n_pad, lane)
    num_blocks = n_pad // tb
    est = _vmem_estimate(n_pad, d_pad, c_pad, tb, feat_bytes, gram_bytes, logit_bytes)
    vmem_limit = int(min(max(int(est * 1.25) + (1 << 20), 32 * 1024 * 1024), budget))

    # ------- host-side (XLA) prep: padding, transposed Gram RHS, hoisted sq_j ------ #
    neg = -30000.0            # softmax-neutral class padding (exp underflows to 0)
    sf = _pad2(student_feats, n_pad, d_pad)                     # native dtype, no upcast
    tf = _pad2(teacher_feats, n_pad, d_pad)
    sl = _pad2(student_logits, n_pad, c_pad, col_val=neg)
    tl = _pad2(teacher_logits, n_pad, c_pad, col_val=neg)
    sft = jnp.transpose(sf).astype(gram_dtype)                  # (D, N) resident Gram RHS

    sqj = jnp.sum(student_feats.astype(jnp.float32) ** 2, axis=1)   # hoisted column norms
    if n_pad > n:
        sqj = jnp.pad(sqj, (0, n_pad - n))
    sqj = sqj.reshape(1, n_pad)

    tgt = targets.astype(jnp.int32)                             # labels assumed >= 0
    if n_pad > n:
        tgt = jnp.pad(tgt, (0, n_pad - n), constant_values=-1)
    tcol = tgt.reshape(n_pad, 1)
    trow = tgt.reshape(1, n_pad)

    kernel = functools.partial(_distill_kernel, temp=float(temp), margin=float(margin),
                               gram_dtype=gram_dtype)

    bytes_in = (sf.size * feat_bytes + tf.size * feat_bytes + sft.size * gram_bytes
                + sl.size * logit_bytes + tl.size * logit_bytes
                + sqj.size * 4 + 2 * n_pad * 4)
    cost = pl.CostEstimate(
        flops=int(2 * n_pad * n_pad * d_pad + 8 * n_pad * n_pad
                  + 10 * n_pad * (d_pad + c_pad)),
        transcendentals=int(2 * n_pad * c_pad + 5 * n_pad),
        bytes_accessed=int(bytes_in + 3 * n_pad * 4),
    )

    def _call(resident_mode):
        def resident_spec(shape):
            if resident_mode is None:
                return pl.BlockSpec(shape, lambda i: (0, 0))
            return pl.BlockSpec(shape, lambda i: (0, 0), pipeline_mode=resident_mode)

        in_specs = [
            pl.BlockSpec((tb, d_pad), lambda i: (i, 0)),   # student feats (row block)
            resident_spec((d_pad, n_pad)),                 # student feats^T (resident)
            pl.BlockSpec((tb, d_pad), lambda i: (i, 0)),   # teacher feats (row block)
            pl.BlockSpec((tb, c_pad), lambda i: (i, 0)),   # student logits (row block)
            pl.BlockSpec((tb, c_pad), lambda i: (i, 0)),   # teacher logits (row block)
            resident_spec((1, n_pad)),                     # hoisted ||x_j||^2 (resident)
            pl.BlockSpec((tb, 1), lambda i: (i, 0)),       # targets, column layout
            resident_spec((1, n_pad)),                     # targets, row layout (resident)
        ]
        out_specs = (pl.BlockSpec((tb, 1), lambda i: (i, 0)),
                     pl.BlockSpec((tb, 1), lambda i: (i, 0)),
                     pl.BlockSpec((tb, 1), lambda i: (i, 0)))
        out_shape = (jax.ShapeDtypeStruct((n_pad, 1), jnp.float32),
                     jax.ShapeDtypeStruct((n_pad, 1), jnp.float32),
                     jax.ShapeDtypeStruct((n_pad, 1), jnp.float32))
        return pl.pallas_call(
            kernel,
            out_shape=out_shape,
            grid=(num_blocks,),
            in_specs=in_specs,
            out_specs=out_specs,
            compiler_params=pltpu.CompilerParams(
                dimension_semantics=("parallel",),   # row blocks shard across TensorCores
                vmem_limit_bytes=vmem_limit,
            ),
            cost_estimate=cost,
        )(sf, sft, tf, sl, tl, sqj, tcol, trow)

    try:
        # Single-buffer the grid-invariant (resident) operands.
        kd_col, tri_col, sim_col = _call(pl.Buffered(1))
    except Exception:
        # Build without BlockSpec.pipeline_mode support: fall back to default buffering.
        kd_col, tri_col, sim_col = _call(None)

    # Tiny epilogue in XLA: sum the per-row partials, normalize, lambda-combine.
    nf = jnp.float32(n)
    kd = jnp.sum(kd_col) / nf * (temp ** 2)          # F.kl_div batchmean * T^2
    tri = jnp.sum(tri_col) / nf                      # mean over batch rows
    sim = jnp.sum(sim_col) / (nf * d)                # MSE over all feature elements
    total = lambda_kd * kd + lambda_tri * tri + sim
    return total, {"kd_loss": kd, "tri_loss": tri, "sim_loss": sim}


# --------------------------------------------------------------------------- #
# Pure-JAX references (for the self-test)
# --------------------------------------------------------------------------- #
def _reference(student_feats, student_logits, teacher_feats, teacher_logits, targets,
               temp=4.0, margin=0.3, lambda_kd=1.0, lambda_tri=1.0):
    """Exact f32 reference mirroring the PyTorch forward."""
    n = student_feats.shape[0]
    log_s = jax.nn.log_softmax(student_logits / temp, axis=1)
    log_t = jax.nn.log_softmax(teacher_logits / temp, axis=1)
    p_t = jnp.exp(log_t)
    kd = jnp.sum(p_t * (log_t - log_s)) / n * temp ** 2

    sq = jnp.sum(student_feats ** 2, axis=1, keepdims=True)
    gram = jnp.dot(student_feats, student_feats.T, precision=jax.lax.Precision.HIGHEST)
    dist = jnp.sqrt(jnp.maximum(sq + sq.T - 2.0 * gram, 1e-12))
    mask = targets[:, None] == targets[None, :]
    dist_ap = jnp.max(jnp.where(mask, dist, -jnp.inf), axis=1)
    dist_an = jnp.min(jnp.where(mask, jnp.inf, dist), axis=1)
    tri = jnp.mean(jnp.maximum(dist_ap - dist_an + margin, 0.0))

    sim = jnp.mean((student_feats - teacher_feats) ** 2)
    return lambda_kd * kd + lambda_tri * tri + sim, kd, tri, sim


def _triplet_gram_dtype_ref(x, targets, margin=0.3, gram_dtype=jnp.bfloat16):
    """Triplet reference matching the kernel numerics: Gram in `gram_dtype` with f32
    accumulation, squared norms in f32."""
    xg = x.astype(gram_dtype).astype(jnp.float32)
    sq = jnp.sum(x.astype(jnp.float32) ** 2, axis=1, keepdims=True)
    d2 = sq + sq.T - 2.0 * jnp.dot(xg, xg.T, precision=jax.lax.Precision.HIGHEST)
    dist = jnp.sqrt(jnp.maximum(d2, 1e-12))
    mask = targets[:, None] == targets[None, :]
    dist_ap = jnp.max(jnp.where(mask, dist, -jnp.inf), axis=1)
    dist_an = jnp.min(jnp.where(mask, jnp.inf, dist), axis=1)
    return jnp.mean(jnp.maximum(dist_ap - dist_an + margin, 0.0))


if __name__ == "__main__":
    key = jax.random.PRNGKey(0)
    N, D, C = 8, 32, 16  # batch, feature dim, num classes

    k1, k2, k3, k4 = jax.random.split(key, 4)
    student_feats = jax.random.normal(k1, (N, D), dtype=jnp.float32)
    teacher_feats = jax.random.normal(k2, (N, D), dtype=jnp.float32)
    student_logits = jax.random.normal(k3, (N, C), dtype=jnp.float32)
    teacher_logits = jax.random.normal(k4, (N, C), dtype=jnp.float32)
    # Each identity appears twice so hard-positive mining is well defined.
    targets = jnp.array([0, 0, 1, 1, 2, 2, 3, 3], dtype=jnp.int32)

    total, parts = distillation_loss(student_feats, student_logits,
                                     teacher_feats, teacher_logits, targets)
    jax.block_until_ready(total)

    ref_total, ref_kd, ref_tri, ref_sim = _reference(
        student_feats, student_logits, teacher_feats, teacher_logits, targets)
    ref_tri_b = _triplet_gram_dtype_ref(student_feats, targets)

    # KD / MSE never touch the Gram -> tight tolerance against the f32 reference.
    assert jnp.allclose(parts["kd_loss"], ref_kd, rtol=1e-4, atol=1e-4), \
        (parts["kd_loss"], ref_kd)
    assert jnp.allclose(parts["sim_loss"], ref_sim, rtol=1e-4, atol=1e-4), \
        (parts["sim_loss"], ref_sim)
    # Triplet: tight against the dtype-matched reference, loose against the exact one
    # (the default bf16 Gram perturbs the mined distances by ~0.1-1%).
    assert jnp.allclose(parts["tri_loss"], ref_tri_b, rtol=1e-3, atol=1e-3), \
        (parts["tri_loss"], ref_tri_b)
    assert jnp.allclose(parts["tri_loss"], ref_tri, rtol=5e-2, atol=5e-2), \
        (parts["tri_loss"], ref_tri)
    assert jnp.allclose(total, ref_kd + ref_tri_b + ref_sim, rtol=1e-3, atol=1e-3), \
        (total, ref_kd + ref_tri_b + ref_sim)

    print("KERNEL_OK")
</pallas_src>

<mosaic_0001>
module attributes {stable_mosaic.version = 11 : i64} {
  func.func @_distill_kernel(%arg0: i32, %arg1: memref<128x128xf32, #tpu.memory_space<vmem>>, %arg2: memref<128x128xbf16, #tpu.memory_space<vmem>>, %arg3: memref<128x128xf32, #tpu.memory_space<vmem>>, %arg4: memref<128x128xf32, #tpu.memory_space<vmem>>, %arg5: memref<128x128xf32, #tpu.memory_space<vmem>>, %arg6: memref<1x128xf32, #tpu.memory_space<vmem>>, %arg7: memref<128x1xi32, #tpu.memory_space<vmem>>, %arg8: memref<1x128xi32, #tpu.memory_space<vmem>>, %arg9: memref<128x1xf32, #tpu.memory_space<vmem>>, %arg10: memref<128x1xf32, #tpu.memory_space<vmem>>, %arg11: memref<128x1xf32, #tpu.memory_space<vmem>>) attributes {dimension_semantics = [#tpu.dimension_semantics<parallel>], iteration_bounds = array<i64: 1>, scalar_prefetch = 0 : i64, scratch_operands = 0 : i64, tpu.core_type = #tpu.core_type<tc>, window_params = [{transform_indices = @transform_0, window_bounds = array<i64: 128, 128>}, {pipeline_mode = #tpu.pipeline_mode<synchronous>, transform_indices = @transform_1, window_bounds = array<i64: 128, 128>}, {transform_indices = @transform_2, window_bounds = array<i64: 128, 128>}, {transform_indices = @transform_3, window_bounds = array<i64: 128, 128>}, {transform_indices = @transform_4, window_bounds = array<i64: 128, 128>}, {pipeline_mode = #tpu.pipeline_mode<synchronous>, transform_indices = @transform_5, window_bounds = array<i64: 1, 128>}, {transform_indices = @transform_6, window_bounds = array<i64: 128, 1>}, {pipeline_mode = #tpu.pipeline_mode<synchronous>, transform_indices = @transform_7, window_bounds = array<i64: 1, 128>}, {transform_indices = @transform_8, window_bounds = array<i64: 128, 1>}, {transform_indices = @transform_9, window_bounds = array<i64: 128, 1>}, {transform_indices = @transform_10, window_bounds = array<i64: 128, 1>}]} {
    %c0 = arith.constant 0 : index
    %c0_0 = arith.constant 0 : index
    %0 = vector.load %arg7[%c0, %c0_0] : memref<128x1xi32, #tpu.memory_space<vmem>>, vector<128x1xi32>
    %c0_1 = arith.constant 0 : index
    %c0_2 = arith.constant 0 : index
    %1 = vector.load %arg8[%c0_1, %c0_2] : memref<1x128xi32, #tpu.memory_space<vmem>>, vector<1x128xi32>
    %c0_i32 = arith.constant 0 : i32
    %2 = vector.broadcast %c0_i32 : i32 to vector<128x1xi32>
    %3 = arith.cmpi sge, %0, %2 : vector<128x1xi32>
    %4 = arith.extui %3 : vector<128x1xi1> to vector<128x1xi32>
    %5 = arith.sitofp %4 : vector<128x1xi32> to vector<128x1xf32>
    %c0_3 = arith.constant 0 : index
    %c0_4 = arith.constant 0 : index
    %6 = vector.load %arg4[%c0_3, %c0_4] : memref<128x128xf32, #tpu.memory_space<vmem>>, vector<128x128xf32>
    %cst = arith.constant 2.500000e-01 : f32
    %7 = vector.broadcast %cst : f32 to vector<128x128xf32>
    %8 = arith.mulf %6, %7 : vector<128x128xf32>
    %c0_5 = arith.constant 0 : index
    %c0_6 = arith.constant 0 : index
    %9 = vector.load %arg5[%c0_5, %c0_6] : memref<128x128xf32, #tpu.memory_space<vmem>>, vector<128x128xf32>
    %cst_7 = arith.constant 2.500000e-01 : f32
    %10 = vector.broadcast %cst_7 : f32 to vector<128x128xf32>
    %11 = arith.mulf %9, %10 : vector<128x128xf32>
    %cst_8 = arith.constant dense<0xFF800000> : vector<128xf32>
    %12 = vector.multi_reduction <maximumf>, %8, %cst_8 [1] : vector<128x128xf32> to vector<128xf32>
    %13 = vector.shape_cast %12 : vector<128xf32> to vector<128x1xf32>
    %14 = vector.broadcast %13 : vector<128x1xf32> to vector<128x128xf32>
    %15 = arith.subf %8, %14 : vector<128x128xf32>
    %16 = math.exp %15 : vector<128x128xf32>
    %17 = vector.broadcast %13 : vector<128x1xf32> to vector<128x128xf32>
    %18 = arith.subf %8, %17 : vector<128x128xf32>
    %cst_9 = arith.constant dense<0.000000e+00> : vector<128xf32>
    %19 = vector.multi_reduction <add>, %16, %cst_9 [1] : vector<128x128xf32> to vector<128xf32>
    %20 = vector.shape_cast %19 : vector<128xf32> to vector<128x1xf32>
    %21 = math.log %20 : vector<128x1xf32>
    %22 = vector.broadcast %21 : vector<128x1xf32> to vector<128x128xf32>
    %23 = arith.subf %18, %22 : vector<128x128xf32>
    %cst_10 = arith.constant dense<0xFF800000> : vector<128xf32>
    %24 = vector.multi_reduction <maximumf>, %11, %cst_10 [1] : vector<128x128xf32> to vector<128xf32>
    %25 = vector.shape_cast %24 : vector<128xf32> to vector<128x1xf32>
    %26 = vector.broadcast %25 : vector<128x1xf32> to vector<128x128xf32>
    %27 = arith.subf %11, %26 : vector<128x128xf32>
    %28 = math.exp %27 : vector<128x128xf32>
    %cst_11 = arith.constant dense<0.000000e+00> : vector<128xf32>
    %29 = vector.multi_reduction <add>, %28, %cst_11 [1] : vector<128x128xf32> to vector<128xf32>
    %30 = vector.shape_cast %29 : vector<128xf32> to vector<128x1xf32>
    %31 = vector.broadcast %25 : vector<128x1xf32> to vector<128x128xf32>
    %32 = arith.subf %11, %31 : vector<128x128xf32>
    %33 = math.log %30 : vector<128x1xf32>
    %34 = vector.broadcast %33 : vector<128x1xf32> to vector<128x128xf32>
    %35 = arith.subf %32, %34 : vector<128x128xf32>
    %36 = tpu.reciprocal %30 : vector<128x1xf32> -> vector<128x1xf32>
    %37 = vector.broadcast %36 : vector<128x1xf32> to vector<128x128xf32>
    %38 = arith.mulf %28, %37 : vector<128x128xf32>
    %39 = arith.subf %35, %23 : vector<128x128xf32>
    %40 = arith.mulf %38, %39 : vector<128x128xf32>
    %cst_12 = arith.constant dense<0.000000e+00> : vector<128xf32>
    %41 = vector.multi_reduction <add>, %40, %cst_12 [1] : vector<128x128xf32> to vector<128xf32>
    %42 = vector.shape_cast %41 : vector<128xf32> to vector<128x1xf32>
    %43 = arith.mulf %42, %5 : vector<128x1xf32>
    %c0_13 = arith.constant 0 : index
    %c0_14 = arith.constant 0 : index
    %44 = vector.load %arg9[%c0_13, %c0_14] : memref<128x1xf32, #tpu.memory_space<vmem>>, vector<128x1xf32>
    tpu.vector_store %arg9[%c0_13, %c0_14], %43 {strides = array<i32>} : memref<128x1xf32, #tpu.memory_space<vmem>>, vector<128x1xf32>,
    %c0_15 = arith.constant 0 : index
    %c0_16 = arith.constant 0 : index
    %45 = vector.load %arg1[%c0_15, %c0_16] : memref<128x128xf32, #tpu.memory_space<vmem>>, vector<128x128xf32>
    %46 = arith.truncf %45 : vector<128x128xf32> to vector<128x128xbf16>
    %c0_17 = arith.constant 0 : index
    %c0_18 = arith.constant 0 : index
    %47 = vector.load %arg2[%c0_17, %c0_18] : memref<128x128xbf16, #tpu.memory_space<vmem>>, vector<128x128xbf16>
    %cst_19 = arith.constant dense<0.000000e+00> : vector<128x128xf32>
    %48 = tpu.matmul %46, %47, %cst_19 {dimension_numbers = #tpu.dot_dimension_numbers<[1], [0], [0], [1], [0, 0, 1, 1], [], []>} : vector<128x128xbf16>, vector<128x128xbf16>, vector<128x128xf32> -> vector<128x128xf32>
    %49 = arith.mulf %45, %45 : vector<128x128xf32>
    %cst_20 = arith.constant dense<0.000000e+00> : vector<128xf32>
    %50 = vector.multi_reduction <add>, %49, %cst_20 [1] : vector<128x128xf32> to vector<128xf32>
    %51 = vector.shape_cast %50 : vector<128xf32> to vector<128x1xf32>
    %c0_21 = arith.constant 0 : index
    %c0_22 = arith.constant 0 : index
    %52 = vector.load %arg6[%c0_21, %c0_22] : memref<1x128xf32, #tpu.memory_space<vmem>>, vector<1x128xf32>
    %53 = vector.broadcast %51 : vector<128x1xf32> to vector<128x128xf32>
    %54 = vector.broadcast %52 : vector<1x128xf32> to vector<128x128xf32>
    %55 = arith.addf %53, %54 : vector<128x128xf32>
    %cst_23 = arith.constant 2.000000e+00 : f32
    %56 = vector.broadcast %cst_23 : f32 to vector<128x128xf32>
    %57 = arith.mulf %56, %48 : vector<128x128xf32>
    %58 = arith.subf %55, %57 : vector<128x128xf32>
    %59 = vector.broadcast %0 : vector<128x1xi32> to vector<128x128xi32>
    %60 = vector.broadcast %1 : vector<1x128xi32> to vector<128x128xi32>
    %61 = arith.cmpi eq, %59, %60 : vector<128x128xi32>
    %c0_i32_24 = arith.constant 0 : i32
    %62 = vector.broadcast %c0_i32_24 : i32 to vector<1x128xi32>
    %63 = arith.cmpi slt, %1, %62 : vector<1x128xi32>
    %cst_25 = arith.constant 0.000000e+00 : f32
    %cst_26 = arith.constant 1.000000e+30 : f32
    %64 = arith.subf %cst_25, %cst_26 : f32
    %65 = vector.broadcast %64 : f32 to vector<128x128xf32>
    %66 = arith.select %61, %58, %65 : vector<128x128xi1>, vector<128x128xf32>
    %cst_27 = arith.constant dense<0xFF800000> : vector<128xf32>
    %67 = vector.multi_reduction <maximumf>, %66, %cst_27 [1] : vector<128x128xf32> to vector<128xf32>
    %68 = vector.shape_cast %67 : vector<128xf32> to vector<128x1xf32>
    %69 = vector.broadcast %63 : vector<1x128xi1> to vector<128x128xi1>
    %70 = arith.ori %61, %69 : vector<128x128xi1>
    %cst_28 = arith.constant 1.000000e+30 : f32
    %71 = vector.broadcast %cst_28 : f32 to vector<128x128xf32>
    %72 = arith.select %70, %71, %58 : vector<128x128xi1>, vector<128x128xf32>
    %cst_29 = arith.constant dense<0x7F800000> : vector<128xf32>
    %73 = vector.multi_reduction <minimumf>, %72, %cst_29 [1] : vector<128x128xf32> to vector<128xf32>
    %74 = vector.shape_cast %73 : vector<128xf32> to vector<128x1xf32>
    %cst_30 = arith.constant 9.99999996E-13 : f32
    %75 = vector.broadcast %cst_30 : f32 to vector<128x1xf32>
    %76 = arith.maximumf %68, %75 : vector<128x1xf32>
    %77 = math.sqrt %76 : vector<128x1xf32>
    %cst_31 = arith.constant 9.99999996E-13 : f32
    %78 = vector.broadcast %cst_31 : f32 to vector<128x1xf32>
    %79 = arith.maximumf %74, %78 : vector<128x1xf32>
    %80 = math.sqrt %79 : vector<128x1xf32>
    %81 = arith.subf %77, %80 : vector<128x1xf32>
    %cst_32 = arith.constant 3.000000e-01 : f32
    %82 = vector.broadcast %cst_32 : f32 to vector<128x1xf32>
    %83 = arith.addf %81, %82 : vector<128x1xf32>
    %cst_33 = arith.constant 0.000000e+00 : f32
    %84 = vector.broadcast %cst_33 : f32 to vector<128x1xf32>
    %85 = arith.maximumf %83, %84 : vector<128x1xf32>
    %86 = arith.mulf %85, %5 : vector<128x1xf32>
    %c0_34 = arith.constant 0 : index
    %c0_35 = arith.constant 0 : index
    %87 = vector.load %arg10[%c0_34, %c0_35] : memref<128x1xf32, #tpu.memory_space<vmem>>, vector<128x1xf32>
    tpu.vector_store %arg10[%c0_34, %c0_35], %86 {strides = array<i32>} : memref<128x1xf32, #tpu.memory_space<vmem>>, vector<128x1xf32>,
    %c0_36 = arith.constant 0 : index
    %c0_37 = arith.constant 0 : index
    %88 = vector.load %arg3[%c0_36, %c0_37] : memref<128x128xf32, #tpu.memory_space<vmem>>, vector<128x128xf32>
    %89 = arith.subf %45, %88 : vector<128x128xf32>
    %90 = arith.mulf %89, %89 : vector<128x128xf32>
    %cst_38 = arith.constant dense<0.000000e+00> : vector<128xf32>
    %91 = vector.multi_reduction <add>, %90, %cst_38 [1] : vector<128x128xf32> to vector<128xf32>
    %92 = vector.shape_cast %91 : vector<128xf32> to vector<128x1xf32>
    %c0_39 = arith.constant 0 : index
    %c0_40 = arith.constant 0 : index
    %93 = vector.load %arg11[%c0_39, %c0_40] : memref<128x1xf32, #tpu.memory_space<vmem>>, vector<128x1xf32>
    tpu.vector_store %arg11[%c0_39, %c0_40], %92 {strides = array<i32>} : memref<128x1xf32, #tpu.memory_space<vmem>>, vector<128x1xf32>,
    return
  }
  func.func @transform_0(%arg0: i32) -> (i32, i32) {
    %c0_i32 = arith.constant 0 : i32
    %c0_i32_0 = arith.constant 0 : i32
    return %arg0, %c0_i32 : i32, i32
  }
  func.func @transform_1(%arg0: i32) -> (i32, i32) {
    %c0_i32 = arith.constant 0 : i32
    %c0_i32_0 = arith.constant 0 : i32
    %c0_i32_1 = arith.constant 0 : i32
    return %c0_i32, %c0_i32_0 : i32, i32
  }
  func.func @transform_2(%arg0: i32) -> (i32, i32) {
    %c0_i32 = arith.constant 0 : i32
    %c0_i32_0 = arith.constant 0 : i32
    return %arg0, %c0_i32 : i32, i32
  }
  func.func @transform_3(%arg0: i32) -> (i32, i32) {
    %c0_i32 = arith.constant 0 : i32
    %c0_i32_0 = arith.constant 0 : i32
    return %arg0, %c0_i32 : i32, i32
  }
  func.func @transform_4(%arg0: i32) -> (i32, i32) {
    %c0_i32 = arith.constant 0 : i32
    %c0_i32_0 = arith.constant 0 : i32
    return %arg0, %c0_i32 : i32, i32
  }
  func.func @transform_5(%arg0: i32) -> (i32, i32) {
    %c0_i32 = arith.constant 0 : i32
    %c0_i32_0 = arith.constant 0 : i32
    %c0_i32_1 = arith.constant 0 : i32
    return %c0_i32, %c0_i32_0 : i32, i32
  }
  func.func @transform_6(%arg0: i32) -> (i32, i32) {
    %c0_i32 = arith.constant 0 : i32
    %c0_i32_0 = arith.constant 0 : i32
    return %arg0, %c0_i32 : i32, i32
  }
  func.func @transform_7(%arg0: i32) -> (i32, i32) {
    %c0_i32 = arith.constant 0 : i32
    %c0_i32_0 = arith.constant 0 : i32
    %c0_i32_1 = arith.constant 0 : i32
    return %c0_i32, %c0_i32_0 : i32, i32
  }
  func.func @transform_8(%arg0: i32) -> (i32, i32) {
    %c0_i32 = arith.constant 0 : i32
    %c0_i32_0 = arith.constant 0 : i32
    return %arg0, %c0_i32 : i32, i32
  }
  func.func @transform_9(%arg0: i32) -> (i32, i32) {
    %c0_i32 = arith.constant 0 : i32
    %c0_i32_0 = arith.constant 0 : i32
    return %arg0, %c0_i32 : i32, i32
  }
  func.func @transform_10(%arg0: i32) -> (i32, i32) {
    %c0_i32 = arith.constant 0 : i32
    %c0_i32_0 = arith.constant 0 : i32
    return %arg0, %c0_i32 : i32, i32
  }
}

module attributes {stable_mosaic.version = 11 : i64} {
  func.func @_distill_kernel(%arg0: i32, %arg1: memref<128x128xf32, #tpu.memory_space<vmem>>, %arg2: memref<128x128xbf16, #tpu.memory_space<vmem>>, %arg3: memref<128x128xf32, #tpu.memory_space<vmem>>, %arg4: memref<128x128xf32, #tpu.memory_space<vmem>>, %arg5: memref<128x128xf32, #tpu.memory_space<vmem>>, %arg6: memref<1x128xf32, #tpu.memory_space<vmem>>, %arg7: memref<128x1xi32, #tpu.memory_space<vmem>>, %arg8: memref<1x128xi32, #tpu.memory_space<vmem>>, %arg9: memref<128x1xf32, #tpu.memory_space<vmem>>, %arg10: memref<128x1xf32, #tpu.memory_space<vmem>>, %arg11: memref<128x1xf32, #tpu.memory_space<vmem>>) attributes {dimension_semantics = [#tpu.dimension_semantics<parallel>], iteration_bounds = array<i64: 1>, scalar_prefetch = 0 : i64, scratch_operands = 0 : i64, tpu.core_type = #tpu.core_type<tc>, window_params = [{transform_indices = @transform_0, window_bounds = array<i64: 128, 128>}, {pipeline_mode = #tpu.pipeline_mode<synchronous>, transform_indices = @transform_1, window_bounds = array<i64: 128, 128>}, {transform_indices = @transform_2, window_bounds = array<i64: 128, 128>}, {transform_indices = @transform_3, window_bounds = array<i64: 128, 128>}, {transform_indices = @transform_4, window_bounds = array<i64: 128, 128>}, {pipeline_mode = #tpu.pipeline_mode<synchronous>, transform_indices = @transform_5, window_bounds = array<i64: 1, 128>}, {transform_indices = @transform_6, window_bounds = array<i64: 128, 1>}, {pipeline_mode = #tpu.pipeline_mode<synchronous>, transform_indices = @transform_7, window_bounds = array<i64: 1, 128>}, {transform_indices = @transform_8, window_bounds = array<i64: 128, 1>}, {transform_indices = @transform_9, window_bounds = array<i64: 128, 1>}, {transform_indices = @transform_10, window_bounds = array<i64: 128, 1>}]} {
    %c0 = arith.constant 0 : index
    %c0_0 = arith.constant 0 : index
    %0 = vector.load %arg7[%c0, %c0_0] : memref<128x1xi32, #tpu.memory_space<vmem>>, vector<128x1xi32>
    %c0_1 = arith.constant 0 : index
    %c0_2 = arith.constant 0 : index
    %1 = vector.load %arg8[%c0_1, %c0_2] : memref<1x128xi32, #tpu.memory_space<vmem>>, vector<1x128xi32>
    %c0_i32 = arith.constant 0 : i32
    %2 = vector.broadcast %c0_i32 : i32 to vector<128x1xi32>
    %3 = arith.cmpi sge, %0, %2 : vector<128x1xi32>
    %4 = arith.extui %3 : vector<128x1xi1> to vector<128x1xi32>
    %5 = arith.sitofp %4 : vector<128x1xi32> to vector<128x1xf32>
    %c0_3 = arith.constant 0 : index
    %c0_4 = arith.constant 0 : index
    %6 = vector.load %arg4[%c0_3, %c0_4] : memref<128x128xf32, #tpu.memory_space<vmem>>, vector<128x128xf32>
    %cst = arith.constant 2.500000e-01 : f32
    %7 = vector.broadcast %cst : f32 to vector<128x128xf32>
    %8 = arith.mulf %6, %7 : vector<128x128xf32>
    %c0_5 = arith.constant 0 : index
    %c0_6 = arith.constant 0 : index
    %9 = vector.load %arg5[%c0_5, %c0_6] : memref<128x128xf32, #tpu.memory_space<vmem>>, vector<128x128xf32>
    %cst_7 = arith.constant 2.500000e-01 : f32
    %10 = vector.broadcast %cst_7 : f32 to vector<128x128xf32>
    %11 = arith.mulf %9, %10 : vector<128x128xf32>
    %cst_8 = arith.constant dense<0xFF800000> : vector<128xf32>
    %12 = vector.multi_reduction <maximumf>, %8, %cst_8 [1] : vector<128x128xf32> to vector<128xf32>
    %13 = vector.shape_cast %12 : vector<128xf32> to vector<128x1xf32>
    %14 = vector.broadcast %13 : vector<128x1xf32> to vector<128x128xf32>
    %15 = arith.subf %8, %14 : vector<128x128xf32>
    %16 = math.exp %15 : vector<128x128xf32>
    %17 = vector.broadcast %13 : vector<128x1xf32> to vector<128x128xf32>
    %18 = arith.subf %8, %17 : vector<128x128xf32>
    %cst_9 = arith.constant dense<0.000000e+00> : vector<128xf32>
    %19 = vector.multi_reduction <add>, %16, %cst_9 [1] : vector<128x128xf32> to vector<128xf32>
    %20 = vector.shape_cast %19 : vector<128xf32> to vector<128x1xf32>
    %21 = math.log %20 : vector<128x1xf32>
    %22 = vector.broadcast %21 : vector<128x1xf32> to vector<128x128xf32>
    %23 = arith.subf %18, %22 : vector<128x128xf32>
    %cst_10 = arith.constant dense<0xFF800000> : vector<128xf32>
    %24 = vector.multi_reduction <maximumf>, %11, %cst_10 [1] : vector<128x128xf32> to vector<128xf32>
    %25 = vector.shape_cast %24 : vector<128xf32> to vector<128x1xf32>
    %26 = vector.broadcast %25 : vector<128x1xf32> to vector<128x128xf32>
    %27 = arith.subf %11, %26 : vector<128x128xf32>
    %28 = math.exp %27 : vector<128x128xf32>
    %cst_11 = arith.constant dense<0.000000e+00> : vector<128xf32>
    %29 = vector.multi_reduction <add>, %28, %cst_11 [1] : vector<128x128xf32> to vector<128xf32>
    %30 = vector.shape_cast %29 : vector<128xf32> to vector<128x1xf32>
    %31 = vector.broadcast %25 : vector<128x1xf32> to vector<128x128xf32>
    %32 = arith.subf %11, %31 : vector<128x128xf32>
    %33 = math.log %30 : vector<128x1xf32>
    %34 = vector.broadcast %33 : vector<128x1xf32> to vector<128x128xf32>
    %35 = arith.subf %32, %34 : vector<128x128xf32>
    %36 = tpu.reciprocal %30 : vector<128x1xf32> -> vector<128x1xf32>
    %37 = vector.broadcast %36 : vector<128x1xf32> to vector<128x128xf32>
    %38 = arith.mulf %28, %37 : vector<128x128xf32>
    %39 = arith.subf %35, %23 : vector<128x128xf32>
    %40 = arith.mulf %38, %39 : vector<128x128xf32>
    %cst_12 = arith.constant dense<0.000000e+00> : vector<128xf32>
    %41 = vector.multi_reduction <add>, %40, %cst_12 [1] : vector<128x128xf32> to vector<128xf32>
    %42 = vector.shape_cast %41 : vector<128xf32> to vector<128x1xf32>
    %43 = arith.mulf %42, %5 : vector<128x1xf32>
    %c0_13 = arith.constant 0 : index
    %c0_14 = arith.constant 0 : index
    %44 = vector.load %arg9[%c0_13, %c0_14] : memref<128x1xf32, #tpu.memory_space<vmem>>, vector<128x1xf32>
    tpu.vector_store %arg9[%c0_13, %c0_14], %43 {strides = array<i32>} : memref<128x1xf32, #tpu.memory_space<vmem>>, vector<128x1xf32>,
    %c0_15 = arith.constant 0 : index
    %c0_16 = arith.constant 0 : index
    %45 = vector.load %arg1[%c0_15, %c0_16] : memref<128x128xf32, #tpu.memory_space<vmem>>, vector<128x128xf32>
    %46 = arith.truncf %45 : vector<128x128xf32> to vector<128x128xbf16>
    %c0_17 = arith.constant 0 : index
    %c0_18 = arith.constant 0 : index
    %47 = vector.load %arg2[%c0_17, %c0_18] : memref<128x128xbf16, #tpu.memory_space<vmem>>, vector<128x128xbf16>
    %cst_19 = arith.constant dense<0.000000e+00> : vector<128x128xf32>
    %48 = tpu.matmul %46, %47, %cst_19 {dimension_numbers = #tpu.dot_dimension_numbers<[1], [0], [0], [1], [0, 0, 1, 1], [], []>} : vector<128x128xbf16>, vector<128x128xbf16>, vector<128x128xf32> -> vector<128x128xf32>
    %49 = arith.mulf %45, %45 : vector<128x128xf32>
    %cst_20 = arith.constant dense<0.000000e+00> : vector<128xf32>
    %50 = vector.multi_reduction <add>, %49, %cst_20 [1] : vector<128x128xf32> to vector<128xf32>
    %51 = vector.shape_cast %50 : vector<128xf32> to vector<128x1xf32>
    %c0_21 = arith.constant 0 : index
    %c0_22 = arith.constant 0 : index
    %52 = vector.load %arg6[%c0_21, %c0_22] : memref<1x128xf32, #tpu.memory_space<vmem>>, vector<1x128xf32>
    %53 = vector.broadcast %51 : vector<128x1xf32> to vector<128x128xf32>
    %54 = vector.broadcast %52 : vector<1x128xf32> to vector<128x128xf32>
    %55 = arith.addf %53, %54 : vector<128x128xf32>
    %cst_23 = arith.constant 2.000000e+00 : f32
    %56 = vector.broadcast %cst_23 : f32 to vector<128x128xf32>
    %57 = arith.mulf %56, %48 : vector<128x128xf32>
    %58 = arith.subf %55, %57 : vector<128x128xf32>
    %59 = vector.broadcast %0 : vector<128x1xi32> to vector<128x128xi32>
    %60 = vector.broadcast %1 : vector<1x128xi32> to vector<128x128xi32>
    %61 = arith.cmpi eq, %59, %60 : vector<128x128xi32>
    %c0_i32_24 = arith.constant 0 : i32
    %62 = vector.broadcast %c0_i32_24 : i32 to vector<1x128xi32>
    %63 = arith.cmpi slt, %1, %62 : vector<1x128xi32>
    %cst_25 = arith.constant 0.000000e+00 : f32
    %cst_26 = arith.constant 1.000000e+30 : f32
    %64 = arith.subf %cst_25, %cst_26 : f32
    %65 = vector.broadcast %64 : f32 to vector<128x128xf32>
    %66 = arith.select %61, %58, %65 : vector<128x128xi1>, vector<128x128xf32>
    %cst_27 = arith.constant dense<0xFF800000> : vector<128xf32>
    %67 = vector.multi_reduction <maximumf>, %66, %cst_27 [1] : vector<128x128xf32> to vector<128xf32>
    %68 = vector.shape_cast %67 : vector<128xf32> to vector<128x1xf32>
    %69 = vector.broadcast %63 : vector<1x128xi1> to vector<128x128xi1>
    %70 = arith.ori %61, %69 : vector<128x128xi1>
    %cst_28 = arith.constant 1.000000e+30 : f32
    %71 = vector.broadcast %cst_28 : f32 to vector<128x128xf32>
    %72 = arith.select %70, %71, %58 : vector<128x128xi1>, vector<128x128xf32>
    %cst_29 = arith.constant dense<0x7F800000> : vector<128xf32>
    %73 = vector.multi_reduction <minimumf>, %72, %cst_29 [1] : vector<128x128xf32> to vector<128xf32>
    %74 = vector.shape_cast %73 : vector<128xf32> to vector<128x1xf32>
    %cst_30 = arith.constant 9.99999996E-13 : f32
    %75 = vector.broadcast %cst_30 : f32 to vector<128x1xf32>
    %76 = arith.maximumf %68, %75 : vector<128x1xf32>
    %77 = math.sqrt %76 : vector<128x1xf32>
    %cst_31 = arith.constant 9.99999996E-13 : f32
    %78 = vector.broadcast %cst_31 : f32 to vector<128x1xf32>
    %79 = arith.maximumf %74, %78 : vector<128x1xf32>
    %80 = math.sqrt %79 : vector<128x1xf32>
    %81 = arith.subf %77, %80 : vector<128x1xf32>
    %cst_32 = arith.constant 3.000000e-01 : f32
    %82 = vector.broadcast %cst_32 : f32 to vector<128x1xf32>
    %83 = arith.addf %81, %82 : vector<128x1xf32>
    %cst_33 = arith.constant 0.000000e+00 : f32
    %84 = vector.broadcast %cst_33 : f32 to vector<128x1xf32>
    %85 = arith.maximumf %83, %84 : vector<128x1xf32>
    %86 = arith.mulf %85, %5 : vector<128x1xf32>
    %c0_34 = arith.constant 0 : index
    %c0_35 = arith.constant 0 : index
    %87 = vector.load %arg10[%c0_34, %c0_35] : memref<128x1xf32, #tpu.memory_space<vmem>>, vector<128x1xf32>
    tpu.vector_store %arg10[%c0_34, %c0_35], %86 {strides = array<i32>} : memref<128x1xf32, #tpu.memory_space<vmem>>, vector<128x1xf32>,
    %c0_36 = arith.constant 0 : index
    %c0_37 = arith.constant 0 : index
    %88 = vector.load %arg3[%c0_36, %c0_37] : memref<128x128xf32, #tpu.memory_space<vmem>>, vector<128x128xf32>
    %89 = arith.subf %45, %88 : vector<128x128xf32>
    %90 = arith.mulf %89, %89 : vector<128x128xf32>
    %cst_38 = arith.constant dense<0.000000e+00> : vector<128xf32>
    %91 = vector.multi_reduction <add>, %90, %cst_38 [1] : vector<128x128xf32> to vector<128xf32>
    %92 = vector.shape_cast %91 : vector<128xf32> to vector<128x1xf32>
    %c0_39 = arith.constant 0 : index
    %c0_40 = arith.constant 0 : index
    %93 = vector.load %arg11[%c0_39, %c0_40] : memref<128x1xf32, #tpu.memory_space<vmem>>, vector<128x1xf32>
    tpu.vector_store %arg11[%c0_39, %c0_40], %92 {strides = array<i32>} : memref<128x1xf32, #tpu.memory_space<vmem>>, vector<128x1xf32>,
    return
  }
  func.func @transform_0(%arg0: i32) -> (i32, i32) {
    %c0_i32 = arith.constant 0 : i32
    %c0_i32_0 = arith.constant 0 : i32
    return %arg0, %c0_i32 : i32, i32
  }
  func.func @transform_1(%arg0: i32) -> (i32, i32) {
    %c0_i32 = arith.constant 0 : i32
    %c0_i32_0 = arith.constant 0 : i32
    %c0_i32_1 = arith.constant 0 : i32
    return %c0_i32, %c0_i32_0 : i32, i32
  }
  func.func @transform_2(%arg0: i32) -> (i32, i32) {
    %c0_i32 = arith.constant 0 : i32
    %c0_i32_0 = arith.constant 0 : i32
    return %arg0, %c0_i32 : i32, i32
  }
  func.func @transform_3(%arg0: i32) -> (i32, i32) {
    %c0_i32 = arith.constant 0 : i32
    %c0_i32_0 = arith.constant 0 : i32
    return %arg0, %c0_i32 : i32, i32
  }
  func.func @transform_4(%arg0: i32) -> (i32, i32) {
    %c0_i32 = arith.constant 0 : i32
    %c0_i32_0 = arith.constant 0 : i32
    return %arg0, %c0_i32 : i32, i32
  }
  func.func @transform_5(%arg0: i32) -> (i32, i32) {
    %c0_i32 = arith.constant 0 : i32
    %c0_i32_0 = arith.constant 0 : i32
    %c0_i32_1 = arith.constant 0 : i32
    return %c0_i32, %c0_i32_0 : i32, i32
  }
  func.func @transform_6(%arg0: i32) -> (i32, i32) {
    %c0_i32 = arith.constant 0 : i32
    %c0_i32_0 = arith.constant 0 : i32
    return %arg0, %c0_i32 : i32, i32
  }
  func.func @transform_7(%arg0: i32) -> (i32, i32) {
    %c0_i32 = arith.constant 0 : i32
    %c0_i32_0 = arith.constant 0 : i32
    %c0_i32_1 = arith.constant 0 : i32
    return %c0_i32, %c0_i32_0 : i32, i32
  }
  func.func @transform_8(%arg0: i32) -> (i32, i32) {
    %c0_i32 = arith.constant 0 : i32
    %c0_i32_0 = arith.constant 0 : i32
    return %arg0, %c0_i32 : i32, i32
  }
  func.func @transform_9(%arg0: i32) -> (i32, i32) {
    %c0_i32 = arith.constant 0 : i32
    %c0_i32_0 = arith.constant 0 : i32
    return %arg0, %c0_i32 : i32, i32
  }
  func.func @transform_10(%arg0: i32) -> (i32, i32) {
    %c0_i32 = arith.constant 0 : i32
    %c0_i32_0 = arith.constant 0 : i32
    return %arg0, %c0_i32 : i32, i32
  }
}

</mosaic_0001>

<bundles_post_ra>
// kernel: tpu_custom_call.1
= control target key start
LH: loop header
LB: loop body
LE: loop exit
PB: predicated region body
PF: predicated region fallthrough
CT: control target
= control target key end

     0   :  { %16 = vsyncpa [#allocation3], 0  ;;  %s3935_s0 = inlined_call_operand.vmem [shape: f32[128,128], index: 0, kind: input, shape index: {}]   ;;  %s3936_s1 = inlined_call_operand.hbm [shape: bf16[128,128], index: 1, kind: input, shape index: {}]   ;;  %s3937_s2 = inlined_call_operand.hbm [shape: f32[128,128], index: 2, kind: input, shape index: {}]   ;;  %s3938_s3 = inlined_call_operand.hbm [shape: f32[128,128], index: 3, kind: input, shape index: {}]   ;;  %s3939_s4 = inlined_call_operand.hbm [shape: f32[128,128], index: 4, kind: input, shape index: {}]   ;;  %s3940_s5 = inlined_call_operand.vmem [shape: f32[1,128], index: 5, kind: input, shape index: {}]   ;;  %s3941_s6 = inlined_call_operand.vmem [shape: s32[128,1], index: 6, kind: input, shape index: {}]   ;;  %s3942_s7 = inlined_call_operand.vmem [shape: s32[1,128], index: 7, kind: input, shape index: {}]   ;;  %s3943_s8 = inlined_call_operand.vmem [shape: f32[128,1], index: 8, kind: output, shape index: {0}]   ;;  %s3944_s9 = inlined_call_operand.vmem [shape: f32[128,1], index: 9, kind: output, shape index: {1}]   ;;  %s3945_s10 = inlined_call_operand.vmem [shape: f32[128,1], index: 10, kind: output, shape index: {2}]  }
   0x1   :  { %17 = vsyncpa [#allocation5], 0 }
   0x2   :  { %18 = vsyncpa [#allocation8], 0  ;;  %s2047_s13 = smov [#allocation4]   ;;  %s1953_s17 = scalar_lea.hbm %s3937_s2, 2048 }
   0x3   :  { %s38_s14 = sshll.u32 %s2047_s13, 4  ;;  %p1954_p0 = scmp.ne.s32.totalorder %s3937_s2, %s1953_s17  ;;  %s39_s14 = int_to_ptr.vmem [resolvable:$true] %s38_s14 }
   0x4   :  { %p1957_p1 = scmp.lt.u32.totalorder %s1953_s17, %s3937_s2 }
   0x6   :  { %p1959_p2 = pnand %p1957_p1, %p1954_p0 }
   0x8   :  { %1962 = shalt.err (!%p1959_p2)
}
   0x9   :  { %s1963_s22 = scalar_lea.vmem %s39_s14, 2048  ;;  %p1968_p4 = scmp.lt.s32.totalorder %s39_s14, %s39_s14 }
   0xa   :  { %p1964_p3 = scmp.ne.s32.totalorder %s39_s14, %s1963_s22  ;;  %p1969_p5 = scmp.lt.s32.totalorder %s1963_s22, %s1963_s22 }
   0xc   :  { %p1970_p6 = por %p1969_p5, %p1968_p4 }
   0xe   :  { %p1971_p7 = pnand %p1970_p6, %p1964_p3 }
  0x10   :  { %1974 = shalt.err (!%p1971_p7)
}
  0x11   :  { %s2048_s23 = smov 128   ;;  %s2049_s24 = smov 8  }
  0x12   :  { %44 = dma.hbm_to_vmem [thread:$0]  %s3937_s2, 2048, %s39_s14, [#allocation5], %s2048_s23, %s2048_s23, %s2049_s24  }
  0x13   :  { %s2050_s27 = smov [#allocation2]   ;;  %s1975_s11 = scalar_lea.hbm %s3936_s1, 1024 }
  0x14   :  { %s26_s28 = sshll.u32 %s2050_s27, 4  ;;  %p1976_p8 = scmp.ne.s32.totalorder %s3936_s1, %s1975_s11  ;;  %s27_s28 = int_to_ptr.vmem [resolvable:$true] %s26_s28 }
  0x15   :  { %p1979_p9 = scmp.lt.u32.totalorder %s1975_s11, %s3936_s1 }
  0x17   :  { %p1981_p10 = pnand %p1979_p9, %p1976_p8 }
  0x19   :  { %1984 = shalt.err (!%p1981_p10)
}
  0x1a   :  { %s1985_s17 = scalar_lea.vmem %s27_s28, 1024  ;;  %p1990_p12 = scmp.lt.s32.totalorder %s27_s28, %s27_s28 }
  0x1b   :  { %p1986_p11 = scmp.ne.s32.totalorder %s27_s28, %s1985_s17  ;;  %p1991_p13 = scmp.lt.s32.totalorder %s1985_s17, %s1985_s17 }
  0x1d   :  { %p1992_p0 = por %p1991_p13, %p1990_p12 }
  0x1f   :  { %p1993_p1 = pnand %p1992_p0, %p1986_p11 }
  0x21   :  { %1996 = shalt.err (!%p1993_p1)
}
  0x22   :  { %s2051_s2 = smov 64   ;;  %s2052_s14 = smov 4  }
  0x23   :  { %32 = dma.hbm_to_vmem [thread:$0]  %s3936_s1, 1024, %s27_s28, [#allocation3], %s2051_s2, %s2051_s2, %s2052_s14  }
  0x24   :  { %s2053_s20 = smov [#allocation6]   ;;  %s2054_s22 = smov [#allocation7]  }
  0x25   :  { %s50_s21 = sshll.u32 %s2053_s20, 4  ;;  %s62_s25 = sshll.u32 %s2054_s22, 4  ;;  %s51_s21 = int_to_ptr.vmem [resolvable:$true] %s50_s21  ;;  %s2139_s25 = int_to_ptr.vmem [resolvable:$true] %s62_s25 }
  0x26   :  { %s1997_s29 = scalar_lea.hbm %s3938_s3, 2048 }
  0x27   :  { %p1998_p2 = scmp.ne.s32.totalorder %s3938_s3, %s1997_s29  ;;  %p2001_p3 = scmp.lt.u32.totalorder %s1997_s29, %s3938_s3 }
  0x29   :  { %p2003_p4 = pnand %p2001_p3, %p1998_p2 }
  0x2b   :  { %2006 = shalt.err (!%p2003_p4)
}
  0x2c   :  { %s2007_s1 = scalar_lea.vmem %s51_s21, 2048  ;;  %p2012_p6 = scmp.lt.s32.totalorder %s51_s21, %s51_s21 }
  0x2d   :  { %p2008_p5 = scmp.ne.s32.totalorder %s51_s21, %s2007_s1  ;;  %p2013_p7 = scmp.lt.s32.totalorder %s2007_s1, %s2007_s1 }
  0x2f   :  { %p2014_p8 = por %p2013_p7, %p2012_p6 }
  0x31   :  { %p2015_p9 = pnand %p2014_p8, %p2008_p5 }
  0x33   :  { %2018 = shalt.err (!%p2015_p9)
}
  0x34   :  { %56 = dma.hbm_to_vmem [thread:$0]  %s3938_s3, 2048, %s51_s21, [#allocation5], %s2048_s23, %s2048_s23, %s2049_s24  }
  0x35   :  { %s2019_s2 = scalar_lea.hbm %s3939_s4, 2048 }
  0x36   :  { %p2020_p10 = scmp.ne.s32.totalorder %s3939_s4, %s2019_s2  ;;  %p2023_p11 = scmp.lt.u32.totalorder %s2019_s2, %s3939_s4 }
  0x38   :  { %p2025_p12 = pnand %p2023_p11, %p2020_p10 }
  0x3a   :  { %2028 = shalt.err (!%p2025_p12)
}
  0x3b   :  { %s2029_s22 = scalar_lea.vmem %s2139_s25, 2048  ;;  %p2034_p0 = scmp.lt.s32.totalorder %s2139_s25, %s2139_s25 }
  0x3c   :  { %p2030_p13 = scmp.ne.s32.totalorder %s2139_s25, %s2029_s22  ;;  %p2035_p1 = scmp.lt.s32.totalorder %s2029_s22, %s2029_s22 }
  0x3e   :  { %p2036_p2 = por %p2035_p1, %p2034_p0 }
  0x40   :  { %p2037_p3 = pnand %p2036_p2, %p2030_p13 }
  0x42   :  { %2040 = shalt.err (!%p2037_p3)
}
  0x43   :  { %68 = dma.hbm_to_vmem [thread:$0]  %s3939_s4, 2048, %s2139_s25, [#allocation8], %s2048_s23, %s2048_s23, %s2049_s24  }
  0x44   :  { %2041 = dma.done.wait [#allocation3], 1024  }
  0x45   :  { %2042 = vsyncadd [#allocation3], 4294966272 }
  0x46   :  { %2043 = dma.done.wait [#allocation5], 4096  }
  0x47   :  { %2044 = vsyncadd [#allocation5], 4294963200 }
  0x48   :  { %2045 = dma.done.wait [#allocation8], 2048  }
  0x49   :  { %2046 = vsyncadd [#allocation8], 4294965248  ;;  %v153_v0 = vld [vmem:[#allocation6] sm:$0xff]  ;;  %v155_v1 = vld [vmem:[#allocation6 + $0x10] sm:$0xff] }
  0x4a   :  { %v154_v2 = vld [vmem:[#allocation6 + $0x8] sm:$0xff]  ;;  %v2176_v3 = vmul.f32 0.25, %v153_v0  ;;  %v2178_v4 = vmul.f32 0.25, %v155_v1  ;;  %v156_v5 = vld [vmem:[#allocation6 + $0x18] sm:$0xff]  ;;  %v157_v8 = vld [vmem:[#allocation6 + $0x20] sm:$0xff] }
  0x4b   :  { %v2182_v6 = vmul.f32 0.25, %v154_v2  ;;  %v2184_v7 = vmul.f32 0.25, %v156_v5  ;;  %v1689_v9 = vld [vmem:[#allocation2] sm:$0xff]   ;;  %v158_v10 = vld [vmem:[#allocation6 + $0x28] sm:$0xff]  ;;  %v2188_v12 = vmul.f32 0.25, %v157_v8  ;;  %v159_v14 = vld [vmem:[#allocation6 + $0x30] sm:$0xff] }
  0x4c   :  { %217 = vmax.xlane.f32.xlu0 %v2176_v3  ;;  %221 = vmax.xlane.f32.xlu1 %v2178_v4  ;;  %v1690_v11 = vld [vmem:[#allocation2 + $0x8] sm:$0xff]   ;;  %v2190_v13 = vmul.f32 0.25, %v158_v10  ;;  %v160_v15 = vld [vmem:[#allocation6 + $0x38] sm:$0xff]  ;;  %v1691_v16 = vld [vmem:[#allocation2 + $0x10] sm:$0xff]   ;;  %v2194_v17 = vmul.f32 0.25, %v159_v14 }
  0x4d   :  { %1629 = vmatprep.subr.bf16.mxu0 %v1689_v9  ;;  %1661 = vmatprep.subr.bf16.mxu1 %v1689_v9  ;;  %v2196_v18 = vmul.f32 0.25, %v160_v15  ;;  %v161_v19 = vld [vmem:[#allocation6 + $0x40] sm:$0xff]  ;;  %v162_v20 = vld [vmem:[#allocation6 + $0x48] sm:$0xff]  ;;  %v1692_v21 = vld [vmem:[#allocation2 + $0x18] sm:$0xff]  }
  0x4e   :  { %1630 = vmatpush3.bf16.msra.mxu0 %v1689_v9  ;;  %1669 = vmatpush3.bf16.msra.mxu1 %v1689_v9  ;;  %v2200_v22 = vmul.f32 0.25, %v161_v19  ;;  %v2202_v23 = vmul.f32 0.25, %v162_v20  ;;  %v163_v24 = vld [vmem:[#allocation6 + $0x50] sm:$0xff]  ;;  %v164_v25 = vld [vmem:[#allocation6 + $0x58] sm:$0xff]  ;;  %v1693_v26 = vld [vmem:[#allocation2 + $0x20] sm:$0xff]  }
  0x4f   :  { %1631 = vmatprep.subr.bf16.mxu0 %v1690_v11  ;;  %1662 = vmatprep.subr.bf16.mxu1 %v1690_v11  ;;  %v2206_v27 = vmul.f32 0.25, %v163_v24  ;;  %v2208_v28 = vmul.f32 0.25, %v164_v25  ;;  %v2213_v29 = vld [vmem:[%s3935_s0] sm:$0xff]  ;;  %v2218_v30 = vld [vmem:[%s3935_s0 + $0x8] sm:$0xff]  ;;  %v167_v39 = vld [vmem:[#allocation6 + $0x70] sm:$0xff] }
  0x50   :  { %219 = vmax.xlane.f32.xlu0 %v2182_v6  ;;  %223 = vmax.xlane.f32.xlu1 %v2184_v7  ;;  %v165_v31 = vld [vmem:[#allocation6 + $0x60] sm:$0xff]  ;;  %v166_v32 = vld [vmem:[#allocation6 + $0x68] sm:$0xff]  ;;  %v682_v34 = vpack.c.bf16 %v2218_v30, %v2213_v29  ;;  %v168_v40 = vld [vmem:[#allocation6 + $0x78] sm:$0xff]  ;;  %v2242_v43 = vmul.f32 0.25, %v167_v39 }
  0x51   :  { %v1694_v33 = vld [vmem:[#allocation2 + $0x28] sm:$0xff]   ;;  %v2224_v35 = vmul.f32 0.25, %v165_v31  ;;  %v2226_v36 = vmul.f32 0.25, %v166_v32  ;;  %v2231_v37 = vld [vmem:[%s3935_s0 + $0x40] sm:$0xff]  ;;  %v1695_v41 = vld [vmem:[#allocation2 + $0x30] sm:$0xff]   ;;  %v2244_v44 = vmul.f32 0.25, %v168_v40 }
  0x52   :  { %1632 = vmatpush3.bf16.msra.mxu0 %v1690_v11  ;;  %1670 = vmatpush3.bf16.msra.mxu1 %v1690_v11  ;;  %v2236_v38 = vld [vmem:[%s3935_s0 + $0x48] sm:$0xff]  ;;  %v185_v45 = vld [vmem:[#allocation7] sm:$0xff]  ;;  %v1696_v47 = vld [vmem:[#allocation2 + $0x38] sm:$0xff]  }
  0x53   :  { %1633 = vmatprep.subr.bf16.mxu0 %v1691_v16  ;;  %1663 = vmatprep.subr.bf16.mxu1 %v1691_v16  ;;  %v686_v42 = vpack.c.bf16 %v2236_v38, %v2231_v37  ;;  %v186_v46 = vld [vmem:[#allocation7 + $0x8] sm:$0xff]  ;;  %v2249_v48 = vld [vmem:[%s3935_s0 + $0x10] sm:$0xff]  ;;  %v2254_v49 = vld [vmem:[%s3935_s0 + $0x18] sm:$0xff]  ;;  %v2258_v50 = vmul.f32 0.25, %v185_v45 }
  0x54   :  { %225 = vmax.xlane.f32.xlu0 %v2188_v12  ;;  %227 = vmax.xlane.f32.xlu1 %v2190_v13  ;;  %v2260_v51 = vmul.f32 0.25, %v186_v46  ;;  %v2265_v52 = vld [vmem:[%s3935_s0 + $0x20] sm:$0xff]  ;;  %v2270_v53 = vld [vmem:[%s3935_s0 + $0x28] sm:$0xff]  ;;  %v187_v54 = vld [vmem:[#allocation7 + $0x10] sm:$0xff]  ;;  %v683_v56 = vpack.c.bf16 %v2254_v49, %v2249_v48 }
  0x55   :  { %1645 = vmatprep.mubr.bf16.mxu0 %v682_v34  ;;  %1653 = vmatprep.mubr.bf16.mxu1 %v686_v42  ;;  %v188_v55 = vld [vmem:[#allocation7 + $0x18] sm:$0xff]  ;;  %v2277_v57 = vld [vmem:[%s3935_s0 + $0x50] sm:$0xff]  ;;  %v684_v59 = vpack.c.bf16 %v2270_v53, %v2265_v52  ;;  %v2289_v60 = vld [vmem:[%s3935_s0 + $0x60] sm:$0xff]  ;;  %v2298_v62 = vmul.f32 0.25, %v187_v54 }
  0x56   :  { %1634 = vmatpush3.bf16.msra.mxu0 %v1691_v16  ;;  %1671 = vmatpush3.bf16.msra.mxu1 %v1691_v16  ;;  %v2282_v58 = vld [vmem:[%s3935_s0 + $0x58] sm:$0xff]  ;;  %v2294_v61 = vld [vmem:[%s3935_s0 + $0x68] sm:$0xff]  ;;  %v2300_v63 = vmul.f32 0.25, %v188_v55  ;;  %v189_v0 = vld [vmem:[#allocation7 + $0x20] sm:$0xff] }
  0x57   :  { %1635 = vmatprep.subr.bf16.mxu0 %v1692_v21  ;;  %1664 = vmatprep.subr.bf16.mxu1 %v1692_v21  ;;  %v190_v1 = vld [vmem:[#allocation7 + $0x28] sm:$0xff]  ;;  %v687_v2 = vpack.c.bf16 %v2282_v58, %v2277_v57  ;;  %v688_v5 = vpack.c.bf16 %v2294_v61, %v2289_v60  ;;  %v672_v8 = vld [vmem:[%s3935_s0 + $0x30] sm:$0xff]  ;;  %v673_v9 = vld [vmem:[%s3935_s0 + $0x38] sm:$0xff]  ;;  %v2314_v10 = vmul.f32 0.25, %v189_v0  ;;  %v851_v0 = vmul.f32 %v2213_v29, %v2213_v29 }
  0x58   :  { %229 = vmax.xlane.f32.xlu0 %v2194_v17  ;;  %231 = vmax.xlane.f32.xlu1 %v2196_v18  ;;  %v2316_v11 = vmul.f32 0.25, %v190_v1  ;;  %v191_v14 = vld [vmem:[#allocation7 + $0x30] sm:$0xff]  ;;  %v192_v15 = vld [vmem:[#allocation7 + $0x38] sm:$0xff]  ;;  %v685_v16 = vpack.c.bf16 %v673_v9, %v672_v8  ;;  %v193_v25 = vld [vmem:[#allocation7 + $0x40] sm:$0xff]  ;;  %v852_v1 = vmul.f32 %v2218_v30, %v2218_v30  ;;  %v857_v29 = vmul.f32 %v672_v8, %v672_v8 }
  0x59   :  { %v680_v19 = vld [vmem:[%s3935_s0 + $0x70] sm:$0xff]  ;;  %v681_v20 = vld [vmem:[%s3935_s0 + $0x78] sm:$0xff]  ;;  %v2328_v24 = vmul.f32 0.25, %v192_v15  ;;  %v2332_v32 = vmul.f32 0.25, %v193_v25  ;;  %v197_v42 = vld [vmem:[#allocation7 + $0x60] sm:$0xff]  ;;  %v856_v15 = vmul.f32 %v2270_v53, %v2270_v53  ;;  %v858_v30 = vmul.f32 %v673_v9, %v673_v9 }
  0x5a   :  { %1636 = vmatpush3.bf16.msra.mxu0 %v1692_v21  ;;  %1672 = vmatpush3.bf16.msra.mxu1 %v1692_v21  ;;  %v2326_v21 = vmul.f32 0.25, %v191_v14  ;;  %v689_v31 = vpack.c.bf16 %v681_v20, %v680_v19  ;;  %v195_v34 = vld [vmem:[#allocation7 + $0x50] sm:$0xff]  ;;  %v196_v39 = vld [vmem:[#allocation7 + $0x58] sm:$0xff]  ;;  %v198_v45 = vld [vmem:[#allocation7 + $0x68] sm:$0xff]  ;;  %v2344_v46 = vmul.f32 0.25, %v197_v42  ;;  %v855_v14 = vmul.f32 %v2265_v52, %v2265_v52 }
  0x5b   :  { %1637 = vmatprep.subr.bf16.mxu0 %v1693_v26  ;;  %1665 = vmatprep.subr.bf16.mxu1 %v1693_v26  ;;  %v2338_v40 = vmul.f32 0.25, %v195_v34  ;;  %v199_v54 = vld [vmem:[#allocation7 + $0x70] sm:$0xff]  ;;  %v200_v55 = vld [vmem:[#allocation7 + $0x78] sm:$0xff]  ;;  %v861_v52 = vmul.f32 %v2277_v57, %v2277_v57  ;;  %v862_v53 = vmul.f32 %v2282_v58, %v2282_v58  ;;  %v863_v8 = vmul.f32 %v2289_v60, %v2289_v60 }
  0x5c   :  { %233 = vmax.xlane.f32.xlu0 %v2200_v22  ;;  %235 = vmax.xlane.f32.xlu1 %v2202_v23  ;;  %v864_v9 = vmul.f32 %v2294_v61, %v2294_v61 }
  0x5e   :  { %1638 = vmatpush3.bf16.msra.mxu0 %v1693_v26  ;;  %1673 = vmatpush3.bf16.msra.mxu1 %v1693_v26  ;;  %v194_v26 = vld [vmem:[#allocation7 + $0x48] sm:$0xff] }
  0x5f   :  { %1639 = vmatprep.subr.bf16.mxu0 %v1694_v33  ;;  %1666 = vmatprep.subr.bf16.mxu1 %v1694_v33 }
  0x60   :  { %237 = vmax.xlane.f32.xlu0 %v2206_v27  ;;  %239 = vmax.xlane.f32.xlu1 %v2208_v28 }
  0x62   :  { %1640 = vmatpush3.bf16.msra.mxu0 %v1694_v33  ;;  %1674 = vmatpush3.bf16.msra.mxu1 %v1694_v33  ;;  %v2334_v33 = vmul.f32 0.25, %v194_v26 }
  0x63   :  { %1641 = vmatprep.subr.bf16.mxu0 %v1695_v41  ;;  %1667 = vmatprep.subr.bf16.mxu1 %v1695_v41 }
  0x64   :  { %241 = vmax.xlane.f32.xlu0 %v2224_v35  ;;  %243 = vmax.xlane.f32.xlu1 %v2226_v36 }
  0x66   :  { %1642 = vmatpush3.bf16.msra.mxu0 %v1695_v41  ;;  %1675 = vmatpush3.bf16.msra.mxu1 %v1695_v41  ;;  %v2340_v41 = vmul.f32 0.25, %v196_v39 }
  0x67   :  { %1643 = vmatprep.subr.bf16.mxu0 %v1696_v47  ;;  %1668 = vmatprep.subr.bf16.mxu1 %v1696_v47 }
  0x68   :  { %245 = vmax.xlane.f32.xlu0 %v2242_v43  ;;  %247 = vmax.xlane.f32.xlu1 %v2244_v44 }
  0x6a   :  { %1644 = vmatpush3.bf16.msra.mxu0 %v1696_v47  ;;  %1676 = vmatpush3.bf16.msra.mxu1 %v1696_v47  ;;  %v2346_v47 = vmul.f32 0.25, %v198_v45 }
  0x6c   :  { %377 = vmax.xlane.f32.xlu0 %v2258_v50  ;;  %379 = vmax.xlane.f32.xlu1 %v2260_v51 }
  0x6d   :  { %1646 = vmatmul.mubr.bf16.vlgmr.msra.gmra.mrb[0].mxu0 %v683_v56  ;;  %1654 = vmatmul.mubr.bf16.vlgmr.msra.gmra.mrb[0].mxu1 %v687_v2  ;;  %v2350_v56 = vmul.f32 0.25, %v199_v54  ;;  %v853_v2 = vmul.f32 %v2249_v48, %v2249_v48  ;;  %v859_v48 = vmul.f32 %v2231_v37, %v2231_v37  ;;  %v865_v37 = vmul.f32 %v680_v19, %v680_v19 }
  0x6e   :  { %1649 = vmatprep.mubr.bf16.mxu0 %v684_v59  ;;  %1657 = vmatprep.mubr.bf16.mxu1 %v688_v5  ;;  %v2352_v59 = vmul.f32 0.25, %v200_v55  ;;  %v854_v5 = vmul.f32 %v2254_v49, %v2254_v49  ;;  %v860_v49 = vmul.f32 %v2236_v38, %v2236_v38  ;;  %v866_v38 = vmul.f32 %v681_v20, %v681_v20 }
  0x70   :  { %381 = vmax.xlane.f32.xlu0 %v2298_v62  ;;  %383 = vmax.xlane.f32.xlu1 %v2300_v63 }
  0x74   :  { %385 = vmax.xlane.f32.xlu0 %v2314_v10  ;;  %387 = vmax.xlane.f32.xlu1 %v2316_v11 }
  0x75   :  { %1650 = vmatmul.mubr.bf16.gmra.mrb[4].mxu0 %v685_v16  ;;  %1658 = vmatmul.mubr.bf16.gmra.mrb[4].mxu1 %v689_v31  ;;  %v3946_v16 = vmov 0  }
  0x76   :  { %1688 = vset.pattern.permute.xlu1 %v3946_v16  ;;  %1687 = vset.pattern.permute.xlu0 %v3946_v16 }
  0x78   :  { %389 = vmax.xlane.f32.xlu0 %v2326_v21  ;;  %391 = vmax.xlane.f32.xlu1 %v2328_v24 }
  0x7c   :  { %393 = vmax.xlane.f32.xlu0 %v2332_v32  ;;  %395 = vmax.xlane.f32.xlu1 %v2334_v33 }
  0x80   :  { %397 = vmax.xlane.f32.xlu0 %v2338_v40  ;;  %399 = vmax.xlane.f32.xlu1 %v2340_v41 }
  0x84   :  { %401 = vmax.xlane.f32.xlu0 %v2344_v46  ;;  %403 = vmax.xlane.f32.xlu1 %v2346_v47 }
  0x88   :  { %405 = vmax.xlane.f32.xlu0 %v2350_v56  ;;  %407 = vmax.xlane.f32.xlu1 %v2352_v59 }
  0x8c   :  { %867 = vadd.xlane.f32.xlu0 %v851_v0  ;;  %869 = vadd.xlane.f32.xlu1 %v852_v1 }
  0x90   :  { %871 = vadd.xlane.f32.xlu0 %v853_v2  ;;  %873 = vadd.xlane.f32.xlu1 %v854_v5 }
  0x94   :  { %875 = vadd.xlane.f32.xlu0 %v855_v14  ;;  %877 = vadd.xlane.f32.xlu1 %v856_v15 }
  0x98   :  { %879 = vadd.xlane.f32.xlu0 %v857_v29  ;;  %881 = vadd.xlane.f32.xlu1 %v858_v30 }
  0x9c   :  { %883 = vadd.xlane.f32.xlu0 %v859_v48  ;;  %885 = vadd.xlane.f32.xlu1 %v860_v49 }
  0xa0   :  { %887 = vadd.xlane.f32.xlu0 %v861_v52  ;;  %889 = vadd.xlane.f32.xlu1 %v862_v53 }
  0xa4   :  { %891 = vadd.xlane.f32.xlu0 %v863_v8  ;;  %893 = vadd.xlane.f32.xlu1 %v864_v9 }
  0xa8   :  { %895 = vadd.xlane.f32.xlu0 %v865_v37  ;;  %897 = vadd.xlane.f32.xlu1 %v866_v38 }
  0xd9   :  { %v218_v57 = vpop.xlane.xlu0 %217  ;;  %v222_v58 = vpop.xlane.xlu1 %221 }
  0xda   :  { %v2383_v25 = vsub.f32 %v2176_v3, %v218_v57  ;;  %v2386_v60 = vsub.f32 %v2178_v4, %v222_v58 }
  0xdc   :  { %4004 = vst [vmem:[#allocation12_spill] sm:$0xff] %v2383_v25  ;;  %4005 = vst [vmem:[#allocation13_spill] sm:$0xff] %v2386_v60  ;;  %v265_v61 = vmul.f32 1.442695, %v2383_v25  ;;  %v269_v19 = vmul.f32 1.442695, %v2386_v60 }
  0xdd   :  { %v220_v20 = vpop.xlane.xlu0 %219  ;;  %v224_v26 = vpop.xlane.xlu1 %223 }
  0xde   :  { %1697 = vpow2.f32 %v265_v61  ;;  %v2391_v31 = vsub.f32 %v2182_v6, %v220_v20  ;;  %v2394_v34 = vsub.f32 %v2184_v7, %v224_v26 }
  0xdf   :  { %1699 = vpow2.f32 %v269_v19 }
  0xe0   :  { %4006 = vst [vmem:[#allocation14_spill] sm:$0xff] %v2391_v31  ;;  %4007 = vst [vmem:[#allocation15_spill] sm:$0xff] %v2394_v34  ;;  %v267_v3 = vmul.f32 1.442695, %v2391_v31  ;;  %v271_v39 = vmul.f32 1.442695, %v2394_v34 }
  0xe1   :  { %v226_v4 = vpop.xlane.xlu0 %225  ;;  %v228_v42 = vpop.xlane.xlu1 %227 }
  0xe2   :  { %1701 = vpow2.f32 %v267_v3  ;;  %v2399_v45 = vsub.f32 %v2188_v12, %v226_v4  ;;  %v2402_v54 = vsub.f32 %v2190_v13, %v228_v42 }
  0xe3   :  { %1703 = vpow2.f32 %v271_v39 }
  0xe4   :  { %4008 = vst [vmem:[#allocation16_spill] sm:$0xff] %v2399_v45  ;;  %4009 = vst [vmem:[#allocation17_spill] sm:$0xff] %v2402_v54  ;;  %v273_v6 = vmul.f32 1.442695, %v2399_v45  ;;  %v275_v7 = vmul.f32 1.442695, %v2402_v54 }
  0xe5   :  { %v230_v55 = vpop.xlane.xlu0 %229  ;;  %v232_v0 = vpop.xlane.xlu1 %231 }
  0xe6   :  { %1705 = vpow2.f32 %v273_v6  ;;  %v2407_v1 = vsub.f32 %v2194_v17, %v230_v55  ;;  %v2410_v2 = vsub.f32 %v2196_v18, %v232_v0 }
  0xe7   :  { %1707 = vpow2.f32 %v275_v7 }
  0xe8   :  { %4010 = vst [vmem:[#allocation18_spill] sm:$0xff] %v2407_v1  ;;  %4011 = vst [vmem:[#allocation19_spill] sm:$0xff] %v2410_v2  ;;  %v1698_v5 = vpop.eup %1697  ;;  %v277_v12 = vmul.f32 1.442695, %v2407_v1  ;;  %v279_v13 = vmul.f32 1.442695, %v2410_v2 }
  0xe9   :  { %297 = vadd.xlane.f32.xlu0 %v1698_v5  ;;  %v234_v14 = vpop.xlane.xlu0 %233  ;;  %v236_v15 = vpop.xlane.xlu1 %235 }
  0xea   :  { %v1700_v29 = vpop.eup %1699  ;;  %1709 = vpow2.f32 %v277_v12  ;;  %v2415_v30 = vsub.f32 %v2200_v22, %v234_v14  ;;  %v2418_v17 = vsub.f32 %v2202_v23, %v236_v15 }
  0xeb   :  { %1711 = vpow2.f32 %v279_v13 }
  0xec   :  { %4012 = vst [vmem:[#allocation20_spill] sm:$0xff] %v2418_v17  ;;  %v1702_v48 = vpop.eup %1701  ;;  %v281_v18 = vmul.f32 1.442695, %v2415_v30  ;;  %v283_v49 = vmul.f32 1.442695, %v2418_v17 }
  0xed   :  { %301 = vadd.xlane.f32.xlu0 %v1700_v29  ;;  %299 = vadd.xlane.f32.xlu1 %v1702_v48  ;;  %v238_v52 = vpop.xlane.xlu0 %237  ;;  %v240_v53 = vpop.xlane.xlu1 %239 }
  0xee   :  { %v1704_v8 = vpop.eup %1703  ;;  %1713 = vpow2.f32 %v281_v18  ;;  %v2423_v9 = vsub.f32 %v2206_v27, %v238_v52  ;;  %v2426_v22 = vsub.f32 %v2208_v28, %v240_v53 }
  0xef   :  { %1715 = vpow2.f32 %v283_v49 }
  0xf0   :  { %4013 = vst [vmem:[#allocation21_spill] sm:$0xff] %v2426_v22  ;;  %v1706_v23 = vpop.eup %1705  ;;  %v285_v37 = vmul.f32 1.442695, %v2423_v9  ;;  %v287_v38 = vmul.f32 1.442695, %v2426_v22 }
  0xf1   :  { %303 = vadd.xlane.f32.xlu1 %v1704_v8  ;;  %305 = vadd.xlane.f32.xlu0 %v1706_v23  ;;  %v242_v57 = vpop.xlane.xlu0 %241  ;;  %v244_v58 = vpop.xlane.xlu1 %243 }
  0xf2   :  { %v1708_v61 = vpop.eup %1707  ;;  %1717 = vpow2.f32 %v285_v37  ;;  %v2431_v19 = vsub.f32 %v2224_v35, %v242_v57  ;;  %v2434_v27 = vsub.f32 %v2226_v36, %v244_v58 }
  0xf3   :  { %1719 = vpow2.f32 %v287_v38 }
  0xf4   :  { %4014 = vst [vmem:[#allocation22_spill] sm:$0xff] %v2434_v27  ;;  %v1710_v28 = vpop.eup %1709  ;;  %v289_v20 = vmul.f32 1.442695, %v2431_v19  ;;  %v291_v26 = vmul.f32 1.442695, %v2434_v27 }
  0xf5   :  { %307 = vadd.xlane.f32.xlu1 %v1708_v61  ;;  %309 = vadd.xlane.f32.xlu0 %v1710_v28  ;;  %v246_v3 = vpop.xlane.xlu0 %245  ;;  %v248_v39 = vpop.xlane.xlu1 %247 }
  0xf6   :  { %v1712_v4 = vpop.eup %1711  ;;  %1721 = vpow2.f32 %v289_v20  ;;  %v2439_v42 = vsub.f32 %v2242_v43, %v246_v3  ;;  %v2442_v35 = vsub.f32 %v2244_v44, %v248_v39 }
  0xf7   :  { %1723 = vpow2.f32 %v291_v26 }
  0xf8   :  { %4015 = vst [vmem:[#allocation23_spill] sm:$0xff] %v2442_v35  ;;  %v1714_v36 = vpop.eup %1713  ;;  %v293_v6 = vmul.f32 1.442695, %v2439_v42  ;;  %v295_v7 = vmul.f32 1.442695, %v2442_v35 }
  0xf9   :  { %311 = vadd.xlane.f32.xlu1 %v1712_v4  ;;  %313 = vadd.xlane.f32.xlu0 %v1714_v36  ;;  %v378_v55 = vpop.xlane.xlu0 %377  ;;  %v380_v0 = vpop.xlane.xlu1 %379 }
  0xfa   :  { %v1716_v5 = vpop.eup %1715  ;;  %1725 = vpow2.f32 %v293_v6  ;;  %v2447_v12 = vsub.f32 %v2258_v50, %v378_v55  ;;  %v2450_v43 = vsub.f32 %v2260_v51, %v380_v0 }
  0xfb   :  { %1727 = vpow2.f32 %v295_v7 }
  0xfc   :  { %4016 = vst [vmem:[#allocation24_spill] sm:$0xff] %v2447_v12  ;;  %4017 = vst [vmem:[#allocation25_spill] sm:$0xff] %v2450_v43  ;;  %v1718_v44 = vpop.eup %1717  ;;  %v425_v13 = vmul.f32 1.442695, %v2447_v12  ;;  %v427_v14 = vmul.f32 1.442695, %v2450_v43 }
  0xfd   :  { %315 = vadd.xlane.f32.xlu1 %v1716_v5  ;;  %317 = vadd.xlane.f32.xlu0 %v1718_v44  ;;  %v382_v15 = vpop.xlane.xlu0 %381  ;;  %v384_v29 = vpop.xlane.xlu1 %383 }
  0xfe   :  { %v1720_v48 = vpop.eup %1719  ;;  %1729 = vpow2.f32 %v425_v13  ;;  %v2455_v18 = vsub.f32 %v2298_v62, %v382_v15  ;;  %v2458_v50 = vsub.f32 %v2300_v63, %v384_v29 }
  0xff   :  { %1731 = vpow2.f32 %v427_v14 }
 0x100   :  { %4018 = vst [vmem:[#allocation26_spill] sm:$0xff] %v2455_v18  ;;  %4019 = vst [vmem:[#allocation27_spill] sm:$0xff] %v2458_v50  ;;  %v1722_v51 = vpop.eup %1721  ;;  %v429_v49 = vmul.f32 1.442695, %v2455_v18  ;;  %v431_v52 = vmul.f32 1.442695, %v2458_v50 }
 0x101   :  { %319 = vadd.xlane.f32.xlu1 %v1720_v48  ;;  %321 = vadd.xlane.f32.xlu0 %v1722_v51  ;;  %v386_v53 = vpop.xlane.xlu0 %385  ;;  %v388_v8 = vpop.xlane.xlu1 %387 }
 0x102   :  { %v1724_v23 = vpop.eup %1723  ;;  %1733 = vpow2.f32 %v429_v49  ;;  %v2463_v37 = vsub.f32 %v2314_v10, %v386_v53  ;;  %v2466_v62 = vsub.f32 %v2316_v11, %v388_v8 }
 0x103   :  { %1735 = vpow2.f32 %v431_v52 }
 0x104   :  { %4020 = vst [vmem:[#allocation28_spill] sm:$0xff] %v2463_v37  ;;  %4021 = vst [vmem:[#allocation29_spill] sm:$0xff] %v2466_v62  ;;  %v1726_v63 = vpop.eup %1725  ;;  %v433_v38 = vmul.f32 1.442695, %v2463_v37  ;;  %v435_v57 = vmul.f32 1.442695, %v2466_v62 }
 0x105   :  { %323 = vadd.xlane.f32.xlu1 %v1724_v23  ;;  %325 = vadd.xlane.f32.xlu0 %v1726_v63  ;;  %v390_v58 = vpop.xlane.xlu0 %389  ;;  %v392_v61 = vpop.xlane.xlu1 %391  ;;  %v96_v37 = vld [vmem:[%s3941_s6 + $0x40] sm:$0xff] }
 0x106   :  { %v1728_v28 = vpop.eup %1727  ;;  %1737 = vpow2.f32 %v433_v38  ;;  %v2471_v20 = vsub.f32 %v2326_v21, %v390_v58  ;;  %v2474_v10 = vsub.f32 %v2328_v24, %v392_v61 }
 0x107   :  { %1739 = vpow2.f32 %v435_v57 }
 0x108   :  { %4022 = vst [vmem:[#allocation30_spill] sm:$0xff] %v2471_v20  ;;  %4023 = vst [vmem:[#allocation31_spill] sm:$0xff] %v2474_v10  ;;  %v2476_v11 = vpop.eup %1729  ;;  %v437_v26 = vmul.f32 1.442695, %v2471_v20  ;;  %v439_v3 = vmul.f32 1.442695, %v2474_v10 }
 0x109   :  { %4024 = vst [vmem:[#allocation32_spill] sm:$0xff] %v2476_v11  ;;  %327 = vadd.xlane.f32.xlu1 %v1728_v28  ;;  %457 = vadd.xlane.f32.xlu0 %v2476_v11  ;;  %v394_v39 = vpop.xlane.xlu0 %393  ;;  %v396_v4 = vpop.xlane.xlu1 %395 }
 0x10a   :  { %v2481_v36 = vpop.eup %1731  ;;  %1741 = vpow2.f32 %v437_v26  ;;  %v2484_v21 = vsub.f32 %v2332_v32, %v394_v39  ;;  %v2487_v24 = vsub.f32 %v2334_v33, %v396_v4  ;;  %v89_v4 = vld [vmem:[%s3941_s6 + $0x8] sm:$0xff] }
 0x10b   :  { %4025 = vst [vmem:[#allocation33_spill] sm:$0xff] %v2481_v36  ;;  %1743 = vpow2.f32 %v439_v3 }
 0x10c   :  { %4026 = vst [vmem:[#allocation34_spill] sm:$0xff] %v2487_v24  ;;  %v2489_v6 = vpop.eup %1733  ;;  %v441_v7 = vmul.f32 1.442695, %v2484_v21  ;;  %v443_v55 = vmul.f32 1.442695, %v2487_v24 }
 0x10d   :  { %4027 = vst [vmem:[#allocation35_spill] sm:$0xff] %v2489_v6  ;;  %459 = vadd.xlane.f32.xlu1 %v2481_v36  ;;  %461 = vadd.xlane.f32.xlu0 %v2489_v6  ;;  %v398_v0 = vpop.xlane.xlu0 %397  ;;  %v400_v5 = vpop.xlane.xlu1 %399 }
 0x10e   :  { %v2495_v44 = vpop.eup %1735  ;;  %1745 = vpow2.f32 %v441_v7  ;;  %v2498_v32 = vsub.f32 %v2338_v40, %v398_v0  ;;  %v2501_v33 = vsub.f32 %v2340_v41, %v400_v5  ;;  %v88_v7 = vld [vmem:[%s3941_s6] sm:$0xff]  ;;  %v97_v0 = vld [vmem:[%s3941_s6 + $0x48] sm:$0xff]  ;;  %v91_v5 = vld [vmem:[%s3941_s6 + $0x18] sm:$0xff] }
 0x10f   :  { %4028 = vst [vmem:[#allocation36_spill] sm:$0xff] %v2495_v44  ;;  %1747 = vpow2.f32 %v443_v55  ;;  %v90_v55 = vld [vmem:[%s3941_s6 + $0x10] sm:$0xff] }
 0x110   :  { %4029 = vst [vmem:[#allocation37_spill] sm:$0xff] %v2501_v33  ;;  %v2503_v13 = vpop.eup %1737  ;;  %v445_v14 = vmul.f32 1.442695, %v2498_v32  ;;  %v447_v15 = vmul.f32 1.442695, %v2501_v33 }
 0x111   :  { %4030 = vst [vmem:[#allocation38_spill] sm:$0xff] %v2503_v13  ;;  %463 = vadd.xlane.f32.xlu1 %v2495_v44  ;;  %465 = vadd.xlane.f32.xlu0 %v2503_v13  ;;  %v402_v29 = vpop.xlane.xlu0 %401  ;;  %v404_v48 = vpop.xlane.xlu1 %403 }
 0x112   :  { %v2509_v51 = vpop.eup %1739  ;;  %1749 = vpow2.f32 %v445_v14  ;;  %v2512_v40 = vsub.f32 %v2344_v46, %v402_v29  ;;  %v2515_v41 = vsub.f32 %v2346_v47, %v404_v48  ;;  %v99_v14 = vld [vmem:[%s3941_s6 + $0x58] sm:$0xff]  ;;  %v92_v48 = vld [vmem:[%s3941_s6 + $0x20] sm:$0xff] }
 0x113   :  { %4031 = vst [vmem:[#allocation39_spill] sm:$0xff] %v2509_v51  ;;  %1751 = vpow2.f32 %v447_v15 }
 0x114   :  { %4032 = vst [vmem:[#allocation40_spill] sm:$0xff] %v2515_v41  ;;  %v2517_v49 = vpop.eup %1741  ;;  %v449_v52 = vmul.f32 1.442695, %v2512_v40  ;;  %v451_v53 = vmul.f32 1.442695, %v2515_v41 }
 0x115   :  { %4033 = vst [vmem:[#allocation41_spill] sm:$0xff] %v2517_v49  ;;  %467 = vadd.xlane.f32.xlu1 %v2509_v51  ;;  %469 = vadd.xlane.f32.xlu0 %v2517_v49  ;;  %v406_v8 = vpop.xlane.xlu0 %405  ;;  %v408_v23 = vpop.xlane.xlu1 %407 }
 0x116   :  { %v2523_v63 = vpop.eup %1743  ;;  %1753 = vpow2.f32 %v449_v52  ;;  %v2526_v46 = vsub.f32 %v2350_v56, %v406_v8  ;;  %v2529_v47 = vsub.f32 %v2352_v59, %v408_v23 }
 0x117   :  { %4034 = vst [vmem:[#allocation42_spill] sm:$0xff] %v2523_v63  ;;  %1755 = vpow2.f32 %v451_v53  ;;  %v101_v53 = vld [vmem:[%s3941_s6 + $0x68] sm:$0xff] }
 0x118   :  { %4035 = vst [vmem:[#allocation43_spill] sm:$0xff] %v2529_v47  ;;  %v2531_v38 = vpop.eup %1745  ;;  %v453_v57 = vmul.f32 1.442695, %v2526_v46  ;;  %v455_v58 = vmul.f32 1.442695, %v2529_v47 }
 0x119   :  { %471 = vadd.xlane.f32.xlu1 %v2523_v63  ;;  %473 = vadd.xlane.f32.xlu0 %v2531_v38  ;;  %v2537_v61 = vpop.eup %1747 }
 0x11a   :  { %4036 = vst [vmem:[#allocation44_spill] sm:$0xff] %v2537_v61  ;;  %1757 = vpow2.f32 %v453_v57  ;;  %v2592_v57 = vpop.xlane.xlu0 %867 }
 0x11b   :  { %1759 = vpow2.f32 %v455_v58 }
 0x11c   :  { %v2539_v28 = vpop.eup %1749 }
 0x11d   :  { %475 = vadd.xlane.f32.xlu1 %v2537_v61  ;;  %477 = vadd.xlane.f32.xlu0 %v2539_v28  ;;  %v2543_v56 = vpop.eup %1751 }
 0x11e   :  { %4037 = vst [vmem:[#allocation45_spill] sm:$0xff] %v2543_v56 }
 0x120   :  { %v2545_v59 = vpop.eup %1753 }
 0x121   :  { %479 = vadd.xlane.f32.xlu1 %v2543_v56  ;;  %481 = vadd.xlane.f32.xlu0 %v2545_v59  ;;  %v2549_v26 = vpop.eup %1755 }
 0x122   :  { %4038 = vst [vmem:[#allocation46_spill] sm:$0xff] %v2549_v26 }
 0x124   :  { %v2551_v3 = vpop.eup %1757 }
 0x125   :  { %483 = vadd.xlane.f32.xlu1 %v2549_v26  ;;  %485 = vadd.xlane.f32.xlu0 %v2551_v3  ;;  %v2555_v39 = vpop.eup %1759 }
 0x126   :  { %4039 = vst [vmem:[#allocation47_spill] sm:$0xff] %v2555_v39 }
 0x129   :  { %487 = vadd.xlane.f32.xlu1 %v2555_v39 }
 0x13a   :  { %958 = vperm.xlu1 %1688, %v89_v4  }
 0x13b   :  { %955 = vperm.xlu0 %1687, %v88_v7   ;;  %v93_v7 = vld [vmem:[%s3941_s6 + $0x28] sm:$0xff] }
 0x13e   :  { %961 = vperm.xlu1 %1688, %v90_v55  }
 0x13f   :  { %982 = vperm.xlu0 %1687, %v97_v0   ;;  %v103_v0 = vld [vmem:[%s3941_s6 + $0x78] sm:$0xff] }
 0x140   :  { %v2576_v15 = vpop.f32.mrb[0].mxu0  ;;  %v2590_v23 = vpop.f32.mrb[0].mxu1 }
 0x141   :  { %v2578_v29 = vpop.f32.mrb[1].mxu0  ;;  %v2594_v58 = vpop.f32.mrb[1].mxu1 }
 0x142   :  { %964 = vperm.xlu1 %1688, %v91_v5   ;;  %v2583_v52 = vpop.f32.mrb[2].mxu0  ;;  %v2596_v4 = vpop.f32.mrb[2].mxu1 }
 0x143   :  { %988 = vperm.xlu0 %1687, %v99_v14   ;;  %v2588_v8 = vpop.f32.mrb[3].mxu0  ;;  %v2601_v55 = vpop.f32.mrb[3].mxu1 }
 0x144   :  { %v2608_v14 = vpop.xlane.xlu1 %869 }
 0x146   :  { %967 = vperm.xlu1 %1688, %v92_v48   ;;  %v94_v48 = vld [vmem:[%s3941_s6 + $0x30] sm:$0xff] }
 0x147   :  { %994 = vperm.xlu0 %1687, %v101_v53   ;;  %v2615_v53 = vpop.xlane.xlu0 %871 }
 0x148   :  { %v2606_v5 = vpop.f32.mrb[4].mxu0  ;;  %v2621_v1 = vpop.f32.mrb[4].mxu1 }
 0x149   :  { %v2610_v16 = vpop.f32.mrb[5].mxu0  ;;  %4040 = vst [vmem:[#allocation48_spill] sm:$0xff] %v2621_v1  ;;  %v2623_v20 = vpop.f32.mrb[5].mxu1 }
 0x14a   :  { %970 = vperm.xlu1 %1688, %v93_v7   ;;  %v2617_v49 = vpop.f32.mrb[6].mxu0  ;;  %v2625_v7 = vpop.f32.mrb[6].mxu1 }
 0x14b   :  { %1000 = vperm.xlu0 %1687, %v103_v0   ;;  %v2619_v13 = vpop.f32.mrb[7].mxu0  ;;  %v95_v0 = vld [vmem:[%s3941_s6 + $0x38] sm:$0xff]  ;;  %v2630_v39 = vpop.f32.mrb[7].mxu1 }
 0x14c   :  { %v2632_v6 = vpop.xlane.xlu1 %873  ;;  %v2634_v45 = vpop.xlane.xlu0 %875 }
 0x14e   :  { %973 = vperm.xlu1 %1688, %v94_v48   ;;  %v98_v48 = vld [vmem:[%s3941_s6 + $0x50] sm:$0xff] }
 0x150   :  { %v2639_v26 = vpop.xlane.xlu1 %877  ;;  %v2644_v35 = vpop.xlane.xlu0 %879 }
 0x152   :  { %976 = vperm.xlu1 %1688, %v95_v0   ;;  %v100_v0 = vld [vmem:[%s3941_s6 + $0x60] sm:$0xff] }
 0x154   :  { %v2649_v11 = vpop.xlane.xlu1 %881  ;;  %v2651_v60 = vpop.xlane.xlu0 %883 }
 0x156   :  { %979 = vperm.xlu1 %1688, %v96_v37   ;;  %v102_v37 = vld [vmem:[%s3941_s6 + $0x70] sm:$0xff] }
 0x158   :  { %v2656_v47 = vpop.xlane.xlu1 %885  ;;  %v2658_v18 = vpop.xlane.xlu0 %887 }
 0x15a   :  { %985 = vperm.xlu1 %1688, %v98_v48  }
 0x15c   :  { %v2660_v56 = vpop.xlane.xlu1 %889  ;;  %v2662_v48 = vpop.xlane.xlu0 %891 }
 0x15e   :  { %991 = vperm.xlu1 %1688, %v100_v0  }
 0x160   :  { %v2664_v27 = vpop.xlane.xlu1 %893  ;;  %v2666_v25 = vpop.xlane.xlu0 %895 }
 0x161   :  { %4041 = vst [vmem:[#allocation49_spill] sm:$0xff] %v2666_v25 }
 0x162   :  { %997 = vperm.xlu1 %1688, %v102_v37  }
 0x164   :  { %v2668_v0 = vpop.xlane.xlu1 %897 }
 0x176   :  { %v2670_v41 = vpop.xlane.xlu0 %297 }
 0x177   :  { %4042 = vst [vmem:[#allocation50_spill] sm:$0xff] %v2670_v41 }
 0x17a   :  { %v2672_v12 = vpop.xlane.xlu1 %299  ;;  %v2674_v61 = vpop.xlane.xlu0 %301 }
 0x17b   :  { %4043 = vst [vmem:[#allocation51_spill] sm:$0xff] %v2674_v61 }
 0x17e   :  { %v2676_v37 = vpop.xlane.xlu1 %303  ;;  %v2678_v22 = vpop.xlane.xlu0 %305 }
 0x17f   :  { %4044 = vst [vmem:[#allocation52_spill] sm:$0xff] %v2676_v37  ;;  %4045 = vst [vmem:[#allocation53_spill] sm:$0xff] %v2678_v22 }
 0x182   :  { %v2680_v33 = vpop.xlane.xlu1 %307  ;;  %v2682_v63 = vpop.xlane.xlu0 %309 }
 0x183   :  { %4046 = vst [vmem:[#allocation54_spill] sm:$0xff] %v2680_v33  ;;  %4047 = vst [vmem:[#allocation55_spill] sm:$0xff] %v2682_v63  ;;  %v1002_v33 = vlaneseq }
 0x185   :  { %v1003_v22 = vshrl.u32 %v1002_v33, 7 }
 0x186   :  { %v2684_v17 = vpop.xlane.xlu1 %311  ;;  %v314_v24 = vpop.xlane.xlu0 %313 }
 0x187   :  { %4048 = vst [vmem:[#allocation56_spill] sm:$0xff] %v2684_v17  ;;  %1761 = vlog2.f32 %v314_v24 }
 0x18a   :  { %v2686_v51 = vpop.xlane.xlu1 %315  ;;  %v318_v2 = vpop.xlane.xlu0 %317 }
 0x18b   :  { %4049 = vst [vmem:[#allocation57_spill] sm:$0xff] %v2686_v51 }
 0x18e   :  { %v2688_v10 = vpop.xlane.xlu1 %319  ;;  %v322_v44 = vpop.xlane.xlu0 %321 }
 0x18f   :  { %4050 = vst [vmem:[#allocation58_spill] sm:$0xff] %v2688_v10 }
 0x192   :  { %v2690_v54 = vpop.xlane.xlu1 %323  ;;  %v326_v62 = vpop.xlane.xlu0 %325 }
 0x193   :  { %4051 = vst [vmem:[#allocation59_spill] sm:$0xff] %v2690_v54 }
 0x196   :  { %v2692_v36 = vpop.xlane.xlu1 %327  ;;  %v2694_v34 = vpop.xlane.xlu0 %457 }
 0x197   :  { %4052 = vst [vmem:[#allocation60_spill] sm:$0xff] %v2692_v36  ;;  %4053 = vst [vmem:[#allocation61_spill] sm:$0xff] %v2694_v34  ;;  %v104_v34 = vld [vmem:[%s3942_s7] sm:$0x1] }
 0x198   :  { %vm1022_vm0 = vcmp.lt.s32.totalorder %v104_v34, 0 }
 0x19a   :  { %v2696_v50 = vpop.xlane.xlu1 %459  ;;  %v2698_v31 = vpop.xlane.xlu0 %461 }
 0x19b   :  { %4054 = vst [vmem:[#allocation62_spill] sm:$0xff] %v2698_v31 }
 0x19e   :  { %v2700_v43 = vpop.xlane.xlu1 %463  ;;  %v2702_v17 = vpop.xlane.xlu0 %465 }
 0x19f   :  { %4055 = vst [vmem:[#allocation63_spill] sm:$0xff] %v2700_v43  ;;  %4056 = vst [vmem:[#allocation64_spill] sm:$0xff] %v2702_v17  ;;  %v1004_v17 = vsub.s32 0, %v1003_v22 }
 0x1a2   :  { %v2704_v51 = vpop.xlane.xlu1 %467  ;;  %v2706_v63 = vpop.xlane.xlu0 %469 }
 0x1a3   :  { %4057 = vst [vmem:[#allocation65_spill] sm:$0xff] %v2704_v51  ;;  %4058 = vst [vmem:[#allocation66_spill] sm:$0xff] %v2706_v63  ;;  %v4062_v51 = vmov 0  }
 0x1a4   :  { %v1071_v37 = vsel %vm1022_vm0, 1, %v4062_v51  ;;  %v922_v51 = vmul.f32 2.0, %v2578_v29 }
 0x1a5   :  { %v2720_v1 = vrot.slane %v1071_v37, %v1004_v17  ;;  %v923_v37 = vmul.f32 2.0, %v2588_v8 }
 0x1a6   :  { %v2708_v10 = vpop.xlane.xlu1 %471  ;;  %v474_v54 = vpop.xlane.xlu0 %473 }
 0x1a7   :  { %4059 = vst [vmem:[#allocation67_spill] sm:$0xff] %v2708_v10  ;;  %1763 = vlog2.f32 %v474_v54  ;;  %v1762_v10 = vpop.eup %1761  ;;  %vm1076_vm1 = vcmp.eq.s32.totalorder %v2720_v1, 1  ;;  %v4117_v1 = vld [vmem:[#allocation25_spill] sm:$0xff] }
 0x1a8   :  { %1765 = vlog2.f32 %v318_v2 }
 0x1a9   :  { %1767 = vlog2.f32 %v322_v44  ;;  %v346_v44 = vmul.f32 0.6931472, %v1762_v10 }
 0x1aa   :  { %v2713_v31 = vpop.xlane.xlu1 %475  ;;  %v478_v36 = vpop.xlane.xlu0 %477  ;;  %1769 = vrcp.f32 %v474_v54  ;;  %v2725_v54 = vld [vmem:[%s3940_s5] ss:$0 sm:$0xff] }
 0x1ab   :  { %4060 = vst [vmem:[#allocation68_spill] sm:$0xff] %v2713_v31  ;;  %1771 = vlog2.f32 %v478_v36  ;;  %v908_v29 = vadd.f32 %v2725_v54, %v2615_v53  ;;  %v909_v8 = vadd.f32 %v2725_v54, %v2632_v6 }
 0x1ac   :  { %1773 = vrcp.f32 %v478_v36  ;;  %v906_v36 = vadd.f32 %v2725_v54, %v2592_v57  ;;  %v369_v57 = vsub.f32 %v2415_v30, %v346_v44 }
 0x1ae   :  { %v2715_v63 = vpop.xlane.xlu1 %479  ;;  %v482_v24 = vpop.xlane.xlu0 %481 }
 0x1af   :  { %4061 = vst [vmem:[#allocation69_spill] sm:$0xff] %v2715_v63  ;;  %1775 = vlog2.f32 %v482_v24 }
 0x1b0   :  { %1777 = vlog2.f32 %v326_v62 }
 0x1b1   :  { %v1764_v31 = vpop.eup %1763  ;;  %1779 = vrcp.f32 %v482_v24 }
 0x1b2   :  { %v2718_v61 = vpop.xlane.xlu1 %483  ;;  %v486_v2 = vpop.xlane.xlu0 %485  ;;  %v506_v22 = vmul.f32 0.6931472, %v1764_v31  ;;  %v2736_v31 = vrot.slane %v104_v34, %v1004_v17 }
 0x1b3   :  { %4063 = vst [vmem:[#allocation70_spill] sm:$0xff] %v2718_v61  ;;  %v1766_v33 = vpop.eup %1765  ;;  %1781 = vlog2.f32 %v486_v2  ;;  %v907_v61 = vadd.f32 %v2725_v54, %v2608_v14  ;;  %v915_v14 = vadd.f32 %v2725_v54, %v2656_v47 }
 0x1b4   :  { %v1768_v63 = vpop.eup %1767  ;;  %v529_v43 = vsub.f32 %v2484_v21, %v506_v22  ;;  %v350_v24 = vmul.f32 0.6931472, %v1766_v33  ;;  %1783 = vrcp.f32 %v486_v2  ;;  %v924_v21 = vmul.f32 2.0, %v2576_v15 }
 0x1b5   :  { %v1770_v62 = vpop.eup %1769  ;;  %v354_v30 = vmul.f32 0.6931472, %v1768_v63  ;;  %v2753_v6 = vsub.f32 %v907_v61, %v923_v37  ;;  %v931_v63 = vmul.f32 2.0, %v2601_v55  ;;  %v925_v61 = vmul.f32 2.0, %v2583_v52 }
 0x1b6   :  { %v2734_v25 = vpop.xlane.xlu1 %487  ;;  %v1772_v10 = vpop.eup %1771  ;;  %v561_v34 = vmul.f32 %v1770_v62, %v2531_v38  ;;  %v577_v17 = vsub.f32 %v529_v43, %v369_v57  ;;  %v371_v15 = vsub.f32 %v2423_v9, %v350_v24  ;;  %v2789_v24 = vsub.f32 %v908_v29, %v924_v21 }
 0x1b7   :  { %4064 = vst [vmem:[#allocation71_spill] sm:$0xff] %v2734_v25  ;;  %v510_v41 = vmul.f32 0.6931472, %v1772_v10  ;;  %v1774_v22 = vpop.eup %1773  ;;  %v2748_v25 = vsub.f32 %v906_v36, %v922_v51  ;;  %v373_v37 = vsub.f32 %v2431_v19, %v354_v30  ;;  %v933_v19 = vmul.f32 2.0, %v2596_v4 }
 0x1b8   :  { %v2759_v43 = vmul.f32 %v577_v17, %v561_v34  ;;  %v563_v36 = vmul.f32 %v1774_v22, %v2539_v28  ;;  %v2806_v21 = vsub.f32 %v915_v14, %v931_v63  ;;  %v910_v30 = vadd.f32 %v2725_v54, %v2634_v45 }
 0x1b9   :  { %v531_v44 = vsub.f32 %v2498_v32, %v510_v41  ;;  %v1776_v2 = vpop.eup %1775  ;;  %v917_v32 = vadd.f32 %v2725_v54, %v2660_v56  ;;  %v926_v45 = vmul.f32 2.0, %v2610_v16  ;;  %v2826_v63 = vsub.f32 %v909_v8, %v925_v61 }
 0x1ba   :  { %v2751_v53 = vpop.permute.xlu1 %958  ;;  %v956_v33 = vpop.permute.xlu0 %955  ;;  %v514_v41 = vmul.f32 0.6931472, %v1776_v2  ;;  %v935_v16 = vmul.f32 2.0, %v2630_v39  ;;  %1785 = vlog2.f32 %v2696_v50 }
 0x1bb   :  { %vm3995_vm2 = vcmp.eq.s32.totalorder %v2751_v53, %v2736_v31  ;;  %vm1006_vm3 = vcmp.eq.s32.totalorder %v956_v33, %v2736_v31  ;;  %v1778_v47 = vpop.eup %1777  ;;  %v579_v62 = vsub.f32 %v531_v44, %v371_v15  ;;  %1787 = vlog2.f32 %v2672_v12 }
 0x1bc   :  { %vm2769_vm4 = vmor %vm3995_vm2, %vm1076_vm1  ;;  %v1023_v38 = vsel %vm1006_vm3, %v2748_v25, -1e+30  ;;  %v1780_v51 = vpop.eup %1779  ;;  %v533_v10 = vsub.f32 %v2512_v40, %v514_v41  ;;  %v358_v33 = vmul.f32 0.6931472, %v1778_v47 }
 0x1bd   :  { %vm2777_vm5 = vmor %vm1006_vm3, %vm1076_vm1  ;;  %1039 = vmax.xlane.f32.xlu1 %v1023_v38  ;;  %v1094_v56 = vsel %vm2769_vm4, 1e+30, %v2753_v6  ;;  %v1782_v17 = vpop.eup %1781  ;;  %v2797_v28 = vmul.f32 %v579_v62, %v563_v36  ;;  %v565_v44 = vmul.f32 %v1780_v51, %v2545_v59  ;;  %v4098_v36 = vld [vmem:[#allocation51_spill] sm:$0xff] }
 0x1be   :  { %v962_v52 = vpop.permute.xlu1 %961  ;;  %v2787_v57 = vpop.permute.xlu0 %982  ;;  %v1093_v34 = vsel %vm2777_vm5, 1e+30, %v2748_v25  ;;  %v518_v40 = vmul.f32 0.6931472, %v1782_v17  ;;  %v581_v2 = vsub.f32 %v533_v10, %v373_v37  ;;  %v375_v62 = vsub.f32 %v2439_v42, %v358_v33  ;;  %v4140_v25 = vld [vmem:[#allocation42_spill] sm:$0xff] }
 0x1bf   :  { %vm1008_vm6 = vcmp.eq.s32.totalorder %v962_v52, %v2736_v31  ;;  %vm1015_vm7 = vcmp.eq.s32.totalorder %v2787_v57, %v2736_v31  ;;  %v1784_v15 = vpop.eup %1783  ;;  %v2846_v42 = vsub.f32 %v917_v32, %v933_v19  ;;  %v2860_v10 = vsub.f32 %v910_v30, %v926_v45 }
 0x1c0   :  { %vm2802_vm8 = vmor %vm1008_vm6, %vm1076_vm1  ;;  %v1025_v22 = vsel %vm1008_vm6, %v2789_v24, -1e+30  ;;  %v535_v47 = vsub.f32 %v2526_v46, %v518_v40  ;;  %v2834_v59 = vmul.f32 %v581_v2, %v565_v44  ;;  %v919_v46 = vadd.f32 %v2725_v54, %v2664_v27 }
 0x1c1   :  { %vm2816_vm9 = vmor %vm1015_vm7, %vm1076_vm1  ;;  %1043 = vmax.xlane.f32.xlu0 %v1025_v22  ;;  %v1095_v14 = vsel %vm2802_vm8, 1e+30, %v2789_v24  ;;  %v567_v39 = vmul.f32 %v1784_v15, %v2551_v3  ;;  %v911_v32 = vadd.f32 %v2725_v54, %v2639_v26  ;;  %v927_v19 = vmul.f32 2.0, %v2619_v13  ;;  %v4143_v24 = vld [vmem:[#allocation21_spill] sm:$0xff] }
 0x1c2   :  { %v965_v41 = vpop.permute.xlu1 %964  ;;  %v989_v38 = vpop.permute.xlu0 %988  ;;  %v583_v37 = vsub.f32 %v535_v47, %v375_v62  ;;  %v937_v40 = vmul.f32 2.0, %v2625_v7  ;;  %v921_v26 = vadd.f32 %v2725_v54, %v2668_v0  ;;  %v2890_v30 = vsub.f32 %v919_v46, %v935_v16 }
 0x1c3   :  { %vm1009_vm10 = vcmp.eq.s32.totalorder %v965_v41, %v2736_v31  ;;  %vm1017_vm11 = vcmp.eq.s32.totalorder %v989_v38, %v2736_v31  ;;  %v4079_v7 = vmov 0  ;;  %v912_v44 = vadd.f32 %v2725_v54, %v2644_v35 }
 0x1c4   :  { %v1026_v8 = vsel %vm1009_vm10, %v2826_v63, -1e+30  ;;  %vm2842_vm12 = vmor %vm1009_vm10, %vm1076_vm1  ;;  %v2873_v3 = vmul.f32 %v583_v37, %v567_v39  ;;  %v1034_v22 = vsel %vm1017_vm11, %v2846_v42, -1e+30  ;;  %v928_v47 = vmul.f32 2.0, %v2606_v5  ;;  %v4097_v39 = vld [vmem:[#allocation48_spill] sm:$0xff] }
 0x1c5   :  { %vm2852_vm13 = vmor %vm1017_vm11, %vm1076_vm1  ;;  %1045 = vmax.xlane.f32.xlu1 %v1026_v8  ;;  %v1096_v27 = vsel %vm2842_vm12, 1e+30, %v2826_v63  ;;  %v2909_v41 = vsub.f32 %v911_v32, %v927_v19  ;;  %v1032_v38 = vsel %vm1015_vm7, %v2806_v21, -1e+30  ;;  %v2925_v5 = vsub.f32 %v921_v26, %v937_v40 }
 0x1c6   :  { %v2864_v52 = vpop.permute.xlu1 %967  ;;  %v995_v17 = vpop.permute.xlu0 %994  ;;  %v4083_v62 = vmov 0  ;;  %v929_v16 = vmul.f32 2.0, %v2617_v49  ;;  %v913_v46 = vadd.f32 %v2725_v54, %v2649_v11  ;;  %v2946_v37 = vsub.f32 %v912_v44, %v928_v47 }
 0x1c7   :  { %vm3994_vm14 = vcmp.eq.s32.totalorder %v2864_v52, %v2736_v31  ;;  %vm3998_vm15 = vcmp.eq.s32.totalorder %v995_v17, %v2736_v31  ;;  %v914_v40 = vadd.f32 %v2725_v54, %v2651_v60  ;;  %v930_v26 = vmul.f32 2.0, %v2594_v58 }
 0x1c8   :  { %vm2886_vm0 = vmor %vm3994_vm14, %vm1076_vm1  ;;  %v2962_v32 = vsub.f32 %v913_v46, %v929_v16  ;;  %v916_v60 = vadd.f32 %v2725_v54, %v2658_v18  ;;  %v936_v45 = vmul.f32 2.0, %v4097_v39  ;;  %v4104_v39 = vld [vmem:[#allocation53_spill] sm:$0xff]  ;;  %vm4118_vm4 = vcmp.eq.s32.totalorder %v2864_v52, %v2736_v31  ;;  %v4123_v18 = vld [vmem:[#allocation27_spill] sm:$0xff] }
 0x1c9   :  { %vm2896_vm3 = vmor %vm3998_vm15, %vm1076_vm1  ;;  %1061 = vmax.xlane.f32.xlu1 %v1034_v22  ;;  %v2982_v16 = vsub.f32 %v914_v40, %v930_v26  ;;  %v934_v26 = vmul.f32 2.0, %v2623_v20  ;;  %v4095_v20 = vld [vmem:[#allocation49_spill] sm:$0xff]  ;;  %v1027_v61 = vsel %vm4118_vm4, %v2860_v10, -1e+30  ;;  %vm649_vm4 = vcmask 7168  }
 0x1ca   :  { %v4080_v7 = vsel %vm2896_vm3, 4294967295, %v4079_v7  ;;  %v971_v2 = vpop.permute.xlu1 %970  ;;  %v1001_v15 = vpop.permute.xlu0 %1000 }
 0x1cb   :  { %vm1011_vm6 = vcmp.eq.s32.totalorder %v971_v2, %v2736_v31  ;;  %vm3996_vm10 = vcmp.eq.s32.totalorder %v1001_v15, %v2736_v31  ;;  %v918_v2 = vadd.f32 %v2725_v54, %v2662_v48  ;;  %v920_v48 = vadd.f32 %v2725_v54, %v4095_v20  ;;  %v1928_v54 = vld [vmem:[%s3935_s0 + $0x10] sm:$0xff] }
 0x1cc   :  { %vm2921_vm11 = vmor %vm1011_vm6, %vm1076_vm1  ;;  %v1028_v46 = vsel %vm1011_vm6, %v2909_v41, -1e+30 }
 0x1cd   :  { %vm2931_vm14 = vmor %vm3996_vm10, %vm1076_vm1  ;;  %1057 = vmax.xlane.f32.xlu1 %v1032_v38  ;;  %v1098_v57 = vsel %vm2921_vm11, 1e+30, %v2909_v41  ;;  %v932_v38 = vmul.f32 2.0, %v2590_v23  ;;  %v3026_v33 = vsub.f32 %v918_v2, %v934_v26  ;;  %v4105_v2 = vld [vmem:[#allocation65_spill] sm:$0xff]  ;;  %v3055_v20 = vsub.f32 %v920_v48, %v936_v45  ;;  %v4110_v48 = vld [vmem:[#allocation55_spill] sm:$0xff] }
 0x1ce   :  { %v4084_v62 = vsel %vm2931_vm14, 4294967295, %v4083_v62  ;;  %v2941_v8 = vpop.permute.xlu1 %973 }
 0x1cf   :  { %vm3997_vm7 = vcmp.eq.s32.totalorder %v2941_v8, %v2736_v31  ;;  %v2999_v40 = vsub.f32 %v916_v60, %v932_v38  ;;  %v4094_v60 = vld [vmem:[#allocation50_spill] sm:$0xff]  ;;  %vm4171_vm5 = vnez %v4084_v62  ;;  %v1484_v62 = vld [vmem:[#allocation4 + $0x38] sm:$0xff] }
 0x1d0   :  { %vm2955_vm2 = vmor %vm3997_vm7, %vm1076_vm1  ;;  %1789 = vlog2.f32 %v4094_v60  ;;  %v4106_v60 = vld [vmem:[#allocation54_spill] sm:$0xff] }
 0x1d2   :  { %v977_v19 = vpop.permute.xlu1 %976 }
 0x1d3   :  { %vm1013_vm10 = vcmp.eq.s32.totalorder %v977_v19, %v2736_v31  ;;  %v4161_v19 = vld [vmem:[#allocation35_spill] sm:$0xff] }
 0x1d4   :  { %v1030_v22 = vsel %vm1013_vm10, %v2962_v32, -1e+30  ;;  %vm2971_vm7 = vmor %vm1013_vm10, %vm1076_vm1 }
 0x1d5   :  { %1053 = vmax.xlane.f32.xlu1 %v1030_v22  ;;  %v1100_v47 = vsel %vm2971_vm7, 1e+30, %v2962_v32 }
 0x1d6   :  { %v980_v58 = vpop.permute.xlu1 %979 }
 0x1d7   :  { %vm3999_vm15 = vcmp.eq.s32.totalorder %v980_v58, %v2736_v31  ;;  %vm4103_vm3 = vcmp.eq.s32.totalorder %v980_v58, %v2736_v31  ;;  %v1786_v58 = vpop.eup %1785 }
 0x1d8   :  { %vm2991_vm10 = vmor %vm3999_vm15, %vm1076_vm1  ;;  %vm4091_vm15 = vcmp.eq.s32.totalorder %v995_v17, %v2736_v31  ;;  %v4096_v17 = vld [vmem:[#allocation63_spill] sm:$0xff] }
 0x1d9   :  { %1049 = vmax.xlane.f32.xlu1 %v1028_v46  ;;  %v1036_v22 = vsel %vm4091_vm15, %v2890_v30, -1e+30  ;;  %v4092_v46 = vmov 0  ;;  %1791 = vlog2.f32 %v4096_v17 }
 0x1da   :  { %v986_v23 = vpop.permute.xlu1 %985  ;;  %1793 = vlog2.f32 %v4098_v36  ;;  %v1031_v36 = vsel %vm4103_vm3, %v2982_v16, -1e+30 }
 0x1db   :  { %vm1016_vm6 = vcmp.eq.s32.totalorder %v986_v23, %v2736_v31 }
 0x1dc   :  { %vm3011_vm14 = vmor %vm1016_vm6, %vm1076_vm1  ;;  %v1033_v38 = vsel %vm1016_vm6, %v2999_v40, -1e+30  ;;  %vm4100_vm6 = vcmp.eq.s32.totalorder %v1001_v15, %v2736_v31 }
 0x1dd   :  { %v4093_v46 = vsel %vm3011_vm14, 4294967295, %v4092_v46  ;;  %1059 = vmax.xlane.f32.xlu0 %v1033_v38  ;;  %1065 = vmax.xlane.f32.xlu1 %v1036_v22  ;;  %v4099_v22 = vld [vmem:[#allocation52_spill] sm:$0xff]  ;;  %v1038_v38 = vsel %vm4100_vm6, %v2925_v5, -1e+30 }
 0x1de   :  { %v3023_v23 = vpop.permute.xlu1 %991  ;;  %1795 = vlog2.f32 %v4099_v22  ;;  %vm4173_vm8 = vnez %v4093_v46  ;;  %v1926_v46 = vld [vmem:[%s3935_s0] sm:$0xff] }
 0x1df   :  { %vm4003_vm15 = vcmp.eq.s32.totalorder %v3023_v23, %v2736_v31  ;;  %1797 = vlog2.f32 %v4104_v39  ;;  %v4112_v39 = vld [vmem:[#allocation56_spill] sm:$0xff]  ;;  %vm4124_vm12 = vcmp.eq.s32.totalorder %v3023_v23, %v2736_v31  ;;  %v4129_v23 = vld [vmem:[#allocation29_spill] sm:$0xff] }
 0x1e0   :  { %vm3040_vm14 = vmor %vm4003_vm15, %vm1076_vm1  ;;  %1799 = vlog2.f32 %v4105_v2  ;;  %vm4109_vm15 = vcmp.eq.s32.totalorder %v2751_v53, %v2736_v31  ;;  %v492_v53 = vmul.f32 0.6931472, %v1786_v58  ;;  %v1035_v41 = vsel %vm4124_vm12, %v3026_v33, -1e+30 }
 0x1e1   :  { %1055 = vmax.xlane.f32.xlu0 %v1031_v36  ;;  %1069 = vmax.xlane.f32.xlu1 %v1038_v38  ;;  %1801 = vlog2.f32 %v4106_v60  ;;  %v1024_v45 = vsel %vm4109_vm15, %v2753_v6, -1e+30  ;;  %v4111_v38 = vld [vmem:[#allocation67_spill] sm:$0xff] }
 0x1e2   :  { %v3052_v26 = vpop.permute.xlu1 %997  ;;  %1803 = vrcp.f32 %v2696_v50  ;;  %v1788_v50 = vpop.eup %1787  ;;  %v522_v15 = vsub.f32 %v4117_v1, %v492_v53  ;;  %v4121_v53 = vld [vmem:[#allocation69_spill] sm:$0xff] }
 0x1e3   :  { %vm1020_vm6 = vcmp.eq.s32.totalorder %v3052_v26, %v2736_v31  ;;  %1805 = vlog2.f32 %v4110_v48  ;;  %v3082_v36 = vpop.eup %1789  ;;  %v4115_v48 = vld [vmem:[#allocation68_spill] sm:$0xff] }
 0x1e4   :  { %vm3065_vm3 = vmor %vm1020_vm6, %vm1076_vm1  ;;  %1807 = vlog2.f32 %v4111_v38  ;;  %v1792_v60 = vpop.eup %1791  ;;  %vm4113_vm1 = vcmp.eq.s32.totalorder %v2941_v8, %v2736_v31  ;;  %v1037_v32 = vsel %vm1020_vm6, %v3055_v20, -1e+30 }
 0x1e5   :  { %1041 = vmax.xlane.f32.xlu0 %v1024_v45  ;;  %1111 = vmin.xlane.f32.xlu1 %v1094_v56  ;;  %1809 = vlog2.f32 %v4112_v39  ;;  %v1029_v6 = vsel %vm4113_vm1, %v2946_v37, -1e+30  ;;  %v3090_v9 = vpop.eup %1793  ;;  %v332_v56 = vmul.f32 0.6931472, %v1788_v50  ;;  %v4114_v45 = vld [vmem:[#allocation57_spill] sm:$0xff]  ;;  %v4116_v39 = vld [vmem:[#allocation58_spill] sm:$0xff] }
 0x1e6   :  { %1811 = vrcp.f32 %v4096_v17  ;;  %v496_v8 = vmul.f32 0.6931472, %v1792_v60  ;;  %v4122_v60 = vld [vmem:[#allocation60_spill] sm:$0xff]  ;;  %v334_v13 = vmul.f32 0.6931472, %v3090_v9  ;;  %v4153_v9 = vld [vmem:[#allocation43_spill] sm:$0xff] }
 0x1e7   :  { %1813 = vlog2.f32 %v4114_v45  ;;  %v4120_v45 = vld [vmem:[#allocation59_spill] sm:$0xff] }
 0x1e8   :  { %v1796_v58 = vpop.eup %1795  ;;  %1815 = vlog2.f32 %v4115_v48 }
 0x1e9   :  { %1051 = vmax.xlane.f32.xlu0 %v1029_v6  ;;  %1115 = vmin.xlane.f32.xlu1 %v1096_v27  ;;  %v3098_v17 = vpop.eup %1797  ;;  %1817 = vlog2.f32 %v4116_v39  ;;  %v4119_v27 = vld [vmem:[#allocation14_spill] sm:$0xff]  ;;  %v336_v6 = vmul.f32 0.6931472, %v1796_v58 }
 0x1ea   :  { %v1800_v12 = vpop.eup %1799  ;;  %1819 = vrcp.f32 %v4105_v2  ;;  %v362_v50 = vsub.f32 %v4119_v27, %v332_v56  ;;  %v524_v56 = vsub.f32 %v4123_v18, %v496_v8  ;;  %v4127_v18 = vld [vmem:[#allocation33_spill] sm:$0xff] }
 0x1eb   :  { %v1802_v63 = vpop.eup %1801  ;;  %1821 = vlog2.f32 %v4120_v45  ;;  %v500_v52 = vmul.f32 0.6931472, %v1800_v12  ;;  %v4126_v45 = vld [vmem:[#allocation61_spill] sm:$0xff] }
 0x1ec   :  { %v1804_v1 = vpop.eup %1803  ;;  %1823 = vlog2.f32 %v4121_v53  ;;  %v570_v39 = vsub.f32 %v522_v15, %v362_v50  ;;  %v340_v27 = vmul.f32 0.6931472, %v1802_v63 }
 0x1ed   :  { %1047 = vmax.xlane.f32.xlu0 %v1027_v61  ;;  %1119 = vmin.xlane.f32.xlu1 %v1098_v57  ;;  %v3114_v2 = vpop.eup %1805  ;;  %1825 = vlog2.f32 %v4122_v60  ;;  %v4125_v57 = vld [vmem:[#allocation15_spill] sm:$0xff]  ;;  %v554_v12 = vmul.f32 %v1804_v1, %v4127_v18  ;;  %v526_v50 = vsub.f32 %v4129_v23, %v500_v52  ;;  %v4132_v52 = vld [vmem:[#allocation36_spill] sm:$0xff] }
 0x1ee   :  { %v1808_v58 = vpop.eup %1807  ;;  %1827 = vrcp.f32 %v4111_v38  ;;  %v364_v61 = vsub.f32 %v4125_v57, %v336_v6  ;;  %v4128_v38 = vld [vmem:[#allocation70_spill] sm:$0xff] }
 0x1ef   :  { %v1810_v35 = vpop.eup %1809  ;;  %1829 = vlog2.f32 %v4126_v45  ;;  %v504_v60 = vmul.f32 0.6931472, %v1808_v58  ;;  %v586_v11 = vmul.f32 %v570_v39, %v554_v12  ;;  %v4131_v57 = vld [vmem:[#allocation62_spill] sm:$0xff] }
 0x1f0   :  { %v1812_v15 = vpop.eup %1811  ;;  %1831 = vlog2.f32 %v4128_v38  ;;  %v572_v6 = vsub.f32 %v524_v56, %v364_v61  ;;  %v4133_v56 = vld [vmem:[#allocation71_spill] sm:$0xff] }
 0x1f1   :  { %1063 = vmax.xlane.f32.xlu0 %v1035_v41  ;;  %1123 = vmin.xlane.f32.xlu1 %v1100_v47  ;;  %v1814_v8 = vpop.eup %1813  ;;  %1833 = vrcp.f32 %v4115_v48  ;;  %v4130_v47 = vld [vmem:[#allocation17_spill] sm:$0xff]  ;;  %v344_v41 = vmul.f32 0.6931472, %v1810_v35  ;;  %v556_v58 = vmul.f32 %v1812_v15, %v4132_v52  ;;  %v4134_v48 = vld [vmem:[#allocation31_spill] sm:$0xff] }
 0x1f2   :  { %v1816_v63 = vpop.eup %1815  ;;  %v366_v1 = vsub.f32 %v4130_v47, %v340_v27  ;;  %1835 = vlog2.f32 %v4131_v57  ;;  %v528_v18 = vsub.f32 %v4134_v48, %v504_v60  ;;  %v4135_v35 = vld [vmem:[#allocation19_spill] sm:$0xff]  ;;  %v348_v0 = vmul.f32 0.6931472, %v1814_v8  ;;  %v4141_v48 = vld [vmem:[#allocation66_spill] sm:$0xff] }
 0x1f3   :  { %v1818_v44 = vpop.eup %1817  ;;  %1837 = vlog2.f32 %v4133_v56  ;;  %v508_v12 = vmul.f32 0.6931472, %v1816_v63  ;;  %v588_v23 = vmul.f32 %v572_v6, %v556_v58  ;;  %v368_v47 = vsub.f32 %v4135_v35, %v344_v41  ;;  %v4137_v6 = vld [vmem:[#allocation64_spill] sm:$0xff]  ;;  %v4138_v63 = vld [vmem:[#allocation34_spill] sm:$0xff] }
 0x1f4   :  { %v1820_v39 = vpop.eup %1819  ;;  %v574_v31 = vsub.f32 %v526_v50, %v366_v1  ;;  %1839 = vrcp.f32 %v4121_v53  ;;  %v352_v52 = vmul.f32 0.6931472, %v1818_v44  ;;  %v4145_v35 = vld [vmem:[#allocation44_spill] sm:$0xff] }
 0x1f5   :  { %1067 = vmax.xlane.f32.xlu0 %v1037_v32  ;;  %603 = vadd.xlane.f32.xlu1 %v586_v11  ;;  %v1822_v61 = vpop.eup %1821  ;;  %1841 = vrcp.f32 %v4126_v45  ;;  %v4136_v11 = vld [vmem:[#allocation39_spill] sm:$0xff]  ;;  %v530_v53 = vsub.f32 %v4138_v63, %v508_v12  ;;  %v576_v41 = vsub.f32 %v528_v18, %v368_v47  ;;  %v4139_v45 = vld [vmem:[#allocation20_spill] sm:$0xff]  ;;  %v4142_v12 = vld [vmem:[#allocation37_spill] sm:$0xff] }
 0x1f6   :  { %v1824_v26 = vpop.eup %1823  ;;  %v558_v15 = vmul.f32 %v1820_v39, %v4136_v11  ;;  %1843 = vlog2.f32 %v4137_v6  ;;  %v370_v55 = vsub.f32 %v4139_v45, %v348_v0  ;;  %v372_v29 = vsub.f32 %v4143_v24, %v352_v52 }
 0x1f7   :  { %v1826_v27 = vpop.eup %1825  ;;  %v512_v32 = vmul.f32 0.6931472, %v1824_v26  ;;  %1845 = vrcp.f32 %v4128_v38  ;;  %v4144_v26 = vsel %vm2886_vm0, 1e+30, %v2860_v10  ;;  %v4149_v10 = vld [vmem:[#allocation22_spill] sm:$0xff] }
 0x1f8   :  { %v1828_v60 = vpop.eup %1827  ;;  %v590_v1 = vmul.f32 %v574_v31, %v558_v15  ;;  %1847 = vrcp.f32 %v4131_v57  ;;  %v578_v44 = vsub.f32 %v530_v53, %v370_v55  ;;  %v330_v57 = vmul.f32 0.6931472, %v3082_v36  ;;  %v4146_v15 = vld [vmem:[#allocation24_spill] sm:$0xff] }
 0x1f9   :  { %1109 = vmin.xlane.f32.xlu0 %v1093_v34  ;;  %607 = vadd.xlane.f32.xlu1 %v588_v23  ;;  %v1830_v50 = vpop.eup %1829  ;;  %v560_v34 = vmul.f32 %v1828_v60, %v4140_v25  ;;  %1849 = vlog2.f32 %v4141_v48  ;;  %v532_v38 = vsub.f32 %v4142_v12, %v512_v32  ;;  %v4147_v53 = vld [vmem:[#allocation40_spill] sm:$0xff]  ;;  %v360_v55 = vmul.f32 0.6931472, %v1826_v27  ;;  %v4151_v25 = vld [vmem:[#allocation45_spill] sm:$0xff] }
 0x1fa   :  { %v1832_v8 = vpop.eup %1831  ;;  %v490_v39 = vmul.f32 0.6931472, %v1830_v50  ;;  %1851 = vrcp.f32 %v4133_v56  ;;  %v4150_v52 = vsel %vm2955_vm2, 1e+30, %v2946_v37  ;;  %v4154_v27 = vld [vmem:[#allocation13_spill] sm:$0xff]  ;;  %v4155_v37 = vld [vmem:[#allocation32_spill] sm:$0xff]  ;;  %vm4169_vm2 = vnez %v4080_v7 }
 0x1fb   :  { %v1834_v58 = vpop.eup %1833  ;;  %v516_v23 = vmul.f32 0.6931472, %v1832_v8  ;;  %v592_v0 = vmul.f32 %v576_v41, %v560_v34  ;;  %1853 = vrcp.f32 %v4137_v6  ;;  %v338_v24 = vmul.f32 0.6931472, %v3098_v17  ;;  %v1482_v7 = vld [vmem:[#allocation4 + $0x28] sm:$0xff] }
 0x1fc   :  { %v1836_v18 = vpop.eup %1835  ;;  %v562_v47 = vmul.f32 %v1834_v58, %v4145_v35  ;;  %v521_v60 = vsub.f32 %v4146_v15, %v490_v39  ;;  %v4152_v39 = vld [vmem:[#allocation26_spill] sm:$0xff]  ;;  %1855 = vrcp.f32 %v4141_v48 }
 0x1fd   :  { %1113 = vmin.xlane.f32.xlu0 %v1095_v14  ;;  %611 = vadd.xlane.f32.xlu1 %v590_v1  ;;  %v1838_v31 = vpop.eup %1837  ;;  %v356_v14 = vmul.f32 0.6931472, %v1822_v61  ;;  %v494_v50 = vmul.f32 0.6931472, %v1836_v18  ;;  %v534_v36 = vsub.f32 %v4147_v53, %v516_v23  ;;  %v580_v1 = vsub.f32 %v532_v38, %v372_v29  ;;  %v4148_v61 = vld [vmem:[#allocation12_spill] sm:$0xff]  ;;  %v4156_v29 = vld [vmem:[#allocation23_spill] sm:$0xff] }
 0x1fe   :  { %v1840_v11 = vpop.eup %1839  ;;  %v520_v32 = vmul.f32 0.6931472, %v1838_v31  ;;  %v594_v56 = vmul.f32 %v578_v44, %v562_v47  ;;  %v361_v8 = vsub.f32 %v4148_v61, %v330_v57  ;;  %v363_v57 = vsub.f32 %v4154_v27, %v334_v13  ;;  %v4158_v35 = vld [vmem:[#allocation46_spill] sm:$0xff] }
 0x1ff   :  { %v1842_v63 = vpop.eup %1841  ;;  %v374_v45 = vsub.f32 %v4149_v10, %v356_v14  ;;  %v564_v34 = vmul.f32 %v1840_v11, %v4151_v25  ;;  %v523_v18 = vsub.f32 %v4152_v39, %v494_v50  ;;  %v376_v14 = vsub.f32 %v4156_v29, %v360_v55  ;;  %v4159_v50 = vld [vmem:[#allocation28_spill] sm:$0xff] }
 0x200   :  { %v1844_v41 = vpop.eup %1843  ;;  %v569_v12 = vsub.f32 %v521_v60, %v361_v8  ;;  %v553_v49 = vmul.f32 %v1842_v63, %v4155_v37  ;;  %v4163_v8 = vld [vmem:[#allocation30_spill] sm:$0xff]  ;;  %v1924_v37 = vld [vmem:[%s3935_s0 + $0x38] sm:$0xff] }
 0x201   :  { %1117 = vmin.xlane.f32.xlu0 %v4144_v26  ;;  %615 = vadd.xlane.f32.xlu1 %v592_v0  ;;  %v1846_v58 = vpop.eup %1845  ;;  %v498_v23 = vmul.f32 0.6931472, %v1844_v41  ;;  %v536_v0 = vsub.f32 %v4153_v9, %v520_v32  ;;  %v596_v6 = vmul.f32 %v580_v1, %v564_v34  ;;  %v582_v44 = vsub.f32 %v534_v36, %v374_v45  ;;  %v4160_v32 = vld [vmem:[#allocation16_spill] sm:$0xff]  ;;  %v4162_v1 = vld [vmem:[#allocation47_spill] sm:$0xff]  ;;  %v4165_v34 = vld [vmem:[#allocation38_spill] sm:$0xff] }
 0x202   :  { %v1848_v38 = vpop.eup %1847  ;;  %v4157_v26 = vsel %vm2991_vm10, 1e+30, %v2982_v16  ;;  %v566_v47 = vmul.f32 %v1846_v58, %v4158_v35  ;;  %v585_v15 = vmul.f32 %v569_v12, %v553_v49  ;;  %v571_v60 = vsub.f32 %v523_v18, %v363_v57  ;;  %v1488_v35 = vld [vmem:[#allocation4 + $0x58] sm:$0xff] }
 0x203   :  { %v1850_v31 = vpop.eup %1849  ;;  %v525_v53 = vsub.f32 %v4159_v50, %v498_v23  ;;  %v584_v63 = vsub.f32 %v536_v0, %v376_v14  ;;  %v365_v17 = vsub.f32 %v4160_v32, %v338_v24  ;;  %v555_v16 = vmul.f32 %v1848_v38, %v4161_v19  ;;  %v4167_v38 = vld [vmem:[#allocation41_spill] sm:$0xff]  ;;  %v1492_v19 = vld [vmem:[#allocation4 + $0x78] sm:$0xff] }
 0x204   :  { %v1852_v11 = vpop.eup %1851  ;;  %v502_v48 = vmul.f32 0.6931472, %v1850_v31  ;;  %v598_v36 = vmul.f32 %v582_v44, %v566_v47  ;;  %v4166_v12 = vsel %vm2816_vm9, 1e+30, %v2806_v21  ;;  %v4168_v0 = vsel %vm2852_vm13, 1e+30, %v2846_v42 }
 0x205   :  { %1121 = vmin.xlane.f32.xlu0 %v4150_v52  ;;  %619 = vadd.xlane.f32.xlu1 %v594_v56  ;;  %v342_v56 = vmul.f32 0.6931472, %v3114_v2  ;;  %v568_v41 = vmul.f32 %v1852_v11, %v4162_v1  ;;  %v1854_v61 = vpop.eup %1853  ;;  %v587_v10 = vmul.f32 %v571_v60, %v555_v16  ;;  %v573_v55 = vsub.f32 %v525_v53, %v365_v17  ;;  %v4164_v52 = vld [vmem:[#allocation18_spill] sm:$0xff]  ;;  %v1921_v21 = vld [vmem:[%s3935_s0 + $0x8] sm:$0xff]  ;;  %v1480_v31 = vld [vmem:[#allocation4 + $0x18] sm:$0xff] }
 0x206   :  { %v527_v13 = vsub.f32 %v4163_v8, %v502_v48  ;;  %v557_v58 = vmul.f32 %v1854_v61, %v4165_v34  ;;  %v1856_v39 = vpop.eup %1855  ;;  %v4170_v44 = vsel %vm4169_vm2, 1e+30, %v2890_v30  ;;  %v4172_v42 = vsel %vm4171_vm5, 1e+30, %v2925_v5  ;;  %v1486_v24 = vld [vmem:[#allocation4 + $0x48] sm:$0xff]  ;;  %v1479_v11 = vld [vmem:[#allocation4 + $0x10] sm:$0xff] }
 0x207   :  { %v600_v45 = vmul.f32 %v584_v63, %v568_v41  ;;  %v367_v25 = vsub.f32 %v4164_v52, %v342_v56  ;;  %v559_v23 = vmul.f32 %v1856_v39, %v4167_v38  ;;  %v1500_v49 = vsub.f32 %v1924_v37, %v1484_v62  ;;  %v1925_v14 = vld [vmem:[%s3935_s0 + $0x48] sm:$0xff]  ;;  %v1927_v60 = vld [vmem:[%s3935_s0 + $0x58] sm:$0xff]  ;;  %v1481_v56 = vld [vmem:[#allocation4 + $0x20] sm:$0xff] }
 0x208   :  { %v589_v2 = vmul.f32 %v573_v55, %v557_v58  ;;  %v4175_v47 = vsel %vm3040_vm14, 1e+30, %v3026_v33  ;;  %v1504_v50 = vsub.f32 %v1927_v60, %v1488_v35  ;;  %v1490_v53 = vld [vmem:[#allocation4 + $0x68] sm:$0xff]  ;;  %v1495_v33 = vsub.f32 %v1928_v54, %v1479_v11  ;;  %v1930_v1 = vld [vmem:[%s3935_s0 + $0x20] sm:$0xff]  ;;  %v1931_v41 = vld [vmem:[%s3935_s0 + $0x78] sm:$0xff] }
 0x209   :  { %1125 = vmin.xlane.f32.xlu0 %v4157_v26  ;;  %623 = vadd.xlane.f32.xlu1 %v596_v6  ;;  %v575_v18 = vsub.f32 %v527_v13, %v367_v25  ;;  %v1478_v6 = vld [vmem:[#allocation4 + $0x8] sm:$0xff]  ;;  %v1516_v29 = vmul.f32 %v1500_v49, %v1500_v49  ;;  %v1477_v26 = vld [vmem:[#allocation4] sm:$0xff]  ;;  %v4176_v48 = vsel %vm3065_vm3, 1e+30, %v3055_v20  ;;  %v1497_v22 = vsub.f32 %v1930_v1, %v1481_v56  ;;  %v1483_v8 = vld [vmem:[#allocation4 + $0x30] sm:$0xff] }
 0x20a   :  { %v1494_v4 = vsub.f32 %v1921_v21, %v1478_v6  ;;  %v1520_v63 = vmul.f32 %v1504_v50, %v1504_v50  ;;  %v1929_v32 = vld [vmem:[%s3935_s0 + $0x68] sm:$0xff]  ;;  %v1511_v16 = vmul.f32 %v1495_v33, %v1495_v33  ;;  %v1508_v61 = vsub.f32 %v1931_v41, %v1492_v19  ;;  %v1485_v52 = vld [vmem:[#allocation4 + $0x40] sm:$0xff]  ;;  %v1487_v39 = vld [vmem:[#allocation4 + $0x50] sm:$0xff] }
 0x20b   :  { %v591_v9 = vmul.f32 %v575_v18, %v559_v23  ;;  %v1506_v17 = vsub.f32 %v1929_v32, %v1490_v53  ;;  %v1513_v13 = vmul.f32 %v1497_v22, %v1497_v22  ;;  %v1933_v34 = vld [vmem:[%s3935_s0 + $0x40] sm:$0xff]  ;;  %v1934_v18 = vld [vmem:[%s3935_s0 + $0x50] sm:$0xff]  ;;  %v1937_v35 = vld [vmem:[%s3941_s6 + $0x8] sm:$0xff]  ;;  %v2056_v53 = vmov 0.0  }
 0x20c   :  { %v1510_v51 = vmul.f32 %v1494_v4, %v1494_v4  ;;  %v1524_v55 = vmul.f32 %v1508_v61, %v1508_v61  ;;  %v1501_v58 = vsub.f32 %v1933_v34, %v1485_v52  ;;  %v1489_v38 = vld [vmem:[#allocation4 + $0x60] sm:$0xff]  ;;  %v1491_v6 = vld [vmem:[#allocation4 + $0x70] sm:$0xff]  ;;  %vm106_vm9 = vcmp.ge.s32.totalorder %v1937_v35, 0  ;;  %v1942_v32 = vld [vmem:[%s3941_s6 + $0x58] sm:$0xff] }
 0x20d   :  { %601 = vadd.xlane.f32.xlu0 %v585_v15  ;;  %627 = vadd.xlane.f32.xlu1 %v598_v36  ;;  %v1522_v20 = vmul.f32 %v1506_v17, %v1506_v17  ;;  %v1936_v21 = vld [vmem:[%s3935_s0 + $0x70] sm:$0xff]  ;;  %v3327_v54 = vsel %vm106_vm9, 1.0, %v2056_v53  ;;  %vm116_vm7 = vcmp.ge.s32.totalorder %v1942_v32, 0  ;;  %v1943_v19 = vld [vmem:[%s3941_s6 + $0x68] sm:$0xff]  ;;  %v1945_v1 = vld [vmem:[%s3941_s6 + $0x78] sm:$0xff] }
 0x20e   :  { %v1507_v4 = vsub.f32 %v1936_v21, %v1491_v6  ;;  %vm118_vm10 = vcmp.ge.s32.totalorder %v1943_v19, 0  ;;  %vm120_vm6 = vcmp.ge.s32.totalorder %v1945_v1, 0  ;;  %v1946_v22 = vld [vmem:[%s3941_s6 + $0x10] sm:$0xff] }
 0x20f   :  { %vm107_vm3 = vcmp.ge.s32.totalorder %v1946_v22, 0  ;;  %v3385_v34 = vsel %vm118_vm10, 1.0, %v2056_v53 }
 0x211   :  { %605 = vadd.xlane.f32.xlu0 %v587_v10  ;;  %631 = vadd.xlane.f32.xlu1 %v600_v45  ;;  %v1932_v10 = vld [vmem:[%s3935_s0 + $0x30] sm:$0xff] }
 0x212   :  { %v1499_v45 = vsub.f32 %v1932_v10, %v1483_v8 }
 0x214   :  { %v1515_v25 = vmul.f32 %v1499_v45, %v1499_v45  ;;  %v3375_v45 = vsel %vm116_vm7, 1.0, %v2056_v53 }
 0x215   :  { %609 = vadd.xlane.f32.xlu0 %v589_v2  ;;  %1127 = vmin.xlane.f32.xlu1 %v4166_v12  ;;  %v1517_v2 = vmul.f32 %v1501_v58, %v1501_v58  ;;  %v1503_v12 = vsub.f32 %v1934_v18, %v1487_v39  ;;  %v3398_v18 = vsel %vm107_vm3, 1.0, %v2056_v53 }
 0x217   :  { %v1519_v23 = vmul.f32 %v1503_v12, %v1503_v12 }
 0x219   :  { %613 = vadd.xlane.f32.xlu0 %v591_v9  ;;  %1131 = vmin.xlane.f32.xlu1 %v4168_v0  ;;  %v1935_v9 = vld [vmem:[%s3935_s0 + $0x60] sm:$0xff] }
 0x21a   :  { %v1505_v0 = vsub.f32 %v1935_v9, %v1489_v38 }
 0x21d   :  { %617 = vadd.xlane.f32.xlu0 %v2759_v43  ;;  %1135 = vmin.xlane.f32.xlu1 %v4170_v44  ;;  %v1922_v43 = vld [vmem:[%s3935_s0 + $0x18] sm:$0xff]  ;;  %v1521_v44 = vmul.f32 %v1505_v0, %v1505_v0 }
 0x21e   :  { %v1496_v30 = vsub.f32 %v1922_v43, %v1480_v31 }
 0x220   :  { %v1512_v27 = vmul.f32 %v1496_v30, %v1496_v30 }
 0x221   :  { %621 = vadd.xlane.f32.xlu0 %v2797_v28  ;;  %1139 = vmin.xlane.f32.xlu1 %v4172_v42  ;;  %v1923_v28 = vld [vmem:[%s3935_s0 + $0x28] sm:$0xff]  ;;  %v1523_v42 = vmul.f32 %v1507_v4, %v1507_v4 }
 0x222   :  { %v1498_v57 = vsub.f32 %v1923_v28, %v1482_v7 }
 0x224   :  { %v1514_v5 = vmul.f32 %v1498_v57, %v1498_v57 }
 0x225   :  { %625 = vadd.xlane.f32.xlu0 %v2834_v59  ;;  %1527 = vadd.xlane.f32.xlu1 %v1510_v51  ;;  %v4174_v59 = vsel %vm4173_vm8, 1e+30, %v2999_v40  ;;  %v1493_v40 = vsub.f32 %v1926_v46, %v1477_v26 }
 0x227   :  { %v1509_v36 = vmul.f32 %v1493_v40, %v1493_v40  ;;  %v1938_v40 = vld [vmem:[%s3941_s6 + $0x18] sm:$0xff] }
 0x228   :  { %vm108_vm13 = vcmp.ge.s32.totalorder %v1938_v40, 0 }
 0x229   :  { %629 = vadd.xlane.f32.xlu0 %v2873_v3  ;;  %1531 = vadd.xlane.f32.xlu1 %v1512_v27  ;;  %v1502_v3 = vsub.f32 %v1925_v14, %v1486_v24  ;;  %v3330_v33 = vsel %vm108_vm13, 1.0, %v2056_v53 }
 0x22b   :  { %v1518_v15 = vmul.f32 %v1502_v3, %v1502_v3 }
 0x22d   :  { %1129 = vmin.xlane.f32.xlu0 %v4174_v59  ;;  %1535 = vadd.xlane.f32.xlu1 %v1514_v5 }
 0x231   :  { %1133 = vmin.xlane.f32.xlu0 %v4175_v47  ;;  %1539 = vadd.xlane.f32.xlu1 %v1516_v29 }
 0x235   :  { %1137 = vmin.xlane.f32.xlu0 %v4176_v48  ;;  %1543 = vadd.xlane.f32.xlu1 %v1518_v15  ;;  %v1939_v15 = vld [vmem:[%s3941_s6 + $0x28] sm:$0xff] }
 0x236   :  { %vm110_vm14 = vcmp.ge.s32.totalorder %v1939_v15, 0 }
 0x237   :  { %v3345_v56 = vsel %vm110_vm14, 1.0, %v2056_v53 }
 0x239   :  { %1525 = vadd.xlane.f32.xlu0 %v1509_v36  ;;  %1547 = vadd.xlane.f32.xlu1 %v1520_v63  ;;  %v1940_v36 = vld [vmem:[%s3941_s6 + $0x38] sm:$0xff]  ;;  %v1941_v63 = vld [vmem:[%s3941_s6 + $0x48] sm:$0xff] }
 0x23a   :  { %vm112_vm0 = vcmp.ge.s32.totalorder %v1940_v36, 0  ;;  %vm114_vm11 = vcmp.ge.s32.totalorder %v1941_v63, 0 }
 0x23b   :  { %v3371_v10 = vsel %vm114_vm11, 1.0, %v2056_v53 }
 0x23d   :  { %1529 = vadd.xlane.f32.xlu0 %v1511_v16  ;;  %1551 = vadd.xlane.f32.xlu1 %v1522_v20  ;;  %v1944_v16 = vld [vmem:[%s3941_s6] sm:$0xff] }
 0x23e   :  { %vm105_vm15 = vcmp.ge.s32.totalorder %v1944_v16, 0  ;;  %v1947_v20 = vld [vmem:[%s3941_s6 + $0x20] sm:$0xff] }
 0x23f   :  { %vm109_vm1 = vcmp.ge.s32.totalorder %v1947_v20, 0  ;;  %v3389_v58 = vsel %vm105_vm15, 1.0, %v2056_v53 }
 0x240   :  { %v3402_v12 = vsel %vm109_vm1, 1.0, %v2056_v53 }
 0x241   :  { %1533 = vadd.xlane.f32.xlu0 %v1513_v13  ;;  %1555 = vadd.xlane.f32.xlu1 %v1524_v55  ;;  %v3367_v13 = vsel %vm112_vm0, 1.0, %v2056_v53  ;;  %v1948_v55 = vld [vmem:[%s3941_s6 + $0x30] sm:$0xff] }
 0x242   :  { %vm111_vm12 = vcmp.ge.s32.totalorder %v1948_v55, 0 }
 0x243   :  { %v3408_v0 = vsel %vm111_vm12, 1.0, %v2056_v53 }
 0x245   :  { %1537 = vadd.xlane.f32.xlu0 %v1515_v25 }
 0x249   :  { %1541 = vadd.xlane.f32.xlu0 %v1517_v2  ;;  %v3394_v2 = vsel %vm120_vm6, 1.0, %v2056_v53 }
 0x24a   :  { %v1040_v31 = vpop.xlane.xlu1 %1039 }
 0x24b   :  { %v3293_v37 = vmax.f32 %v1040_v31, 1e-12 }
 0x24d   :  { %1545 = vadd.xlane.f32.xlu0 %v1519_v23  ;;  %v1162_v9 = vand.u32 2147483648, %v3293_v37  ;;  %vm1159_vm3 = vcmp.eq.f32.partialorder %v3293_v37, inf }
 0x24e   :  { %v1044_v27 = vpop.xlane.xlu0 %1043 }
 0x24f   :  { %v3295_v49 = vmax.f32 %v1044_v27, 1e-12 }
 0x251   :  { %1549 = vadd.xlane.f32.xlu0 %v1521_v44 }
 0x252   :  { %v1046_v51 = vpop.xlane.xlu1 %1045 }
 0x253   :  { %v3286_v57 = vmax.f32 %v1046_v51, 1e-12 }
 0x255   :  { %1553 = vadd.xlane.f32.xlu0 %v1523_v42  ;;  %1857 = vrsqrt.f32 %v3286_v57  ;;  %vm1180_vm2 = vcmp.eq.f32.partialorder %v3286_v57, inf  ;;  %v1183_v23 = vand.u32 2147483648, %v3286_v57  ;;  %vm1182_vm5 = vcmp.eq.f32.partialorder %v3286_v57, 0.0 }
 0x256   :  { %v3282_v43 = vpop.xlane.xlu1 %1061  ;;  %1859 = vrsqrt.f32 %v3293_v37 }
 0x257   :  { %1861 = vrsqrt.f32 %v3295_v49  ;;  %v3411_v44 = vmax.f32 %v3282_v43, 1e-12 }
 0x25a   :  { %v3284_v30 = vpop.xlane.xlu1 %1057 }
 0x25f   :  { %v1858_v11 = vpop.eup %1857 }
 0x260   :  { %v1179_v17 = vmul.f32 %v1858_v11, %v3286_v57  ;;  %v1860_v41 = vpop.eup %1859 }
 0x261   :  { %v1862_v52 = vpop.eup %1861  ;;  %v3417_v31 = vmul.f32 %v1860_v41, %v3293_v37 }
 0x262   :  { %v1054_v7 = vpop.xlane.xlu1 %1053  ;;  %v1181_v39 = vsel %vm1180_vm2, %v3286_v57, %v1179_v17  ;;  %v3420_v42 = vmul.f32 %v1862_v52, %v3295_v49  ;;  %vm1161_vm2 = vcmp.eq.f32.partialorder %v3293_v37, 0.0 }
 0x263   :  { %v3301_v29 = vmax.f32 %v1054_v7, 1e-12  ;;  %v1184_v27 = vsel %vm1182_vm5, %v1183_v23, %v1181_v39 }
 0x265   :  { %1863 = vrsqrt.f32 %v3301_v29  ;;  %vm1208_vm9 = vcmp.eq.f32.partialorder %v3301_v29, inf  ;;  %vm1210_vm6 = vcmp.eq.f32.partialorder %v3301_v29, 0.0 }
 0x266   :  { %v1050_v28 = vpop.xlane.xlu1 %1049 }
 0x267   :  { %v3304_v14 = vmax.f32 %v1050_v28, 1e-12 }
 0x269   :  { %1865 = vrsqrt.f32 %v3304_v14  ;;  %vm1194_vm8 = vcmp.eq.f32.partialorder %v3304_v14, inf  ;;  %vm1196_vm13 = vcmp.eq.f32.partialorder %v3304_v14, 0.0 }
 0x26a   :  { %v3288_v62 = vpop.xlane.xlu1 %1065  ;;  %v3290_v5 = vpop.xlane.xlu0 %1059 }
 0x26e   :  { %v3297_v24 = vpop.xlane.xlu1 %1069  ;;  %v3299_v59 = vpop.xlane.xlu0 %1055 }
 0x26f   :  { %v1864_v38 = vpop.eup %1863  ;;  %v3427_v28 = vmax.f32 %v3299_v59, 1e-12 }
 0x270   :  { %v1207_v35 = vmul.f32 %v1864_v38, %v3301_v29 }
 0x272   :  { %v1112_v3 = vpop.xlane.xlu1 %1111  ;;  %v1042_v26 = vpop.xlane.xlu0 %1041 }
 0x273   :  { %v3311_v47 = vmax.f32 %v1112_v3, 1e-12  ;;  %v3313_v46 = vmax.f32 %v1042_v26, 1e-12  ;;  %v1866_v6 = vpop.eup %1865  ;;  %v1197_v3 = vand.u32 2147483648, %v3304_v14 }
 0x275   :  { %1867 = vrsqrt.f32 %v3311_v47  ;;  %vm1294_vm14 = vcmp.eq.f32.partialorder %v3311_v47, inf  ;;  %v1297_v26 = vand.u32 2147483648, %v3311_v47  ;;  %vm1296_vm0 = vcmp.eq.f32.partialorder %v3311_v47, 0.0 }
 0x276   :  { %1869 = vrsqrt.f32 %v3313_v46  ;;  %v1116_v60 = vpop.xlane.xlu1 %1115  ;;  %v3324_v50 = vpop.xlane.xlu0 %1051  ;;  %vm1166_vm11 = vcmp.eq.f32.partialorder %v3313_v46, inf  ;;  %v1169_v17 = vand.u32 2147483648, %v3313_v46  ;;  %vm1168_vm7 = vcmp.eq.f32.partialorder %v3313_v46, 0.0 }
 0x277   :  { %v3332_v48 = vmax.f32 %v1116_v60, 1e-12  ;;  %v1193_v60 = vmul.f32 %v1866_v6, %v3304_v14  ;;  %v3446_v19 = vmax.f32 %v3324_v50, 1e-12  ;;  %v1209_v50 = vsel %vm1208_vm9, %v3301_v29, %v1207_v35 }
 0x278   :  { %vm1173_vm9 = vcmp.eq.f32.partialorder %v3295_v49, inf }
 0x279   :  { %1871 = vrsqrt.f32 %v3332_v48  ;;  %vm1308_vm10 = vcmp.eq.f32.partialorder %v3332_v48, inf  ;;  %v1311_v22 = vand.u32 2147483648, %v3332_v48  ;;  %vm1310_vm15 = vcmp.eq.f32.partialorder %v3332_v48, 0.0 }
 0x27a   :  { %v1120_v61 = vpop.xlane.xlu1 %1119  ;;  %v3363_v8 = vpop.xlane.xlu0 %1047  ;;  %v1195_v55 = vsel %vm1194_vm8, %v3304_v14, %v1193_v60 }
 0x27b   :  { %v3380_v25 = vmax.f32 %v1120_v61, 1e-12  ;;  %v3467_v39 = vmax.f32 %v3363_v8, 1e-12  ;;  %v1198_v8 = vsel %vm1196_vm13, %v1197_v3, %v1195_v55  ;;  %v3514_v55 = vmax.f32 %v3284_v30, 1e-12 }
 0x27c   :  { %v1160_v30 = vsel %vm1159_vm3, %v3293_v37, %v3417_v31  ;;  %vm1175_vm13 = vcmp.eq.f32.partialorder %v3295_v49, 0.0  ;;  %vm1215_vm3 = vcmp.eq.f32.partialorder %v3427_v28, inf }
 0x27d   :  { %1873 = vrsqrt.f32 %v3380_v25  ;;  %vm1322_vm1 = vcmp.eq.f32.partialorder %v3380_v25, inf  ;;  %vm1324_vm12 = vcmp.eq.f32.partialorder %v3380_v25, 0.0 }
 0x27e   :  { %v1124_v21 = vpop.xlane.xlu1 %1123  ;;  %v3413_v4 = vpop.xlane.xlu0 %1063 }
 0x27f   :  { %v1868_v51 = vpop.eup %1867  ;;  %v3422_v7 = vmax.f32 %v1124_v21, 1e-12 }
 0x280   :  { %v1870_v43 = vpop.eup %1869  ;;  %v1293_v57 = vmul.f32 %v1868_v51, %v3311_v47 }
 0x281   :  { %1875 = vrsqrt.f32 %v3422_v7  ;;  %v1165_v11 = vmul.f32 %v1870_v43, %v3313_v46  ;;  %v1325_v43 = vand.u32 2147483648, %v3380_v25  ;;  %vm1336_vm5 = vcmp.eq.f32.partialorder %v3422_v7, inf }
 0x282   :  { %v1295_v40 = vsel %vm1294_vm14, %v3311_v47, %v1293_v57  ;;  %v604_v59 = vpop.xlane.xlu1 %603  ;;  %v3439_v15 = vpop.xlane.xlu0 %1067  ;;  %1877 = vrsqrt.f32 %v3446_v19  ;;  %vm1338_vm8 = vcmp.eq.f32.partialorder %v3422_v7, 0.0 }
 0x283   :  { %v1872_v36 = vpop.eup %1871  ;;  %v1298_v63 = vsel %vm1296_vm0, %v1297_v26, %v1295_v40  ;;  %v634_v32 = vmul.f32 %v3327_v54, %v604_v59  ;;  %v1167_v47 = vsel %vm1166_vm11, %v3313_v46, %v1165_v11  ;;  %vm1201_vm11 = vcmp.eq.f32.partialorder %v3446_v19, inf }
 0x284   :  { %v1307_v16 = vmul.f32 %v1872_v36, %v3332_v48  ;;  %v1170_v1 = vsel %vm1168_vm7, %v1169_v17, %v1167_v47  ;;  %v1339_v17 = vand.u32 2147483648, %v3422_v7 }
 0x285   :  { %651 = vst.msk [vmem:[%s3943_s8 + $0x8] sm:$0xff] %vm649_vm4, %v634_v32  ;;  %v1398_v20 = vsub.f32 %v1170_v1, %v1298_v63 }
 0x286   :  { %v1309_v41 = vsel %vm1308_vm10, %v3332_v48, %v1307_v16  ;;  %v608_v46 = vpop.xlane.xlu1 %607  ;;  %v1110_v61 = vpop.xlane.xlu0 %1109  ;;  %vm1187_vm10 = vcmp.eq.f32.partialorder %v3467_v39, inf }
 0x287   :  { %v1874_v52 = vpop.eup %1873  ;;  %v1312_v38 = vsel %vm1310_vm15, %v1311_v22, %v1309_v41  ;;  %v636_v23 = vmul.f32 %v3330_v33, %v608_v46  ;;  %v3470_v6 = vmax.f32 %v1110_v61, 1e-12  ;;  %v1414_v48 = vadd.f32 0.3, %v1398_v20 }
 0x288   :  { %v1400_v21 = vsub.f32 %v1184_v27, %v1312_v38  ;;  %v1321_v51 = vmul.f32 %v1874_v52, %v3380_v25 }
 0x289   :  { %653 = vst.msk [vmem:[%s3943_s8 + $0x18] sm:$0xff] %vm649_vm4, %v636_v23  ;;  %1879 = vrsqrt.f32 %v3470_v6  ;;  %v1430_v57 = vmax.f32 %v1414_v48, 0.0  ;;  %vm1287_vm14 = vcmp.eq.f32.partialorder %v3470_v6, inf  ;;  %vm1289_vm0 = vcmp.eq.f32.partialorder %v3470_v6, 0.0 }
 0x28a   :  { %v1416_v27 = vadd.f32 0.3, %v1400_v21  ;;  %v1323_v26 = vsel %vm1322_vm1, %v3380_v25, %v1321_v51  ;;  %v612_v35 = vpop.xlane.xlu1 %611  ;;  %v1114_v40 = vpop.xlane.xlu0 %1113  ;;  %1881 = vrsqrt.f32 %v3467_v39  ;;  %v1211_v25 = vand.u32 2147483648, %v3301_v29 }
 0x28b   :  { %v1876_v59 = vpop.eup %1875  ;;  %v1326_v11 = vsel %vm1324_vm12, %v1325_v43, %v1323_v26  ;;  %v638_v60 = vmul.f32 %v3345_v56, %v612_v35  ;;  %v3488_v14 = vmax.f32 %v1114_v40, 1e-12  ;;  %v1446_v3 = vmul.f32 %v3327_v54, %v1430_v57 }
 0x28c   :  { %v1432_v36 = vmax.f32 %v1416_v27, 0.0  ;;  %v1402_v63 = vsub.f32 %v1198_v8, %v1326_v11  ;;  %v1335_v32 = vmul.f32 %v1876_v59, %v3422_v7  ;;  %v1212_v20 = vsel %vm1210_vm6, %v1211_v25, %v1209_v50  ;;  %v1878_v29 = vpop.eup %1877 }
 0x28d   :  { %655 = vst.msk [vmem:[%s3943_s8 + $0x28] sm:$0xff] %vm649_vm4, %v638_v60  ;;  %1883 = vrsqrt.f32 %v3488_v14  ;;  %1462 = vst.msk [vmem:[%s3944_s9 + $0x8] sm:$0xff] %vm649_vm4, %v1446_v3  ;;  %v3533_v50 = vmax.f32 %v3288_v62, 1e-12  ;;  %v1174_v21 = vsel %vm1173_vm9, %v3295_v49, %v3420_v42  ;;  %v1176_v43 = vand.u32 2147483648, %v3295_v49 }
 0x28e   :  { %v1448_v54 = vmul.f32 %v3330_v33, %v1432_v36  ;;  %v1418_v47 = vadd.f32 0.3, %v1402_v63  ;;  %v1337_v16 = vsel %vm1336_vm5, %v3422_v7, %v1335_v32  ;;  %v616_v1 = vpop.xlane.xlu1 %615  ;;  %v1118_v22 = vpop.xlane.xlu0 %1117  ;;  %1885 = vrsqrt.f32 %v3427_v28 }
 0x28f   :  { %v1340_v41 = vsel %vm1338_vm8, %v1339_v17, %v1337_v16  ;;  %v640_v46 = vmul.f32 %v3367_v13, %v616_v1  ;;  %v3511_v61 = vmax.f32 %v1118_v22, 1e-12  ;;  %v1290_v27 = vand.u32 2147483648, %v3470_v6 }
 0x290   :  { %1464 = vst.msk [vmem:[%s3944_s9 + $0x18] sm:$0xff] %vm649_vm4, %v1448_v54  ;;  %v1434_v33 = vmax.f32 %v1418_v47, 0.0  ;;  %v1404_v7 = vsub.f32 %v1212_v20, %v1340_v41  ;;  %v1177_v26 = vsel %vm1175_vm13, %v1176_v43, %v1174_v21  ;;  %v3567_v11 = vmax.f32 %v3297_v24, 1e-12 }
 0x291   :  { %657 = vst.msk [vmem:[%s3943_s8 + $0x38] sm:$0xff] %vm649_vm4, %v640_v46  ;;  %1887 = vrsqrt.f32 %v3511_v61  ;;  %vm1301_vm7 = vcmp.eq.f32.partialorder %v3488_v14, inf  ;;  %v1304_v24 = vand.u32 2147483648, %v3488_v14  ;;  %vm1303_vm15 = vcmp.eq.f32.partialorder %v3488_v14, 0.0 }
 0x292   :  { %v1450_v52 = vmul.f32 %v3345_v56, %v1434_v33  ;;  %v1420_v38 = vadd.f32 0.3, %v1404_v7  ;;  %v620_v23 = vpop.xlane.xlu1 %619  ;;  %v1122_v48 = vpop.xlane.xlu0 %1121  ;;  %1889 = vrsqrt.f32 %v3411_v44  ;;  %v1163_v56 = vsel %vm1161_vm2, %v1162_v9, %v1160_v30 }
 0x293   :  { %v1880_v51 = vpop.eup %1879  ;;  %v642_v31 = vmul.f32 %v3371_v10, %v620_v23  ;;  %v3540_v8 = vmax.f32 %v1122_v48, 1e-12  ;;  %1891 = vrsqrt.f32 %v3514_v55  ;;  %vm1189_vm6 = vcmp.eq.f32.partialorder %v3467_v39, 0.0 }
 0x294   :  { %1466 = vst.msk [vmem:[%s3944_s9 + $0x28] sm:$0xff] %vm649_vm4, %v1450_v52  ;;  %v1436_v62 = vmax.f32 %v1420_v38, 0.0  ;;  %v1286_v42 = vmul.f32 %v1880_v51, %v3470_v6  ;;  %v1882_v57 = vpop.eup %1881  ;;  %v1200_v20 = vmul.f32 %v1878_v29, %v3446_v19  ;;  %v1190_v30 = vand.u32 2147483648, %v3467_v39  ;;  %v1949_v52 = vld [vmem:[%s3941_s6 + $0x40] sm:$0xff] }
 0x295   :  { %659 = vst.msk [vmem:[%s3943_s8 + $0x48] sm:$0xff] %vm649_vm4, %v642_v31  ;;  %1893 = vrsqrt.f32 %v3540_v8  ;;  %v1186_v63 = vmul.f32 %v1882_v57, %v3467_v39  ;;  %vm1315_vm1 = vcmp.eq.f32.partialorder %v3511_v61, inf  ;;  %v1318_v29 = vand.u32 2147483648, %v3511_v61 }
 0x296   :  { %1895 = vrsqrt.f32 %v3533_v50  ;;  %v1452_v37 = vmul.f32 %v3367_v13, %v1436_v62  ;;  %v624_v9 = vpop.xlane.xlu1 %623  ;;  %v1126_v35 = vpop.xlane.xlu0 %1125  ;;  %v1288_v40 = vsel %vm1287_vm14, %v3470_v6, %v1286_v42  ;;  %vm113_vm12 = vcmp.ge.s32.totalorder %v1949_v52, 0  ;;  %v1951_v52 = vld [vmem:[%s3941_s6 + $0x60] sm:$0xff] }
 0x297   :  { %v1884_v59 = vpop.eup %1883  ;;  %v644_v60 = vmul.f32 %v3375_v45, %v624_v9  ;;  %v3570_v3 = vmax.f32 %v1126_v35, 1e-12  ;;  %v1291_v49 = vsel %vm1289_vm0, %v1290_v27, %v1288_v40  ;;  %v1188_v33 = vsel %vm1187_vm10, %v3467_v39, %v1186_v63 }
 0x298   :  { %1468 = vst.msk [vmem:[%s3944_s9 + $0x38] sm:$0xff] %vm649_vm4, %v1452_v37  ;;  %v1397_v13 = vsub.f32 %v1163_v56, %v1291_v49  ;;  %v1300_v36 = vmul.f32 %v1884_v59, %v3488_v14  ;;  %v1886_v6 = vpop.eup %1885  ;;  %vm1317_vm2 = vcmp.eq.f32.partialorder %v3511_v61, 0.0  ;;  %vm1217_vm5 = vcmp.eq.f32.partialorder %v3427_v28, 0.0 }
 0x299   :  { %661 = vst.msk [vmem:[%s3943_s8 + $0x58] sm:$0xff] %vm649_vm4, %v644_v60  ;;  %1897 = vrsqrt.f32 %v3570_v3  ;;  %v1214_v38 = vmul.f32 %v1886_v6, %v3427_v28  ;;  %v1191_v57 = vsel %vm1189_vm6, %v1190_v30, %v1188_v33  ;;  %v1202_v37 = vsel %vm1201_vm11, %v3446_v19, %v1200_v20 }
 0x29a   :  { %v628_v32 = vpop.xlane.xlu1 %627  ;;  %v1413_v25 = vadd.f32 0.3, %v1397_v13  ;;  %v602_v17 = vpop.xlane.xlu0 %601  ;;  %v1302_v54 = vsel %vm1301_vm7, %v3488_v14, %v1300_v36  ;;  %vm1203_vm8 = vcmp.eq.f32.partialorder %v3446_v19, 0.0  ;;  %v1204_v39 = vand.u32 2147483648, %v3446_v19 }
 0x29b   :  { %v1888_v47 = vpop.eup %1887  ;;  %v646_v16 = vmul.f32 %v3385_v34, %v628_v32  ;;  %v633_v1 = vmul.f32 %v3389_v58, %v602_v17  ;;  %v1305_v22 = vsel %vm1303_vm15, %v1304_v24, %v1302_v54  ;;  %vm1329_vm9 = vcmp.eq.f32.partialorder %v3540_v8, inf }
 0x29c   :  { %v1429_v41 = vmax.f32 %v1413_v25, 0.0  ;;  %v1399_v46 = vsub.f32 %v1177_v26, %v1305_v22  ;;  %v1314_v14 = vmul.f32 %v1888_v47, %v3511_v61  ;;  %v3598_v7 = vpop.eup %1889  ;;  %v1332_v35 = vand.u32 2147483648, %v3540_v8 }
 0x29d   :  { %663 = vst.msk [vmem:[%s3943_s8 + $0x68] sm:$0xff] %vm649_vm4, %v646_v16  ;;  %650 = vst.msk [vmem:[%s3943_s8] sm:$0xff] %vm649_vm4, %v633_v1  ;;  %v3615_v23 = vpop.eup %1891  ;;  %vm1331_vm13 = vcmp.eq.f32.partialorder %v3540_v8, 0.0  ;;  %v1205_v6 = vsel %vm1203_vm8, %v1204_v39, %v1202_v37  ;;  %v1216_v25 = vsel %vm1215_vm3, %v3427_v28, %v1214_v38  ;;  %v1218_v17 = vand.u32 2147483648, %v3427_v28  ;;  %v1950_v28 = vld [vmem:[%s3941_s6 + $0x50] sm:$0xff] }
 0x29e   :  { %v1445_v48 = vmul.f32 %v3389_v58, %v1429_v41  ;;  %v632_v21 = vpop.xlane.xlu1 %631  ;;  %v1415_v51 = vadd.f32 0.3, %v1399_v46  ;;  %v606_v31 = vpop.xlane.xlu0 %605  ;;  %v1316_v43 = vsel %vm1315_vm1, %v3511_v61, %v1314_v14  ;;  %vm1343_vm14 = vcmp.eq.f32.partialorder %v3570_v3, inf }
 0x29f   :  { %v1894_v62 = vpop.eup %1893  ;;  %v648_v56 = vmul.f32 %v3394_v2, %v632_v21  ;;  %v635_v42 = vmul.f32 %v3398_v18, %v606_v31  ;;  %v1319_v27 = vsel %vm1317_vm2, %v1318_v29, %v1316_v43  ;;  %v1346_v54 = vand.u32 2147483648, %v3570_v3  ;;  %v1952_v43 = vld [vmem:[%s3941_s6 + $0x70] sm:$0xff] }
 0x2a0   :  { %v3625_v26 = vpop.eup %1895  ;;  %1461 = vst.msk [vmem:[%s3944_s9] sm:$0xff] %vm649_vm4, %v1445_v48  ;;  %v1431_v58 = vmax.f32 %v1415_v51, 0.0  ;;  %v1401_v61 = vsub.f32 %v1191_v57, %v1319_v27  ;;  %v1328_v9 = vmul.f32 %v1894_v62, %v3540_v8  ;;  %vm1345_vm0 = vcmp.eq.f32.partialorder %v3570_v3, 0.0 }
 0x2a1   :  { %665 = vst.msk [vmem:[%s3943_s8 + $0x78] sm:$0xff] %vm649_vm4, %v648_v56  ;;  %652 = vst.msk [vmem:[%s3943_s8 + $0x10] sm:$0xff] %vm649_vm4, %v635_v42  ;;  %v1219_v33 = vsel %vm1217_vm5, %v1218_v17, %v1216_v25  ;;  %v1596_v30 = vsel %vm113_vm12, 1.0, %v2056_v53  ;;  %vm115_vm11 = vcmp.ge.s32.totalorder %v1950_v28, 0  ;;  %vm117_vm7 = vcmp.ge.s32.totalorder %v1951_v52, 0 }
 0x2a2   :  { %v1447_v40 = vmul.f32 %v3398_v18, %v1431_v58  ;;  %v1128_v59 = vpop.xlane.xlu1 %1127  ;;  %v1417_v60 = vadd.f32 0.3, %v1401_v61  ;;  %v610_v49 = vpop.xlane.xlu0 %609  ;;  %v1330_v13 = vsel %vm1329_vm9, %v3540_v8, %v1328_v9  ;;  %vm119_vm10 = vcmp.ge.s32.totalorder %v1952_v43, 0 }
 0x2a3   :  { %v1898_v36 = vpop.eup %1897  ;;  %v3650_v63 = vmax.f32 %v1128_v59, 1e-12  ;;  %v637_v24 = vmul.f32 %v3402_v12, %v610_v49  ;;  %v1333_v19 = vsel %vm1331_vm13, %v1332_v35, %v1330_v13  ;;  %v1221_v62 = vmul.f32 %v3615_v23, %v3514_v55 }
 0x2a4   :  { %1463 = vst.msk [vmem:[%s3944_s9 + $0x10] sm:$0xff] %vm649_vm4, %v1447_v40  ;;  %v1433_v18 = vmax.f32 %v1417_v60, 0.0  ;;  %v1403_v32 = vsub.f32 %v1205_v6, %v1333_v19  ;;  %v1342_v8 = vmul.f32 %v1898_v36, %v3570_v3  ;;  %v3711_v42 = vsel %vm115_vm11, 1.0, %v2056_v53 }
 0x2a5   :  { %1899 = vrsqrt.f32 %v3650_v63  ;;  %654 = vst.msk [vmem:[%s3943_s8 + $0x20] sm:$0xff] %vm649_vm4, %v637_v24  ;;  %vm1236_vm15 = vcmp.eq.f32.partialorder %v3411_v44, inf  ;;  %vm1238_vm6 = vcmp.eq.f32.partialorder %v3411_v44, 0.0  ;;  %v3724_v58 = vsel %vm119_vm10, 1.0, %v2056_v53 }
 0x2a6   :  { %v1449_v47 = vmul.f32 %v3402_v12, %v1433_v18  ;;  %v1132_v16 = vpop.xlane.xlu1 %1131  ;;  %v1419_v1 = vadd.f32 0.3, %v1403_v32  ;;  %v614_v22 = vpop.xlane.xlu0 %613  ;;  %v1344_v20 = vsel %vm1343_vm14, %v3570_v3, %v1342_v8  ;;  %v1239_v37 = vand.u32 2147483648, %v3411_v44 }
 0x2a7   :  { %v3672_v41 = vmax.f32 %v1132_v16, 1e-12  ;;  %v639_v46 = vmul.f32 %v3408_v0, %v614_v22  ;;  %v1347_v14 = vsel %vm1345_vm0, %v1346_v54, %v1344_v20  ;;  %vm1222_vm3 = vcmp.eq.f32.partialorder %v3514_v55, inf }
 0x2a8   :  { %1465 = vst.msk [vmem:[%s3944_s9 + $0x20] sm:$0xff] %vm649_vm4, %v1449_v47  ;;  %v1435_v12 = vmax.f32 %v1419_v1, 0.0  ;;  %v1405_v29 = vsub.f32 %v1219_v33, %v1347_v14  ;;  %v1223_v40 = vsel %vm1222_vm3, %v3514_v55, %v1221_v62  ;;  %v1225_v59 = vand.u32 2147483648, %v3514_v55 }
 0x2a9   :  { %1901 = vrsqrt.f32 %v3672_v41  ;;  %656 = vst.msk [vmem:[%s3943_s8 + $0x30] sm:$0xff] %vm649_vm4, %v639_v46  ;;  %vm1350_vm1 = vcmp.eq.f32.partialorder %v3650_v63, inf  ;;  %v1353_v49 = vand.u32 2147483648, %v3650_v63  ;;  %vm1224_vm12 = vcmp.eq.f32.partialorder %v3514_v55, 0.0 }
 0x2aa   :  { %v1451_v3 = vmul.f32 %v3408_v0, %v1435_v12  ;;  %v1136_v38 = vpop.xlane.xlu1 %1135  ;;  %v1421_v48 = vadd.f32 0.3, %v1405_v29  ;;  %v618_v21 = vpop.xlane.xlu0 %617  ;;  %1903 = vrsqrt.f32 %v3567_v11  ;;  %v1235_v0 = vmul.f32 %v3598_v7, %v3411_v44 }
 0x2ab   :  { %v3696_v51 = vmax.f32 %v1136_v38, 1e-12  ;;  %v641_v31 = vmul.f32 %v1596_v30, %v618_v21  ;;  %v3719_v7 = vsel %vm117_vm7, 1.0, %v2056_v53  ;;  %v3740_v53 = vmax.f32 %v3290_v5, 1e-12 }
 0x2ac   :  { %1467 = vst.msk [vmem:[%s3944_s9 + $0x30] sm:$0xff] %vm649_vm4, %v1451_v3  ;;  %v1437_v56 = vmax.f32 %v1421_v48, 0.0  ;;  %v1237_v35 = vsel %vm1236_vm15, %v3411_v44, %v1235_v0  ;;  %v1249_v13 = vmul.f32 %v3625_v26, %v3533_v50  ;;  %vm1352_vm2 = vcmp.eq.f32.partialorder %v3650_v63, 0.0 }
 0x2ad   :  { %1905 = vrsqrt.f32 %v3696_v51  ;;  %658 = vst.msk [vmem:[%s3943_s8 + $0x40] sm:$0xff] %vm649_vm4, %v641_v31  ;;  %v1240_v19 = vsel %vm1238_vm6, %v1239_v37, %v1237_v35  ;;  %v1226_v18 = vsel %vm1224_vm12, %v1225_v59, %v1223_v40  ;;  %vm1250_vm5 = vcmp.eq.f32.partialorder %v3533_v50, inf }
 0x2ae   :  { %v1453_v23 = vmul.f32 %v1596_v30, %v1437_v56  ;;  %v1140_v57 = vpop.xlane.xlu1 %1139  ;;  %v622_v27 = vpop.xlane.xlu0 %621  ;;  %vm1252_vm8 = vcmp.eq.f32.partialorder %v3533_v50, 0.0  ;;  %v1253_v44 = vand.u32 2147483648, %v3533_v50  ;;  %vm1364_vm9 = vcmp.eq.f32.partialorder %v3672_v41, inf }
 0x2af   :  { %v1900_v61 = vpop.eup %1899  ;;  %v3728_v9 = vmax.f32 %v1140_v57, 1e-12  ;;  %v643_v39 = vmul.f32 %v3711_v42, %v622_v27  ;;  %v1367_v8 = vand.u32 2147483648, %v3672_v41  ;;  %v1251_v17 = vsel %vm1250_vm5, %v3533_v50, %v1249_v13 }
 0x2b0   :  { %v1349_v60 = vmul.f32 %v1900_v61, %v3650_v63  ;;  %1469 = vst.msk [vmem:[%s3944_s9 + $0x40] sm:$0xff] %vm649_vm4, %v1453_v23  ;;  %vm1366_vm13 = vcmp.eq.f32.partialorder %v3672_v41, 0.0  ;;  %vm1264_vm14 = vcmp.eq.f32.partialorder %v3567_v11, inf  ;;  %v3777_v20 = vmax.f32 %v3413_v4, 1e-12 }
 0x2b1   :  { %1907 = vrsqrt.f32 %v3728_v9  ;;  %660 = vst.msk [vmem:[%s3943_s8 + $0x50] sm:$0xff] %vm649_vm4, %v643_v39  ;;  %v1254_v29 = vsel %vm1252_vm8, %v1253_v44, %v1251_v17  ;;  %vm1266_vm0 = vcmp.eq.f32.partialorder %v3567_v11, 0.0  ;;  %vm1378_vm11 = vcmp.eq.f32.partialorder %v3696_v51, inf }
 0x2b2   :  { %v1351_v36 = vsel %vm1350_vm1, %v3650_v63, %v1349_v60  ;;  %v626_v5 = vpop.xlane.xlu0 %625  ;;  %v1528_v24 = vpop.xlane.xlu1 %1527  ;;  %1909 = vrsqrt.f32 %v3740_v53  ;;  %v1381_v4 = vand.u32 2147483648, %v3696_v51  ;;  %vm1380_vm7 = vcmp.eq.f32.partialorder %v3696_v51, 0.0 }
 0x2b3   :  { %v1902_v6 = vpop.eup %1901  ;;  %v1354_v32 = vsel %vm1352_vm2, %v1353_v49, %v1351_v36  ;;  %v645_v25 = vmul.f32 %v3719_v7, %v626_v5  ;;  %1558 = vst.msk [vmem:[%s3945_s10 + $0x8] sm:$0xff] %vm649_vm4, %v1528_v24  ;;  %1911 = vrsqrt.f32 %v3777_v20  ;;  %v3800_v52 = vmax.f32 %v3439_v15, 1e-12 }
 0x2b4   :  { %v1406_v55 = vsub.f32 %v1226_v18, %v1354_v32  ;;  %v1363_v26 = vmul.f32 %v1902_v6, %v3672_v41  ;;  %v1904_v63 = vpop.eup %1903  ;;  %v1267_v62 = vand.u32 2147483648, %v3567_v11  ;;  %vm1392_vm10 = vcmp.eq.f32.partialorder %v3728_v9, inf }
 0x2b5   :  { %662 = vst.msk [vmem:[%s3943_s8 + $0x60] sm:$0xff] %vm649_vm4, %v645_v25  ;;  %v1263_v14 = vmul.f32 %v1904_v63, %v3567_v11  ;;  %v1395_v56 = vand.u32 2147483648, %v3728_v9  ;;  %vm1394_vm15 = vcmp.eq.f32.partialorder %v3728_v9, 0.0  ;;  %vm1229_vm6 = vcmp.eq.f32.partialorder %v3740_v53, inf }
 0x2b6   :  { %v1422_v54 = vadd.f32 0.3, %v1406_v55  ;;  %v1365_v47 = vsel %vm1364_vm9, %v3672_v41, %v1363_v26  ;;  %v630_v16 = vpop.xlane.xlu0 %629  ;;  %v1532_v1 = vpop.xlane.xlu1 %1531  ;;  %v1232_v63 = vand.u32 2147483648, %v3740_v53  ;;  %vm1231_vm1 = vcmp.eq.f32.partialorder %v3740_v53, 0.0 }
 0x2b7   :  { %v1906_v22 = vpop.eup %1905  ;;  %v1368_v46 = vsel %vm1366_vm13, %v1367_v8, %v1365_v47  ;;  %v647_v33 = vmul.f32 %v3724_v58, %v630_v16  ;;  %1560 = vst.msk [vmem:[%s3945_s10 + $0x18] sm:$0xff] %vm649_vm4, %v1532_v1  ;;  %vm1243_vm2 = vcmp.eq.f32.partialorder %v3777_v20, inf  ;;  %vm1245_vm8 = vcmp.eq.f32.partialorder %v3777_v20, 0.0 }
 0x2b8   :  { %v1438_v12 = vmax.f32 %v1422_v54, 0.0  ;;  %v1408_v41 = vsub.f32 %v1240_v19, %v1368_v46  ;;  %v1377_v30 = vmul.f32 %v1906_v22, %v3696_v51  ;;  %vm1257_vm13 = vcmp.eq.f32.partialorder %v3800_v52, inf }
 0x2b9   :  { %664 = vst.msk [vmem:[%s3943_s8 + $0x70] sm:$0xff] %vm649_vm4, %v647_v33 }
 0x2ba   :  { %v1454_v28 = vmul.f32 %v3371_v10, %v1438_v12  ;;  %v1424_v3 = vadd.f32 0.3, %v1408_v41  ;;  %v1379_v38 = vsel %vm1378_vm11, %v3696_v51, %v1377_v30  ;;  %v1130_v50 = vpop.xlane.xlu0 %1129  ;;  %v1536_v48 = vpop.xlane.xlu1 %1535  ;;  %v1265_v10 = vsel %vm1264_vm14, %v3567_v11, %v1263_v14 }
 0x2bb   :  { %v1908_v21 = vpop.eup %1907  ;;  %v1382_v31 = vsel %vm1380_vm7, %v1381_v4, %v1379_v38  ;;  %v3802_v43 = vmax.f32 %v1130_v50, 1e-12  ;;  %1562 = vst.msk [vmem:[%s3945_s10 + $0x28] sm:$0xff] %vm649_vm4, %v1536_v48  ;;  %v1268_v35 = vsel %vm1266_vm0, %v1267_v62, %v1265_v10  ;;  %v1246_v14 = vand.u32 2147483648, %v3777_v20 }
 0x2bc   :  { %1470 = vst.msk [vmem:[%s3944_s9 + $0x48] sm:$0xff] %vm649_vm4, %v1454_v28  ;;  %v1440_v51 = vmax.f32 %v1424_v3, 0.0  ;;  %v1410_v15 = vsub.f32 %v1254_v29, %v1382_v31  ;;  %v1391_v0 = vmul.f32 %v1908_v21, %v3728_v9  ;;  %v1910_v39 = vpop.eup %1909  ;;  %vm1259_vm14 = vcmp.eq.f32.partialorder %v3800_v52, 0.0 }
 0x2bd   :  { %1913 = vrsqrt.f32 %v3802_v43  ;;  %v1228_v5 = vmul.f32 %v1910_v39, %v3740_v53  ;;  %v1912_v6 = vpop.eup %1911  ;;  %vm1357_vm3 = vcmp.eq.f32.partialorder %v3802_v43, inf  ;;  %v1360_v44 = vand.u32 2147483648, %v3802_v43 }
 0x2be   :  { %v1456_v23 = vmul.f32 %v3375_v45, %v1440_v51  ;;  %v1426_v57 = vadd.f32 0.3, %v1410_v15  ;;  %v1393_v27 = vsel %vm1392_vm10, %v3728_v9, %v1391_v0  ;;  %v1134_v61 = vpop.xlane.xlu0 %1133  ;;  %v1540_v37 = vpop.xlane.xlu1 %1539  ;;  %1915 = vrsqrt.f32 %v3800_v52 }
 0x2bf   :  { %v1396_v40 = vsel %vm1394_vm15, %v1395_v56, %v1393_v27  ;;  %v1281_v59 = vmax.f32 %v1134_v61, 1e-12  ;;  %1564 = vst.msk [vmem:[%s3945_s10 + $0x38] sm:$0xff] %vm649_vm4, %v1540_v37  ;;  %v1230_v25 = vsel %vm1229_vm6, %v3740_v53, %v1228_v5  ;;  %v1242_v55 = vmul.f32 %v1912_v6, %v3777_v20 }
 0x2c0   :  { %1472 = vst.msk [vmem:[%s3944_s9 + $0x58] sm:$0xff] %vm649_vm4, %v1456_v23  ;;  %v1442_v45 = vmax.f32 %v1426_v57, 0.0  ;;  %v1412_v9 = vsub.f32 %v1268_v35, %v1396_v40  ;;  %vm1359_vm12 = vcmp.eq.f32.partialorder %v3802_v43, 0.0  ;;  %v1233_v16 = vsel %vm1231_vm1, %v1232_v63, %v1230_v25 }
 0x2c1   :  { %1917 = vrsqrt.f32 %v1281_v59  ;;  %v1244_v53 = vsel %vm1243_vm2, %v3777_v20, %v1242_v55  ;;  %vm1371_vm5 = vcmp.eq.f32.partialorder %v1281_v59, inf  ;;  %v1374_v12 = vand.u32 2147483648, %v1281_v59 }
 0x2c2   :  { %v1458_v11 = vmul.f32 %v3385_v34, %v1442_v45  ;;  %v1428_v60 = vadd.f32 0.3, %v1412_v9  ;;  %v1138_v49 = vpop.xlane.xlu0 %1137  ;;  %v1544_v13 = vpop.xlane.xlu1 %1543  ;;  %vm1373_vm9 = vcmp.eq.f32.partialorder %v1281_v59, 0.0  ;;  %v1247_v3 = vsel %vm1245_vm8, %v1246_v14, %v1244_v53 }
 0x2c3   :  { %v3835_v36 = vmax.f32 %v1138_v49, 1e-12  ;;  %1566 = vst.msk [vmem:[%s3945_s10 + $0x48] sm:$0xff] %vm649_vm4, %v1544_v13  ;;  %v1260_v31 = vand.u32 2147483648, %v3800_v52 }
 0x2c4   :  { %1474 = vst.msk [vmem:[%s3944_s9 + $0x68] sm:$0xff] %vm649_vm4, %v1458_v11  ;;  %v1444_v24 = vmax.f32 %v1428_v60, 0.0 }
 0x2c5   :  { %1919 = vrsqrt.f32 %v3835_v36  ;;  %vm1385_vm0 = vcmp.eq.f32.partialorder %v3835_v36, inf  ;;  %vm1387_vm11 = vcmp.eq.f32.partialorder %v3835_v36, 0.0 }
 0x2c6   :  { %v1460_v34 = vmul.f32 %v3394_v2, %v1444_v24  ;;  %v1526_v19 = vpop.xlane.xlu0 %1525  ;;  %v1548_v18 = vpop.xlane.xlu1 %1547 }
 0x2c7   :  { %v1914_v32 = vpop.eup %1913  ;;  %1557 = vst.msk [vmem:[%s3945_s10] sm:$0xff] %vm649_vm4, %v1526_v19  ;;  %1568 = vst.msk [vmem:[%s3945_s10 + $0x58] sm:$0xff] %vm649_vm4, %v1548_v18 }
 0x2c8   :  { %1476 = vst.msk [vmem:[%s3944_s9 + $0x78] sm:$0xff] %vm649_vm4, %v1460_v34  ;;  %v1356_v2 = vmul.f32 %v1914_v32, %v3802_v43  ;;  %v1916_v26 = vpop.eup %1915 }
 0x2c9   :  { %v1256_v22 = vmul.f32 %v1916_v26, %v3800_v52 }
 0x2ca   :  { %v1358_v8 = vsel %vm1357_vm3, %v3802_v43, %v1356_v2  ;;  %v1530_v17 = vpop.xlane.xlu0 %1529  ;;  %v1552_v54 = vpop.xlane.xlu1 %1551  ;;  %v1388_v43 = vand.u32 2147483648, %v3835_v36 }
 0x2cb   :  { %v1918_v47 = vpop.eup %1917  ;;  %v1361_v1 = vsel %vm1359_vm12, %v1360_v44, %v1358_v8  ;;  %1559 = vst.msk [vmem:[%s3945_s10 + $0x10] sm:$0xff] %vm649_vm4, %v1530_v17  ;;  %1570 = vst.msk [vmem:[%s3945_s10 + $0x68] sm:$0xff] %vm649_vm4, %v1552_v54  ;;  %v1258_v20 = vsel %vm1257_vm13, %v3800_v52, %v1256_v22 }
 0x2cc   :  { %v1407_v46 = vsub.f32 %v1233_v16, %v1361_v1  ;;  %v1370_v33 = vmul.f32 %v1918_v47, %v1281_v59  ;;  %v1261_v62 = vsel %vm1259_vm14, %v1260_v31, %v1258_v20 }
 0x2ce   :  { %v1423_v41 = vadd.f32 0.3, %v1407_v46  ;;  %v1372_v30 = vsel %vm1371_vm5, %v1281_v59, %v1370_v33  ;;  %v1534_v29 = vpop.xlane.xlu0 %1533  ;;  %v1556_v4 = vpop.xlane.xlu1 %1555 }
 0x2cf   :  { %v1920_v28 = vpop.eup %1919  ;;  %v1375_v38 = vsel %vm1373_vm9, %v1374_v12, %v1372_v30  ;;  %1561 = vst.msk [vmem:[%s3945_s10 + $0x20] sm:$0xff] %vm649_vm4, %v1534_v29  ;;  %1572 = vst.msk [vmem:[%s3945_s10 + $0x78] sm:$0xff] %vm649_vm4, %v1556_v4 }
 0x2d0   :  { %v1439_v50 = vmax.f32 %v1423_v41, 0.0  ;;  %v1409_v48 = vsub.f32 %v1247_v3, %v1375_v38  ;;  %v1384_v21 = vmul.f32 %v1920_v28, %v3835_v36 }
 0x2d2   :  { %v1455_v10 = vmul.f32 %v3711_v42, %v1439_v50  ;;  %v1425_v51 = vadd.f32 0.3, %v1409_v48  ;;  %v1386_v15 = vsel %vm1385_vm0, %v3835_v36, %v1384_v21  ;;  %v1538_v0 = vpop.xlane.xlu0 %1537 }
 0x2d3   :  { %v1389_v56 = vsel %vm1387_vm11, %v1388_v43, %v1386_v15  ;;  %1563 = vst.msk [vmem:[%s3945_s10 + $0x30] sm:$0xff] %vm649_vm4, %v1538_v0 }
 0x2d4   :  { %1471 = vst.msk [vmem:[%s3944_s9 + $0x50] sm:$0xff] %vm649_vm4, %v1455_v10  ;;  %v1441_v52 = vmax.f32 %v1425_v51, 0.0  ;;  %v1411_v42 = vsub.f32 %v1261_v62, %v1389_v56 }
 0x2d6   :  { %v1457_v23 = vmul.f32 %v3719_v7, %v1441_v52  ;;  %v1427_v57 = vadd.f32 0.3, %v1411_v42  ;;  %v1542_v27 = vpop.xlane.xlu0 %1541 }
 0x2d7   :  { %1565 = vst.msk [vmem:[%s3945_s10 + $0x40] sm:$0xff] %vm649_vm4, %v1542_v27 }
 0x2d8   :  { %1473 = vst.msk [vmem:[%s3944_s9 + $0x60] sm:$0xff] %vm649_vm4, %v1457_v23  ;;  %v1443_v61 = vmax.f32 %v1427_v57, 0.0 }
 0x2da   :  { %v1459_v37 = vmul.f32 %v3724_v58, %v1443_v61  ;;  %v1546_v39 = vpop.xlane.xlu0 %1545 }
 0x2db   :  { %1567 = vst.msk [vmem:[%s3945_s10 + $0x50] sm:$0xff] %vm649_vm4, %v1546_v39 }
 0x2dc   :  { %1475 = vst.msk [vmem:[%s3944_s9 + $0x70] sm:$0xff] %vm649_vm4, %v1459_v37 }
 0x2de   :  { %v1550_v7 = vpop.xlane.xlu0 %1549 }
 0x2df   :  { %1569 = vst.msk [vmem:[%s3945_s10 + $0x60] sm:$0xff] %vm649_vm4, %v1550_v7 }
 0x2e2   :  { %v1554_v35 = vpop.xlane.xlu0 %1553 }
 0x2e3   :  { %1571 = vst.msk [vmem:[%s3945_s10 + $0x70] sm:$0xff] %vm649_vm4, %v1554_v35 }
 0x2e4   :  { %1585 = vsyncpa [#allocation3], 1 }
 0x2e5   :  { %1586 = vsyncpa [#allocation5], 1 }
 0x2e6   :  { %1587 = vsyncpa [#allocation8], 1 }

// kernel: tpu_custom_call.1
= control target key start
LH: loop header
LB: loop body
LE: loop exit
PB: predicated region body
PF: predicated region fallthrough
CT: control target
= control target key end

     0   :  { %16 = vsyncpa [#allocation3], 0  ;;  %s3935_s0 = inlined_call_operand.vmem [shape: f32[128,128], index: 0, kind: input, shape index: {}]   ;;  %s3936_s1 = inlined_call_operand.hbm [shape: bf16[128,128], index: 1, kind: input, shape index: {}]   ;;  %s3937_s2 = inlined_call_operand.hbm [shape: f32[128,128], index: 2, kind: input, shape index: {}]   ;;  %s3938_s3 = inlined_call_operand.hbm [shape: f32[128,128], index: 3, kind: input, shape index: {}]   ;;  %s3939_s4 = inlined_call_operand.hbm [shape: f32[128,128], index: 4, kind: input, shape index: {}]   ;;  %s3940_s5 = inlined_call_operand.vmem [shape: f32[1,128], index: 5, kind: input, shape index: {}]   ;;  %s3941_s6 = inlined_call_operand.vmem [shape: s32[128,1], index: 6, kind: input, shape index: {}]   ;;  %s3942_s7 = inlined_call_operand.vmem [shape: s32[1,128], index: 7, kind: input, shape index: {}]   ;;  %s3943_s8 = inlined_call_operand.vmem [shape: f32[128,1], index: 8, kind: output, shape index: {0}]   ;;  %s3944_s9 = inlined_call_operand.vmem [shape: f32[128,1], index: 9, kind: output, shape index: {1}]   ;;  %s3945_s10 = inlined_call_operand.vmem [shape: f32[128,1], index: 10, kind: output, shape index: {2}]  }
   0x1   :  { %17 = vsyncpa [#allocation5], 0 }
   0x2   :  { %18 = vsyncpa [#allocation8], 0  ;;  %s2047_s13 = smov [#allocation4]   ;;  %s1953_s17 = scalar_lea.hbm %s3937_s2, 2048 }
   0x3   :  { %s38_s14 = sshll.u32 %s2047_s13, 4  ;;  %p1954_p0 = scmp.ne.s32.totalorder %s3937_s2, %s1953_s17  ;;  %s39_s14 = int_to_ptr.vmem [resolvable:$true] %s38_s14 }
   0x4   :  { %p1957_p1 = scmp.lt.u32.totalorder %s1953_s17, %s3937_s2 }
   0x6   :  { %p1959_p2 = pnand %p1957_p1, %p1954_p0 }
   0x8   :  { %1962 = shalt.err (!%p1959_p2)
}
   0x9   :  { %s1963_s22 = scalar_lea.vmem %s39_s14, 2048  ;;  %p1968_p4 = scmp.lt.s32.totalorder %s39_s14, %s39_s14 }
   0xa   :  { %p1964_p3 = scmp.ne.s32.totalorder %s39_s14, %s1963_s22  ;;  %p1969_p5 = scmp.lt.s32.totalorder %s1963_s22, %s1963_s22 }
   0xc   :  { %p1970_p6 = por %p1969_p5, %p1968_p4 }
   0xe   :  { %p1971_p7 = pnand %p1970_p6, %p1964_p3 }
  0x10   :  { %1974 = shalt.err (!%p1971_p7)
}
  0x11   :  { %s2048_s23 = smov 128   ;;  %s2049_s24 = smov 8  }
  0x12   :  { %44 = dma.hbm_to_vmem [thread:$0]  %s3937_s2, 2048, %s39_s14, [#allocation5], %s2048_s23, %s2048_s23, %s2049_s24  }
  0x13   :  { %s2050_s27 = smov [#allocation2]   ;;  %s1975_s11 = scalar_lea.hbm %s3936_s1, 1024 }
  0x14   :  { %s26_s28 = sshll.u32 %s2050_s27, 4  ;;  %p1976_p8 = scmp.ne.s32.totalorder %s3936_s1, %s1975_s11  ;;  %s27_s28 = int_to_ptr.vmem [resolvable:$true] %s26_s28 }
  0x15   :  { %p1979_p9 = scmp.lt.u32.totalorder %s1975_s11, %s3936_s1 }
  0x17   :  { %p1981_p10 = pnand %p1979_p9, %p1976_p8 }
  0x19   :  { %1984 = shalt.err (!%p1981_p10)
}
  0x1a   :  { %s1985_s17 = scalar_lea.vmem %s27_s28, 1024  ;;  %p1990_p12 = scmp.lt.s32.totalorder %s27_s28, %s27_s28 }
  0x1b   :  { %p1986_p11 = scmp.ne.s32.totalorder %s27_s28, %s1985_s17  ;;  %p1991_p13 = scmp.lt.s32.totalorder %s1985_s17, %s1985_s17 }
  0x1d   :  { %p1992_p0 = por %p1991_p13, %p1990_p12 }
  0x1f   :  { %p1993_p1 = pnand %p1992_p0, %p1986_p11 }
  0x21   :  { %1996 = shalt.err (!%p1993_p1)
}
  0x22   :  { %s2051_s2 = smov 64   ;;  %s2052_s14 = smov 4  }
  0x23   :  { %32 = dma.hbm_to_vmem [thread:$0]  %s3936_s1, 1024, %s27_s28, [#allocation3], %s2051_s2, %s2051_s2, %s2052_s14  }
  0x24   :  { %s2053_s20 = smov [#allocation6]   ;;  %s2054_s22 = smov [#allocation7]  }
  0x25   :  { %s50_s21 = sshll.u32 %s2053_s20, 4  ;;  %s62_s25 = sshll.u32 %s2054_s22, 4  ;;  %s51_s21 = int_to_ptr.vmem [resolvable:$true] %s50_s21  ;;  %s2139_s25 = int_to_ptr.vmem [resolvable:$true] %s62_s25 }
  0x26   :  { %s1997_s29 = scalar_lea.hbm %s3938_s3, 2048 }
  0x27   :  { %p1998_p2 = scmp.ne.s32.totalorder %s3938_s3, %s1997_s29  ;;  %p2001_p3 = scmp.lt.u32.totalorder %s1997_s29, %s3938_s3 }
  0x29   :  { %p2003_p4 = pnand %p2001_p3, %p1998_p2 }
  0x2b   :  { %2006 = shalt.err (!%p2003_p4)
}
  0x2c   :  { %s2007_s1 = scalar_lea.vmem %s51_s21, 2048  ;;  %p2012_p6 = scmp.lt.s32.totalorder %s51_s21, %s51_s21 }
  0x2d   :  { %p2008_p5 = scmp.ne.s32.totalorder %s51_s21, %s2007_s1  ;;  %p2013_p7 = scmp.lt.s32.totalorder %s2007_s1, %s2007_s1 }
  0x2f   :  { %p2014_p8 = por %p2013_p7, %p2012_p6 }
  0x31   :  { %p2015_p9 = pnand %p2014_p8, %p2008_p5 }
  0x33   :  { %2018 = shalt.err (!%p2015_p9)
}
  0x34   :  { %56 = dma.hbm_to_vmem [thread:$0]  %s3938_s3, 2048, %s51_s21, [#allocation5], %s2048_s23, %s2048_s23, %s2049_s24  }
  0x35   :  { %s2019_s2 = scalar_lea.hbm %s3939_s4, 2048 }
  0x36   :  { %p2020_p10 = scmp.ne.s32.totalorder %s3939_s4, %s2019_s2  ;;  %p2023_p11 = scmp.lt.u32.totalorder %s2019_s2, %s3939_s4 }
  0x38   :  { %p2025_p12 = pnand %p2023_p11, %p2020_p10 }
  0x3a   :  { %2028 = shalt.err (!%p2025_p12)
}
  0x3b   :  { %s2029_s22 = scalar_lea.vmem %s2139_s25, 2048  ;;  %p2034_p0 = scmp.lt.s32.totalorder %s2139_s25, %s2139_s25 }
  0x3c   :  { %p2030_p13 = scmp.ne.s32.totalorder %s2139_s25, %s2029_s22  ;;  %p2035_p1 = scmp.lt.s32.totalorder %s2029_s22, %s2029_s22 }
  0x3e   :  { %p2036_p2 = por %p2035_p1, %p2034_p0 }
  0x40   :  { %p2037_p3 = pnand %p2036_p2, %p2030_p13 }
  0x42   :  { %2040 = shalt.err (!%p2037_p3)
}
  0x43   :  { %68 = dma.hbm_to_vmem [thread:$0]  %s3939_s4, 2048, %s2139_s25, [#allocation8], %s2048_s23, %s2048_s23, %s2049_s24  }
  0x44   :  { %2041 = dma.done.wait [#allocation3], 1024  }
  0x45   :  { %2042 = vsyncadd [#allocation3], 4294966272 }
  0x46   :  { %2043 = dma.done.wait [#allocation5], 4096  }
  0x47   :  { %2044 = vsyncadd [#allocation5], 4294963200 }
  0x48   :  { %2045 = dma.done.wait [#allocation8], 2048  }
  0x49   :  { %2046 = vsyncadd [#allocation8], 4294965248  ;;  %v153_v0 = vld [vmem:[#allocation6] sm:$0xff]  ;;  %v155_v1 = vld [vmem:[#allocation6 + $0x10] sm:$0xff] }
  0x4a   :  { %v154_v2 = vld [vmem:[#allocation6 + $0x8] sm:$0xff]  ;;  %v2176_v3 = vmul.f32 0.25, %v153_v0  ;;  %v2178_v4 = vmul.f32 0.25, %v155_v1  ;;  %v156_v5 = vld [vmem:[#allocation6 + $0x18] sm:$0xff]  ;;  %v157_v8 = vld [vmem:[#allocation6 + $0x20] sm:$0xff] }
  0x4b   :  { %v2182_v6 = vmul.f32 0.25, %v154_v2  ;;  %v2184_v7 = vmul.f32 0.25, %v156_v5  ;;  %v1689_v9 = vld [vmem:[#allocation2] sm:$0xff]   ;;  %v158_v10 = vld [vmem:[#allocation6 + $0x28] sm:$0xff]  ;;  %v2188_v12 = vmul.f32 0.25, %v157_v8  ;;  %v159_v14 = vld [vmem:[#allocation6 + $0x30] sm:$0xff] }
  0x4c   :  { %217 = vmax.xlane.f32.xlu0 %v2176_v3  ;;  %221 = vmax.xlane.f32.xlu1 %v2178_v4  ;;  %v1690_v11 = vld [vmem:[#allocation2 + $0x8] sm:$0xff]   ;;  %v2190_v13 = vmul.f32 0.25, %v158_v10  ;;  %v160_v15 = vld [vmem:[#allocation6 + $0x38] sm:$0xff]  ;;  %v1691_v16 = vld [vmem:[#allocation2 + $0x10] sm:$0xff]   ;;  %v2194_v17 = vmul.f32 0.25, %v159_v14 }
  0x4d   :  { %1629 = vmatprep.subr.bf16.mxu0 %v1689_v9  ;;  %1661 = vmatprep.subr.bf16.mxu1 %v1689_v9  ;;  %v2196_v18 = vmul.f32 0.25, %v160_v15  ;;  %v161_v19 = vld [vmem:[#allocation6 + $0x40] sm:$0xff]  ;;  %v162_v20 = vld [vmem:[#allocation6 + $0x48] sm:$0xff]  ;;  %v1692_v21 = vld [vmem:[#allocation2 + $0x18] sm:$0xff]  }
  0x4e   :  { %1630 = vmatpush3.bf16.msra.mxu0 %v1689_v9  ;;  %1669 = vmatpush3.bf16.msra.mxu1 %v1689_v9  ;;  %v2200_v22 = vmul.f32 0.25, %v161_v19  ;;  %v2202_v23 = vmul.f32 0.25, %v162_v20  ;;  %v163_v24 = vld [vmem:[#allocation6 + $0x50] sm:$0xff]  ;;  %v164_v25 = vld [vmem:[#allocation6 + $0x58] sm:$0xff]  ;;  %v1693_v26 = vld [vmem:[#allocation2 + $0x20] sm:$0xff]  }
  0x4f   :  { %1631 = vmatprep.subr.bf16.mxu0 %v1690_v11  ;;  %1662 = vmatprep.subr.bf16.mxu1 %v1690_v11  ;;  %v2206_v27 = vmul.f32 0.25, %v163_v24  ;;  %v2208_v28 = vmul.f32 0.25, %v164_v25  ;;  %v2213_v29 = vld [vmem:[%s3935_s0] sm:$0xff]  ;;  %v2218_v30 = vld [vmem:[%s3935_s0 + $0x8] sm:$0xff]  ;;  %v167_v39 = vld [vmem:[#allocation6 + $0x70] sm:$0xff] }
  0x50   :  { %219 = vmax.xlane.f32.xlu0 %v2182_v6  ;;  %223 = vmax.xlane.f32.xlu1 %v2184_v7  ;;  %v165_v31 = vld [vmem:[#allocation6 + $0x60] sm:$0xff]  ;;  %v166_v32 = vld [vmem:[#allocation6 + $0x68] sm:$0xff]  ;;  %v682_v34 = vpack.c.bf16 %v2218_v30, %v2213_v29  ;;  %v168_v40 = vld [vmem:[#allocation6 + $0x78] sm:$0xff]  ;;  %v2242_v43 = vmul.f32 0.25, %v167_v39 }
  0x51   :  { %v1694_v33 = vld [vmem:[#allocation2 + $0x28] sm:$0xff]   ;;  %v2224_v35 = vmul.f32 0.25, %v165_v31  ;;  %v2226_v36 = vmul.f32 0.25, %v166_v32  ;;  %v2231_v37 = vld [vmem:[%s3935_s0 + $0x40] sm:$0xff]  ;;  %v1695_v41 = vld [vmem:[#allocation2 + $0x30] sm:$0xff]   ;;  %v2244_v44 = vmul.f32 0.25, %v168_v40 }
  0x52   :  { %1632 = vmatpush3.bf16.msra.mxu0 %v1690_v11  ;;  %1670 = vmatpush3.bf16.msra.mxu1 %v1690_v11  ;;  %v2236_v38 = vld [vmem:[%s3935_s0 + $0x48] sm:$0xff]  ;;  %v185_v45 = vld [vmem:[#allocation7] sm:$0xff]  ;;  %v1696_v47 = vld [vmem:[#allocation2 + $0x38] sm:$0xff]  }
  0x53   :  { %1633 = vmatprep.subr.bf16.mxu0 %v1691_v16  ;;  %1663 = vmatprep.subr.bf16.mxu1 %v1691_v16  ;;  %v686_v42 = vpack.c.bf16 %v2236_v38, %v2231_v37  ;;  %v186_v46 = vld [vmem:[#allocation7 + $0x8] sm:$0xff]  ;;  %v2249_v48 = vld [vmem:[%s3935_s0 + $0x10] sm:$0xff]  ;;  %v2254_v49 = vld [vmem:[%s3935_s0 + $0x18] sm:$0xff]  ;;  %v2258_v50 = vmul.f32 0.25, %v185_v45 }
  0x54   :  { %225 = vmax.xlane.f32.xlu0 %v2188_v12  ;;  %227 = vmax.xlane.f32.xlu1 %v2190_v13  ;;  %v2260_v51 = vmul.f32 0.25, %v186_v46  ;;  %v2265_v52 = vld [vmem:[%s3935_s0 + $0x20] sm:$0xff]  ;;  %v2270_v53 = vld [vmem:[%s3935_s0 + $0x28] sm:$0xff]  ;;  %v187_v54 = vld [vmem:[#allocation7 + $0x10] sm:$0xff]  ;;  %v683_v56 = vpack.c.bf16 %v2254_v49, %v2249_v48 }
  0x55   :  { %1645 = vmatprep.mubr.bf16.mxu0 %v682_v34  ;;  %1653 = vmatprep.mubr.bf16.mxu1 %v686_v42  ;;  %v188_v55 = vld [vmem:[#allocation7 + $0x18] sm:$0xff]  ;;  %v2277_v57 = vld [vmem:[%s3935_s0 + $0x50] sm:$0xff]  ;;  %v684_v59 = vpack.c.bf16 %v2270_v53, %v2265_v52  ;;  %v2289_v60 = vld [vmem:[%s3935_s0 + $0x60] sm:$0xff]  ;;  %v2298_v62 = vmul.f32 0.25, %v187_v54 }
  0x56   :  { %1634 = vmatpush3.bf16.msra.mxu0 %v1691_v16  ;;  %1671 = vmatpush3.bf16.msra.mxu1 %v1691_v16  ;;  %v2282_v58 = vld [vmem:[%s3935_s0 + $0x58] sm:$0xff]  ;;  %v2294_v61 = vld [vmem:[%s3935_s0 + $0x68] sm:$0xff]  ;;  %v2300_v63 = vmul.f32 0.25, %v188_v55  ;;  %v189_v0 = vld [vmem:[#allocation7 + $0x20] sm:$0xff] }
  0x57   :  { %1635 = vmatprep.subr.bf16.mxu0 %v1692_v21  ;;  %1664 = vmatprep.subr.bf16.mxu1 %v1692_v21  ;;  %v190_v1 = vld [vmem:[#allocation7 + $0x28] sm:$0xff]  ;;  %v687_v2 = vpack.c.bf16 %v2282_v58, %v2277_v57  ;;  %v688_v5 = vpack.c.bf16 %v2294_v61, %v2289_v60  ;;  %v672_v8 = vld [vmem:[%s3935_s0 + $0x30] sm:$0xff]  ;;  %v673_v9 = vld [vmem:[%s3935_s0 + $0x38] sm:$0xff]  ;;  %v2314_v10 = vmul.f32 0.25, %v189_v0  ;;  %v851_v0 = vmul.f32 %v2213_v29, %v2213_v29 }
  0x58   :  { %229 = vmax.xlane.f32.xlu0 %v2194_v17  ;;  %231 = vmax.xlane.f32.xlu1 %v2196_v18  ;;  %v2316_v11 = vmul.f32 0.25, %v190_v1  ;;  %v191_v14 = vld [vmem:[#allocation7 + $0x30] sm:$0xff]  ;;  %v192_v15 = vld [vmem:[#allocation7 + $0x38] sm:$0xff]  ;;  %v685_v16 = vpack.c.bf16 %v673_v9, %v672_v8  ;;  %v193_v25 = vld [vmem:[#allocation7 + $0x40] sm:$0xff]  ;;  %v852_v1 = vmul.f32 %v2218_v30, %v2218_v30  ;;  %v857_v29 = vmul.f32 %v672_v8, %v672_v8 }
  0x59   :  { %v680_v19 = vld [vmem:[%s3935_s0 + $0x70] sm:$0xff]  ;;  %v681_v20 = vld [vmem:[%s3935_s0 + $0x78] sm:$0xff]  ;;  %v2328_v24 = vmul.f32 0.25, %v192_v15  ;;  %v2332_v32 = vmul.f32 0.25, %v193_v25  ;;  %v197_v42 = vld [vmem:[#allocation7 + $0x60] sm:$0xff]  ;;  %v856_v15 = vmul.f32 %v2270_v53, %v2270_v53  ;;  %v858_v30 = vmul.f32 %v673_v9, %v673_v9 }
  0x5a   :  { %1636 = vmatpush3.bf16.msra.mxu0 %v1692_v21  ;;  %1672 = vmatpush3.bf16.msra.mxu1 %v1692_v21  ;;  %v2326_v21 = vmul.f32 0.25, %v191_v14  ;;  %v689_v31 = vpack.c.bf16 %v681_v20, %v680_v19  ;;  %v195_v34 = vld [vmem:[#allocation7 + $0x50] sm:$0xff]  ;;  %v196_v39 = vld [vmem:[#allocation7 + $0x58] sm:$0xff]  ;;  %v198_v45 = vld [vmem:[#allocation7 + $0x68] sm:$0xff]  ;;  %v2344_v46 = vmul.f32 0.25, %v197_v42  ;;  %v855_v14 = vmul.f32 %v2265_v52, %v2265_v52 }
  0x5b   :  { %1637 = vmatprep.subr.bf16.mxu0 %v1693_v26  ;;  %1665 = vmatprep.subr.bf16.mxu1 %v1693_v26  ;;  %v2338_v40 = vmul.f32 0.25, %v195_v34  ;;  %v199_v54 = vld [vmem:[#allocation7 + $0x70] sm:$0xff]  ;;  %v200_v55 = vld [vmem:[#allocation7 + $0x78] sm:$0xff]  ;;  %v861_v52 = vmul.f32 %v2277_v57, %v2277_v57  ;;  %v862_v53 = vmul.f32 %v2282_v58, %v2282_v58  ;;  %v863_v8 = vmul.f32 %v2289_v60, %v2289_v60 }
  0x5c   :  { %233 = vmax.xlane.f32.xlu0 %v2200_v22  ;;  %235 = vmax.xlane.f32.xlu1 %v2202_v23  ;;  %v864_v9 = vmul.f32 %v2294_v61, %v2294_v61 }
  0x5e   :  { %1638 = vmatpush3.bf16.msra.mxu0 %v1693_v26  ;;  %1673 = vmatpush3.bf16.msra.mxu1 %v1693_v26  ;;  %v194_v26 = vld [vmem:[#allocation7 + $0x48] sm:$0xff] }
  0x5f   :  { %1639 = vmatprep.subr.bf16.mxu0 %v1694_v33  ;;  %1666 = vmatprep.subr.bf16.mxu1 %v1694_v33 }
  0x60   :  { %237 = vmax.xlane.f32.xlu0 %v2206_v27  ;;  %239 = vmax.xlane.f32.xlu1 %v2208_v28 }
  0x62   :  { %1640 = vmatpush3.bf16.msra.mxu0 %v1694_v33  ;;  %1674 = vmatpush3.bf16.msra.mxu1 %v1694_v33  ;;  %v2334_v33 = vmul.f32 0.25, %v194_v26 }
  0x63   :  { %1641 = vmatprep.subr.bf16.mxu0 %v1695_v41  ;;  %1667 = vmatprep.subr.bf16.mxu1 %v1695_v41 }
  0x64   :  { %241 = vmax.xlane.f32.xlu0 %v2224_v35  ;;  %243 = vmax.xlane.f32.xlu1 %v2226_v36 }
  0x66   :  { %1642 = vmatpush3.bf16.msra.mxu0 %v1695_v41  ;;  %1675 = vmatpush3.bf16.msra.mxu1 %v1695_v41  ;;  %v2340_v41 = vmul.f32 0.25, %v196_v39 }
  0x67   :  { %1643 = vmatprep.subr.bf16.mxu0 %v1696_v47  ;;  %1668 = vmatprep.subr.bf16.mxu1 %v1696_v47 }
  0x68   :  { %245 = vmax.xlane.f32.xlu0 %v2242_v43  ;;  %247 = vmax.xlane.f32.xlu1 %v2244_v44 }
  0x6a   :  { %1644 = vmatpush3.bf16.msra.mxu0 %v1696_v47  ;;  %1676 = vmatpush3.bf16.msra.mxu1 %v1696_v47  ;;  %v2346_v47 = vmul.f32 0.25, %v198_v45 }
  0x6c   :  { %377 = vmax.xlane.f32.xlu0 %v2258_v50  ;;  %379 = vmax.xlane.f32.xlu1 %v2260_v51 }
  0x6d   :  { %1646 = vmatmul.mubr.bf16.vlgmr.msra.gmra.mrb[0].mxu0 %v683_v56  ;;  %1654 = vmatmul.mubr.bf16.vlgmr.msra.gmra.mrb[0].mxu1 %v687_v2  ;;  %v2350_v56 = vmul.f32 0.25, %v199_v54  ;;  %v853_v2 = vmul.f32 %v2249_v48, %v2249_v48  ;;  %v859_v48 = vmul.f32 %v2231_v37, %v2231_v37  ;;  %v865_v37 = vmul.f32 %v680_v19, %v680_v19 }
  0x6e   :  { %1649 = vmatprep.mubr.bf16.mxu0 %v684_v59  ;;  %1657 = vmatprep.mubr.bf16.mxu1 %v688_v5  ;;  %v2352_v59 = vmul.f32 0.25, %v200_v55  ;;  %v854_v5 = vmul.f32 %v2254_v49, %v2254_v49  ;;  %v860_v49 = vmul.f32 %v2236_v38, %v2236_v38  ;;  %v866_v38 = vmul.f32 %v681_v20, %v681_v20 }
  0x70   :  { %381 = vmax.xlane.f32.xlu0 %v2298_v62  ;;  %383 = vmax.xlane.f32.xlu1 %v2300_v63 }
  0x74   :  { %385 = vmax.xlane.f32.xlu0 %v2314_v10  ;;  %387 = vmax.xlane.f32.xlu1 %v2316_v11 }
  0x75   :  { %1650 = vmatmul.mubr.bf16.gmra.mrb[4].mxu0 %v685_v16  ;;  %1658 = vmatmul.mubr.bf16.gmra.mrb[4].mxu1 %v689_v31  ;;  %v3946_v16 = vmov 0  }
  0x76   :  { %1688 = vset.pattern.permute.xlu1 %v3946_v16  ;;  %1687 = vset.pattern.permute.xlu0 %v3946_v16 }
  0x78   :  { %389 = vmax.xlane.f32.xlu0 %v2326_v21  ;;  %391 = vmax.xlane.f32.xlu1 %v2328_v24 }
  0x7c   :  { %393 = vmax.xlane.f32.xlu0 %v2332_v32  ;;  %395 = vmax.xlane.f32.xlu1 %v2334_v33 }
  0x80   :  { %397 = vmax.xlane.f32.xlu0 %v2338_v40  ;;  %399 = vmax.xlane.f32.xlu1 %v2340_v41 }
  0x84   :  { %401 = vmax.xlane.f32.xlu0 %v2344_v46  ;;  %403 = vmax.xlane.f32.xlu1 %v2346_v47 }
  0x88   :  { %405 = vmax.xlane.f32.xlu0 %v2350_v56  ;;  %407 = vmax.xlane.f32.xlu1 %v2352_v59 }
  0x8c   :  { %867 = vadd.xlane.f32.xlu0 %v851_v0  ;;  %869 = vadd.xlane.f32.xlu1 %v852_v1 }
  0x90   :  { %871 = vadd.xlane.f32.xlu0 %v853_v2  ;;  %873 = vadd.xlane.f32.xlu1 %v854_v5 }
  0x94   :  { %875 = vadd.xlane.f32.xlu0 %v855_v14  ;;  %877 = vadd.xlane.f32.xlu1 %v856_v15 }
  0x98   :  { %879 = vadd.xlane.f32.xlu0 %v857_v29  ;;  %881 = vadd.xlane.f32.xlu1 %v858_v30 }
  0x9c   :  { %883 = vadd.xlane.f32.xlu0 %v859_v48  ;;  %885 = vadd.xlane.f32.xlu1 %v860_v49 }
  0xa0   :  { %887 = vadd.xlane.f32.xlu0 %v861_v52  ;;  %889 = vadd.xlane.f32.xlu1 %v862_v53 }
  0xa4   :  { %891 = vadd.xlane.f32.xlu0 %v863_v8  ;;  %893 = vadd.xlane.f32.xlu1 %v864_v9 }
  0xa8   :  { %895 = vadd.xlane.f32.xlu0 %v865_v37  ;;  %897 = vadd.xlane.f32.xlu1 %v866_v38 }
  0xd9   :  { %v218_v57 = vpop.xlane.xlu0 %217  ;;  %v222_v58 = vpop.xlane.xlu1 %221 }
  0xda   :  { %v2383_v25 = vsub.f32 %v2176_v3, %v218_v57  ;;  %v2386_v60 = vsub.f32 %v2178_v4, %v222_v58 }
  0xdc   :  { %4004 = vst [vmem:[#allocation12_spill] sm:$0xff] %v2383_v25  ;;  %4005 = vst [vmem:[#allocation13_spill] sm:$0xff] %v2386_v60  ;;  %v265_v61 = vmul.f32 1.442695, %v2383_v25  ;;  %v269_v19 = vmul.f32 1.442695, %v2386_v60 }
  0xdd   :  { %v220_v20 = vpop.xlane.xlu0 %219  ;;  %v224_v26 = vpop.xlane.xlu1 %223 }
  0xde   :  { %1697 = vpow2.f32 %v265_v61  ;;  %v2391_v31 = vsub.f32 %v2182_v6, %v220_v20  ;;  %v2394_v34 = vsub.f32 %v2184_v7, %v224_v26 }
  0xdf   :  { %1699 = vpow2.f32 %v269_v19 }
  0xe0   :  { %4006 = vst [vmem:[#allocation14_spill] sm:$0xff] %v2391_v31  ;;  %4007 = vst [vmem:[#allocation15_spill] sm:$0xff] %v2394_v34  ;;  %v267_v3 = vmul.f32 1.442695, %v2391_v31  ;;  %v271_v39 = vmul.f32 1.442695, %v2394_v34 }
  0xe1   :  { %v226_v4 = vpop.xlane.xlu0 %225  ;;  %v228_v42 = vpop.xlane.xlu1 %227 }
  0xe2   :  { %1701 = vpow2.f32 %v267_v3  ;;  %v2399_v45 = vsub.f32 %v2188_v12, %v226_v4  ;;  %v2402_v54 = vsub.f32 %v2190_v13, %v228_v42 }
  0xe3   :  { %1703 = vpow2.f32 %v271_v39 }
  0xe4   :  { %4008 = vst [vmem:[#allocation16_spill] sm:$0xff] %v2399_v45  ;;  %4009 = vst [vmem:[#allocation17_spill] sm:$0xff] %v2402_v54  ;;  %v273_v6 = vmul.f32 1.442695, %v2399_v45  ;;  %v275_v7 = vmul.f32 1.442695, %v2402_v54 }
  0xe5   :  { %v230_v55 = vpop.xlane.xlu0 %229  ;;  %v232_v0 = vpop.xlane.xlu1 %231 }
  0xe6   :  { %1705 = vpow2.f32 %v273_v6  ;;  %v2407_v1 = vsub.f32 %v2194_v17, %v230_v55  ;;  %v2410_v2 = vsub.f32 %v2196_v18, %v232_v0 }
  0xe7   :  { %1707 = vpow2.f32 %v275_v7 }
  0xe8   :  { %4010 = vst [vmem:[#allocation18_spill] sm:$0xff] %v2407_v1  ;;  %4011 = vst [vmem:[#allocation19_spill] sm:$0xff] %v2410_v2  ;;  %v1698_v5 = vpop.eup %1697  ;;  %v277_v12 = vmul.f32 1.442695, %v2407_v1  ;;  %v279_v13 = vmul.f32 1.442695, %v2410_v2 }
  0xe9   :  { %297 = vadd.xlane.f32.xlu0 %v1698_v5  ;;  %v234_v14 = vpop.xlane.xlu0 %233  ;;  %v236_v15 = vpop.xlane.xlu1 %235 }
  0xea   :  { %v1700_v29 = vpop.eup %1699  ;;  %1709 = vpow2.f32 %v277_v12  ;;  %v2415_v30 = vsub.f32 %v2200_v22, %v234_v14  ;;  %v2418_v17 = vsub.f32 %v2202_v23, %v236_v15 }
  0xeb   :  { %1711 = vpow2.f32 %v279_v13 }
  0xec   :  { %4012 = vst [vmem:[#allocation20_spill] sm:$0xff] %v2418_v17  ;;  %v1702_v48 = vpop.eup %1701  ;;  %v281_v18 = vmul.f32 1.442695, %v2415_v30  ;;  %v283_v49 = vmul.f32 1.442695, %v2418_v17 }
  0xed   :  { %301 = vadd.xlane.f32.xlu0 %v1700_v29  ;;  %299 = vadd.xlane.f32.xlu1 %v1702_v48  ;;  %v238_v52 = vpop.xlane.xlu0 %237  ;;  %v240_v53 = vpop.xlane.xlu1 %239 }
  0xee   :  { %v1704_v8 = vpop.eup %1703  ;;  %1713 = vpow2.f32 %v281_v18  ;;  %v2423_v9 = vsub.f32 %v2206_v27, %v238_v52  ;;  %v2426_v22 = vsub.f32 %v2208_v28, %v240_v53 }
  0xef   :  { %1715 = vpow2.f32 %v283_v49 }
  0xf0   :  { %4013 = vst [vmem:[#allocation21_spill] sm:$0xff] %v2426_v22  ;;  %v1706_v23 = vpop.eup %1705  ;;  %v285_v37 = vmul.f32 1.442695, %v2423_v9  ;;  %v287_v38 = vmul.f32 1.442695, %v2426_v22 }
  0xf1   :  { %303 = vadd.xlane.f32.xlu1 %v1704_v8  ;;  %305 = vadd.xlane.f32.xlu0 %v1706_v23  ;;  %v242_v57 = vpop.xlane.xlu0 %241  ;;  %v244_v58 = vpop.xlane.xlu1 %243 }
  0xf2   :  { %v1708_v61 = vpop.eup %1707  ;;  %1717 = vpow2.f32 %v285_v37  ;;  %v2431_v19 = vsub.f32 %v2224_v35, %v242_v57  ;;  %v2434_v27 = vsub.f32 %v2226_v36, %v244_v58 }
  0xf3   :  { %1719 = vpow2.f32 %v287_v38 }
  0xf4   :  { %4014 = vst [vmem:[#allocation22_spill] sm:$0xff] %v2434_v27  ;;  %v1710_v28 = vpop.eup %1709  ;;  %v289_v20 = vmul.f32 1.442695, %v2431_v19  ;;  %v291_v26 = vmul.f32 1.442695, %v2434_v27 }
  0xf5   :  { %307 = vadd.xlane.f32.xlu1 %v1708_v61  ;;  %309 = vadd.xlane.f32.xlu0 %v1710_v28  ;;  %v246_v3 = vpop.xlane.xlu0 %245  ;;  %v248_v39 = vpop.xlane.xlu1 %247 }
  0xf6   :  { %v1712_v4 = vpop.eup %1711  ;;  %1721 = vpow2.f32 %v289_v20  ;;  %v2439_v42 = vsub.f32 %v2242_v43, %v246_v3  ;;  %v2442_v35 = vsub.f32 %v2244_v44, %v248_v39 }
  0xf7   :  { %1723 = vpow2.f32 %v291_v26 }
  0xf8   :  { %4015 = vst [vmem:[#allocation23_spill] sm:$0xff] %v2442_v35  ;;  %v1714_v36 = vpop.eup %1713  ;;  %v293_v6 = vmul.f32 1.442695, %v2439_v42  ;;  %v295_v7 = vmul.f32 1.442695, %v2442_v35 }
  0xf9   :  { %311 = vadd.xlane.f32.xlu1 %v1712_v4  ;;  %313 = vadd.xlane.f32.xlu0 %v1714_v36  ;;  %v378_v55 = vpop.xlane.xlu0 %377  ;;  %v380_v0 = vpop.xlane.xlu1 %379 }
  0xfa   :  { %v1716_v5 = vpop.eup %1715  ;;  %1725 = vpow2.f32 %v293_v6  ;;  %v2447_v12 = vsub.f32 %v2258_v50, %v378_v55  ;;  %v2450_v43 = vsub.f32 %v2260_v51, %v380_v0 }
  0xfb   :  { %1727 = vpow2.f32 %v295_v7 }
  0xfc   :  { %4016 = vst [vmem:[#allocation24_spill] sm:$0xff] %v2447_v12  ;;  %4017 = vst [vmem:[#allocation25_spill] sm:$0xff] %v2450_v43  ;;  %v1718_v44 = vpop.eup %1717  ;;  %v425_v13 = vmul.f32 1.442695, %v2447_v12  ;;  %v427_v14 = vmul.f32 1.442695, %v2450_v43 }
  0xfd   :  { %315 = vadd.xlane.f32.xlu1 %v1716_v5  ;;  %317 = vadd.xlane.f32.xlu0 %v1718_v44  ;;  %v382_v15 = vpop.xlane.xlu0 %381  ;;  %v384_v29 = vpop.xlane.xlu1 %383 }
  0xfe   :  { %v1720_v48 = vpop.eup %1719  ;;  %1729 = vpow2.f32 %v425_v13  ;;  %v2455_v18 = vsub.f32 %v2298_v62, %v382_v15  ;;  %v2458_v50 = vsub.f32 %v2300_v63, %v384_v29 }
  0xff   :  { %1731 = vpow2.f32 %v427_v14 }
 0x100   :  { %4018 = vst [vmem:[#allocation26_spill] sm:$0xff] %v2455_v18  ;;  %4019 = vst [vmem:[#allocation27_spill] sm:$0xff] %v2458_v50  ;;  %v1722_v51 = vpop.eup %1721  ;;  %v429_v49 = vmul.f32 1.442695, %v2455_v18  ;;  %v431_v52 = vmul.f32 1.442695, %v2458_v50 }
 0x101   :  { %319 = vadd.xlane.f32.xlu1 %v1720_v48  ;;  %321 = vadd.xlane.f32.xlu0 %v1722_v51  ;;  %v386_v53 = vpop.xlane.xlu0 %385  ;;  %v388_v8 = vpop.xlane.xlu1 %387 }
 0x102   :  { %v1724_v23 = vpop.eup %1723  ;;  %1733 = vpow2.f32 %v429_v49  ;;  %v2463_v37 = vsub.f32 %v2314_v10, %v386_v53  ;;  %v2466_v62 = vsub.f32 %v2316_v11, %v388_v8 }
 0x103   :  { %1735 = vpow2.f32 %v431_v52 }
 0x104   :  { %4020 = vst [vmem:[#allocation28_spill] sm:$0xff] %v2463_v37  ;;  %4021 = vst [vmem:[#allocation29_spill] sm:$0xff] %v2466_v62  ;;  %v1726_v63 = vpop.eup %1725  ;;  %v433_v38 = vmul.f32 1.442695, %v2463_v37  ;;  %v435_v57 = vmul.f32 1.442695, %v2466_v62 }
 0x105   :  { %323 = vadd.xlane.f32.xlu1 %v1724_v23  ;;  %325 = vadd.xlane.f32.xlu0 %v1726_v63  ;;  %v390_v58 = vpop.xlane.xlu0 %389  ;;  %v392_v61 = vpop.xlane.xlu1 %391  ;;  %v96_v37 = vld [vmem:[%s3941_s6 + $0x40] sm:$0xff] }
 0x106   :  { %v1728_v28 = vpop.eup %1727  ;;  %1737 = vpow2.f32 %v433_v38  ;;  %v2471_v20 = vsub.f32 %v2326_v21, %v390_v58  ;;  %v2474_v10 = vsub.f32 %v2328_v24, %v392_v61 }
 0x107   :  { %1739 = vpow2.f32 %v435_v57 }
 0x108   :  { %4022 = vst [vmem:[#allocation30_spill] sm:$0xff] %v2471_v20  ;;  %4023 = vst [vmem:[#allocation31_spill] sm:$0xff] %v2474_v10  ;;  %v2476_v11 = vpop.eup %1729  ;;  %v437_v26 = vmul.f32 1.442695, %v2471_v20  ;;  %v439_v3 = vmul.f32 1.442695, %v2474_v10 }
 0x109   :  { %4024 = vst [vmem:[#allocation32_spill] sm:$0xff] %v2476_v11  ;;  %327 = vadd.xlane.f32.xlu1 %v1728_v28  ;;  %457 = vadd.xlane.f32.xlu0 %v2476_v11  ;;  %v394_v39 = vpop.xlane.xlu0 %393  ;;  %v396_v4 = vpop.xlane.xlu1 %395 }
 0x10a   :  { %v2481_v36 = vpop.eup %1731  ;;  %1741 = vpow2.f32 %v437_v26  ;;  %v2484_v21 = vsub.f32 %v2332_v32, %v394_v39  ;;  %v2487_v24 = vsub.f32 %v2334_v33, %v396_v4  ;;  %v89_v4 = vld [vmem:[%s3941_s6 + $0x8] sm:$0xff] }
 0x10b   :  { %4025 = vst [vmem:[#allocation33_spill] sm:$0xff] %v2481_v36  ;;  %1743 = vpow2.f32 %v439_v3 }
 0x10c   :  { %4026 = vst [vmem:[#allocation34_spill] sm:$0xff] %v2487_v24  ;;  %v2489_v6 = vpop.eup %1733  ;;  %v441_v7 = vmul.f32 1.442695, %v2484_v21  ;;  %v443_v55 = vmul.f32 1.442695, %v2487_v24 }
 0x10d   :  { %4027 = vst [vmem:[#allocation35_spill] sm:$0xff] %v2489_v6  ;;  %459 = vadd.xlane.f32.xlu1 %v2481_v36  ;;  %461 = vadd.xlane.f32.xlu0 %v2489_v6  ;;  %v398_v0 = vpop.xlane.xlu0 %397  ;;  %v400_v5 = vpop.xlane.xlu1 %399 }
 0x10e   :  { %v2495_v44 = vpop.eup %1735  ;;  %1745 = vpow2.f32 %v441_v7  ;;  %v2498_v32 = vsub.f32 %v2338_v40, %v398_v0  ;;  %v2501_v33 = vsub.f32 %v2340_v41, %v400_v5  ;;  %v88_v7 = vld [vmem:[%s3941_s6] sm:$0xff]  ;;  %v97_v0 = vld [vmem:[%s3941_s6 + $0x48] sm:$0xff]  ;;  %v91_v5 = vld [vmem:[%s3941_s6 + $0x18] sm:$0xff] }
 0x10f   :  { %4028 = vst [vmem:[#allocation36_spill] sm:$0xff] %v2495_v44  ;;  %1747 = vpow2.f32 %v443_v55  ;;  %v90_v55 = vld [vmem:[%s3941_s6 + $0x10] sm:$0xff] }
 0x110   :  { %4029 = vst [vmem:[#allocation37_spill] sm:$0xff] %v2501_v33  ;;  %v2503_v13 = vpop.eup %1737  ;;  %v445_v14 = vmul.f32 1.442695, %v2498_v32  ;;  %v447_v15 = vmul.f32 1.442695, %v2501_v33 }
 0x111   :  { %4030 = vst [vmem:[#allocation38_spill] sm:$0xff] %v2503_v13  ;;  %463 = vadd.xlane.f32.xlu1 %v2495_v44  ;;  %465 = vadd.xlane.f32.xlu0 %v2503_v13  ;;  %v402_v29 = vpop.xlane.xlu0 %401  ;;  %v404_v48 = vpop.xlane.xlu1 %403 }
 0x112   :  { %v2509_v51 = vpop.eup %1739  ;;  %1749 = vpow2.f32 %v445_v14  ;;  %v2512_v40 = vsub.f32 %v2344_v46, %v402_v29  ;;  %v2515_v41 = vsub.f32 %v2346_v47, %v404_v48  ;;  %v99_v14 = vld [vmem:[%s3941_s6 + $0x58] sm:$0xff]  ;;  %v92_v48 = vld [vmem:[%s3941_s6 + $0x20] sm:$0xff] }
 0x113   :  { %4031 = vst [vmem:[#allocation39_spill] sm:$0xff] %v2509_v51  ;;  %1751 = vpow2.f32 %v447_v15 }
 0x114   :  { %4032 = vst [vmem:[#allocation40_spill] sm:$0xff] %v2515_v41  ;;  %v2517_v49 = vpop.eup %1741  ;;  %v449_v52 = vmul.f32 1.442695, %v2512_v40  ;;  %v451_v53 = vmul.f32 1.442695, %v2515_v41 }
 0x115   :  { %4033 = vst [vmem:[#allocation41_spill] sm:$0xff] %v2517_v49  ;;  %467 = vadd.xlane.f32.xlu1 %v2509_v51  ;;  %469 = vadd.xlane.f32.xlu0 %v2517_v49  ;;  %v406_v8 = vpop.xlane.xlu0 %405  ;;  %v408_v23 = vpop.xlane.xlu1 %407 }
 0x116   :  { %v2523_v63 = vpop.eup %1743  ;;  %1753 = vpow2.f32 %v449_v52  ;;  %v2526_v46 = vsub.f32 %v2350_v56, %v406_v8  ;;  %v2529_v47 = vsub.f32 %v2352_v59, %v408_v23 }
 0x117   :  { %4034 = vst [vmem:[#allocation42_spill] sm:$0xff] %v2523_v63  ;;  %1755 = vpow2.f32 %v451_v53  ;;  %v101_v53 = vld [vmem:[%s3941_s6 + $0x68] sm:$0xff] }
 0x118   :  { %4035 = vst [vmem:[#allocation43_spill] sm:$0xff] %v2529_v47  ;;  %v2531_v38 = vpop.eup %1745  ;;  %v453_v57 = vmul.f32 1.442695, %v2526_v46  ;;  %v455_v58 = vmul.f32 1.442695, %v2529_v47 }
 0x119   :  { %471 = vadd.xlane.f32.xlu1 %v2523_v63  ;;  %473 = vadd.xlane.f32.xlu0 %v2531_v38  ;;  %v2537_v61 = vpop.eup %1747 }
 0x11a   :  { %4036 = vst [vmem:[#allocation44_spill] sm:$0xff] %v2537_v61  ;;  %1757 = vpow2.f32 %v453_v57  ;;  %v2592_v57 = vpop.xlane.xlu0 %867 }
 0x11b   :  { %1759 = vpow2.f32 %v455_v58 }
 0x11c   :  { %v2539_v28 = vpop.eup %1749 }
 0x11d   :  { %475 = vadd.xlane.f32.xlu1 %v2537_v61  ;;  %477 = vadd.xlane.f32.xlu0 %v2539_v28  ;;  %v2543_v56 = vpop.eup %1751 }
 0x11e   :  { %4037 = vst [vmem:[#allocation45_spill] sm:$0xff] %v2543_v56 }
 0x120   :  { %v2545_v59 = vpop.eup %1753 }
 0x121   :  { %479 = vadd.xlane.f32.xlu1 %v2543_v56  ;;  %481 = vadd.xlane.f32.xlu0 %v2545_v59  ;;  %v2549_v26 = vpop.eup %1755 }
 0x122   :  { %4038 = vst [vmem:[#allocation46_spill] sm:$0xff] %v2549_v26 }
 0x124   :  { %v2551_v3 = vpop.eup %1757 }
 0x125   :  { %483 = vadd.xlane.f32.xlu1 %v2549_v26  ;;  %485 = vadd.xlane.f32.xlu0 %v2551_v3  ;;  %v2555_v39 = vpop.eup %1759 }
 0x126   :  { %4039 = vst [vmem:[#allocation47_spill] sm:$0xff] %v2555_v39 }
 0x129   :  { %487 = vadd.xlane.f32.xlu1 %v2555_v39 }
 0x13a   :  { %958 = vperm.xlu1 %1688, %v89_v4  }
 0x13b   :  { %955 = vperm.xlu0 %1687, %v88_v7   ;;  %v93_v7 = vld [vmem:[%s3941_s6 + $0x28] sm:$0xff] }
 0x13e   :  { %961 = vperm.xlu1 %1688, %v90_v55  }
 0x13f   :  { %982 = vperm.xlu0 %1687, %v97_v0   ;;  %v103_v0 = vld [vmem:[%s3941_s6 + $0x78] sm:$0xff] }
 0x140   :  { %v2576_v15 = vpop.f32.mrb[0].mxu0  ;;  %v2590_v23 = vpop.f32.mrb[0].mxu1 }
 0x141   :  { %v2578_v29 = vpop.f32.mrb[1].mxu0  ;;  %v2594_v58 = vpop.f32.mrb[1].mxu1 }
 0x142   :  { %964 = vperm.xlu1 %1688, %v91_v5   ;;  %v2583_v52 = vpop.f32.mrb[2].mxu0  ;;  %v2596_v4 = vpop.f32.mrb[2].mxu1 }
 0x143   :  { %988 = vperm.xlu0 %1687, %v99_v14   ;;  %v2588_v8 = vpop.f32.mrb[3].mxu0  ;;  %v2601_v55 = vpop.f32.mrb[3].mxu1 }
 0x144   :  { %v2608_v14 = vpop.xlane.xlu1 %869 }
 0x146   :  { %967 = vperm.xlu1 %1688, %v92_v48   ;;  %v94_v48 = vld [vmem:[%s3941_s6 + $0x30] sm:$0xff] }
 0x147   :  { %994 = vperm.xlu0 %1687, %v101_v53   ;;  %v2615_v53 = vpop.xlane.xlu0 %871 }
 0x148   :  { %v2606_v5 = vpop.f32.mrb[4].mxu0  ;;  %v2621_v1 = vpop.f32.mrb[4].mxu1 }
 0x149   :  { %v2610_v16 = vpop.f32.mrb[5].mxu0  ;;  %4040 = vst [vmem:[#allocation48_spill] sm:$0xff] %v2621_v1  ;;  %v2623_v20 = vpop.f32.mrb[5].mxu1 }
 0x14a   :  { %970 = vperm.xlu1 %1688, %v93_v7   ;;  %v2617_v49 = vpop.f32.mrb[6].mxu0  ;;  %v2625_v7 = vpop.f32.mrb[6].mxu1 }
 0x14b   :  { %1000 = vperm.xlu0 %1687, %v103_v0   ;;  %v2619_v13 = vpop.f32.mrb[7].mxu0  ;;  %v95_v0 = vld [vmem:[%s3941_s6 + $0x38] sm:$0xff]  ;;  %v2630_v39 = vpop.f32.mrb[7].mxu1 }
 0x14c   :  { %v2632_v6 = vpop.xlane.xlu1 %873  ;;  %v2634_v45 = vpop.xlane.xlu0 %875 }
 0x14e   :  { %973 = vperm.xlu1 %1688, %v94_v48   ;;  %v98_v48 = vld [vmem:[%s3941_s6 + $0x50] sm:$0xff] }
 0x150   :  { %v2639_v26 = vpop.xlane.xlu1 %877  ;;  %v2644_v35 = vpop.xlane.xlu0 %879 }
 0x152   :  { %976 = vperm.xlu1 %1688, %v95_v0   ;;  %v100_v0 = vld [vmem:[%s3941_s6 + $0x60] sm:$0xff] }
 0x154   :  { %v2649_v11 = vpop.xlane.xlu1 %881  ;;  %v2651_v60 = vpop.xlane.xlu0 %883 }
 0x156   :  { %979 = vperm.xlu1 %1688, %v96_v37   ;;  %v102_v37 = vld [vmem:[%s3941_s6 + $0x70] sm:$0xff] }
 0x158   :  { %v2656_v47 = vpop.xlane.xlu1 %885  ;;  %v2658_v18 = vpop.xlane.xlu0 %887 }
 0x15a   :  { %985 = vperm.xlu1 %1688, %v98_v48  }
 0x15c   :  { %v2660_v56 = vpop.xlane.xlu1 %889  ;;  %v2662_v48 = vpop.xlane.xlu0 %891 }
 0x15e   :  { %991 = vperm.xlu1 %1688, %v100_v0  }
 0x160   :  { %v2664_v27 = vpop.xlane.xlu1 %893  ;;  %v2666_v25 = vpop.xlane.xlu0 %895 }
 0x161   :  { %4041 = vst [vmem:[#allocation49_spill] sm:$0xff] %v2666_v25 }
 0x162   :  { %997 = vperm.xlu1 %1688, %v102_v37  }
 0x164   :  { %v2668_v0 = vpop.xlane.xlu1 %897 }
 0x176   :  { %v2670_v41 = vpop.xlane.xlu0 %297 }
 0x177   :  { %4042 = vst [vmem:[#allocation50_spill] sm:$0xff] %v2670_v41 }
 0x17a   :  { %v2672_v12 = vpop.xlane.xlu1 %299  ;;  %v2674_v61 = vpop.xlane.xlu0 %301 }
 0x17b   :  { %4043 = vst [vmem:[#allocation51_spill] sm:$0xff] %v2674_v61 }
 0x17e   :  { %v2676_v37 = vpop.xlane.xlu1 %303  ;;  %v2678_v22 = vpop.xlane.xlu0 %305 }
 0x17f   :  { %4044 = vst [vmem:[#allocation52_spill] sm:$0xff] %v2676_v37  ;;  %4045 = vst [vmem:[#allocation53_spill] sm:$0xff] %v2678_v22 }
 0x182   :  { %v2680_v33 = vpop.xlane.xlu1 %307  ;;  %v2682_v63 = vpop.xlane.xlu0 %309 }
 0x183   :  { %4046 = vst [vmem:[#allocation54_spill] sm:$0xff] %v2680_v33  ;;  %4047 = vst [vmem:[#allocation55_spill] sm:$0xff] %v2682_v63  ;;  %v1002_v33 = vlaneseq }
 0x185   :  { %v1003_v22 = vshrl.u32 %v1002_v33, 7 }
 0x186   :  { %v2684_v17 = vpop.xlane.xlu1 %311  ;;  %v314_v24 = vpop.xlane.xlu0 %313 }
 0x187   :  { %4048 = vst [vmem:[#allocation56_spill] sm:$0xff] %v2684_v17  ;;  %1761 = vlog2.f32 %v314_v24 }
 0x18a   :  { %v2686_v51 = vpop.xlane.xlu1 %315  ;;  %v318_v2 = vpop.xlane.xlu0 %317 }
 0x18b   :  { %4049 = vst [vmem:[#allocation57_spill] sm:$0xff] %v2686_v51 }
 0x18e   :  { %v2688_v10 = vpop.xlane.xlu1 %319  ;;  %v322_v44 = vpop.xlane.xlu0 %321 }
 0x18f   :  { %4050 = vst [vmem:[#allocation58_spill] sm:$0xff] %v2688_v10 }
 0x192   :  { %v2690_v54 = vpop.xlane.xlu1 %323  ;;  %v326_v62 = vpop.xlane.xlu0 %325 }
 0x193   :  { %4051 = vst [vmem:[#allocation59_spill] sm:$0xff] %v2690_v54 }
 0x196   :  { %v2692_v36 = vpop.xlane.xlu1 %327  ;;  %v2694_v34 = vpop.xlane.xlu0 %457 }
 0x197   :  { %4052 = vst [vmem:[#allocation60_spill] sm:$0xff] %v2692_v36  ;;  %4053 = vst [vmem:[#allocation61_spill] sm:$0xff] %v2694_v34  ;;  %v104_v34 = vld [vmem:[%s3942_s7] sm:$0x1] }
 0x198   :  { %vm1022_vm0 = vcmp.lt.s32.totalorder %v104_v34, 0 }
 0x19a   :  { %v2696_v50 = vpop.xlane.xlu1 %459  ;;  %v2698_v31 = vpop.xlane.xlu0 %461 }
 0x19b   :  { %4054 = vst [vmem:[#allocation62_spill] sm:$0xff] %v2698_v31 }
 0x19e   :  { %v2700_v43 = vpop.xlane.xlu1 %463  ;;  %v2702_v17 = vpop.xlane.xlu0 %465 }
 0x19f   :  { %4055 = vst [vmem:[#allocation63_spill] sm:$0xff] %v2700_v43  ;;  %4056 = vst [vmem:[#allocation64_spill] sm:$0xff] %v2702_v17  ;;  %v1004_v17 = vsub.s32 0, %v1003_v22 }
 0x1a2   :  { %v2704_v51 = vpop.xlane.xlu1 %467  ;;  %v2706_v63 = vpop.xlane.xlu0 %469 }
 0x1a3   :  { %4057 = vst [vmem:[#allocation65_spill] sm:$0xff] %v2704_v51  ;;  %4058 = vst [vmem:[#allocation66_spill] sm:$0xff] %v2706_v63  ;;  %v4062_v51 = vmov 0  }
 0x1a4   :  { %v1071_v37 = vsel %vm1022_vm0, 1, %v4062_v51  ;;  %v922_v51 = vmul.f32 2.0, %v2578_v29 }
 0x1a5   :  { %v2720_v1 = vrot.slane %v1071_v37, %v1004_v17  ;;  %v923_v37 = vmul.f32 2.0, %v2588_v8 }
 0x1a6   :  { %v2708_v10 = vpop.xlane.xlu1 %471  ;;  %v474_v54 = vpop.xlane.xlu0 %473 }
 0x1a7   :  { %4059 = vst [vmem:[#allocation67_spill] sm:$0xff] %v2708_v10  ;;  %1763 = vlog2.f32 %v474_v54  ;;  %v1762_v10 = vpop.eup %1761  ;;  %vm1076_vm1 = vcmp.eq.s32.totalorder %v2720_v1, 1  ;;  %v4117_v1 = vld [vmem:[#allocation25_spill] sm:$0xff] }
 0x1a8   :  { %1765 = vlog2.f32 %v318_v2 }
 0x1a9   :  { %1767 = vlog2.f32 %v322_v44  ;;  %v346_v44 = vmul.f32 0.6931472, %v1762_v10 }
 0x1aa   :  { %v2713_v31 = vpop.xlane.xlu1 %475  ;;  %v478_v36 = vpop.xlane.xlu0 %477  ;;  %1769 = vrcp.f32 %v474_v54  ;;  %v2725_v54 = vld [vmem:[%s3940_s5] ss:$0 sm:$0xff] }
 0x1ab   :  { %4060 = vst [vmem:[#allocation68_spill] sm:$0xff] %v2713_v31  ;;  %1771 = vlog2.f32 %v478_v36  ;;  %v908_v29 = vadd.f32 %v2725_v54, %v2615_v53  ;;  %v909_v8 = vadd.f32 %v2725_v54, %v2632_v6 }
 0x1ac   :  { %1773 = vrcp.f32 %v478_v36  ;;  %v906_v36 = vadd.f32 %v2725_v54, %v2592_v57  ;;  %v369_v57 = vsub.f32 %v2415_v30, %v346_v44 }
 0x1ae   :  { %v2715_v63 = vpop.xlane.xlu1 %479  ;;  %v482_v24 = vpop.xlane.xlu0 %481 }
 0x1af   :  { %4061 = vst [vmem:[#allocation69_spill] sm:$0xff] %v2715_v63  ;;  %1775 = vlog2.f32 %v482_v24 }
 0x1b0   :  { %1777 = vlog2.f32 %v326_v62 }
 0x1b1   :  { %v1764_v31 = vpop.eup %1763  ;;  %1779 = vrcp.f32 %v482_v24 }
 0x1b2   :  { %v2718_v61 = vpop.xlane.xlu1 %483  ;;  %v486_v2 = vpop.xlane.xlu0 %485  ;;  %v506_v22 = vmul.f32 0.6931472, %v1764_v31  ;;  %v2736_v31 = vrot.slane %v104_v34, %v1004_v17 }
 0x1b3   :  { %4063 = vst [vmem:[#allocation70_spill] sm:$0xff] %v2718_v61  ;;  %v1766_v33 = vpop.eup %1765  ;;  %1781 = vlog2.f32 %v486_v2  ;;  %v907_v61 = vadd.f32 %v2725_v54, %v2608_v14  ;;  %v915_v14 = vadd.f32 %v2725_v54, %v2656_v47 }
 0x1b4   :  { %v1768_v63 = vpop.eup %1767  ;;  %v529_v43 = vsub.f32 %v2484_v21, %v506_v22  ;;  %v350_v24 = vmul.f32 0.6931472, %v1766_v33  ;;  %1783 = vrcp.f32 %v486_v2  ;;  %v924_v21 = vmul.f32 2.0, %v2576_v15 }
 0x1b5   :  { %v1770_v62 = vpop.eup %1769  ;;  %v354_v30 = vmul.f32 0.6931472, %v1768_v63  ;;  %v2753_v6 = vsub.f32 %v907_v61, %v923_v37  ;;  %v931_v63 = vmul.f32 2.0, %v2601_v55  ;;  %v925_v61 = vmul.f32 2.0, %v2583_v52 }
 0x1b6   :  { %v2734_v25 = vpop.xlane.xlu1 %487  ;;  %v1772_v10 = vpop.eup %1771  ;;  %v561_v34 = vmul.f32 %v1770_v62, %v2531_v38  ;;  %v577_v17 = vsub.f32 %v529_v43, %v369_v57  ;;  %v371_v15 = vsub.f32 %v2423_v9, %v350_v24  ;;  %v2789_v24 = vsub.f32 %v908_v29, %v924_v21 }
 0x1b7   :  { %4064 = vst [vmem:[#allocation71_spill] sm:$0xff] %v2734_v25  ;;  %v510_v41 = vmul.f32 0.6931472, %v1772_v10  ;;  %v1774_v22 = vpop.eup %1773  ;;  %v2748_v25 = vsub.f32 %v906_v36, %v922_v51  ;;  %v373_v37 = vsub.f32 %v2431_v19, %v354_v30  ;;  %v933_v19 = vmul.f32 2.0, %v2596_v4 }
 0x1b8   :  { %v2759_v43 = vmul.f32 %v577_v17, %v561_v34  ;;  %v563_v36 = vmul.f32 %v1774_v22, %v2539_v28  ;;  %v2806_v21 = vsub.f32 %v915_v14, %v931_v63  ;;  %v910_v30 = vadd.f32 %v2725_v54, %v2634_v45 }
 0x1b9   :  { %v531_v44 = vsub.f32 %v2498_v32, %v510_v41  ;;  %v1776_v2 = vpop.eup %1775  ;;  %v917_v32 = vadd.f32 %v2725_v54, %v2660_v56  ;;  %v926_v45 = vmul.f32 2.0, %v2610_v16  ;;  %v2826_v63 = vsub.f32 %v909_v8, %v925_v61 }
 0x1ba   :  { %v2751_v53 = vpop.permute.xlu1 %958  ;;  %v956_v33 = vpop.permute.xlu0 %955  ;;  %v514_v41 = vmul.f32 0.6931472, %v1776_v2  ;;  %v935_v16 = vmul.f32 2.0, %v2630_v39  ;;  %1785 = vlog2.f32 %v2696_v50 }
 0x1bb   :  { %vm3995_vm2 = vcmp.eq.s32.totalorder %v2751_v53, %v2736_v31  ;;  %vm1006_vm3 = vcmp.eq.s32.totalorder %v956_v33, %v2736_v31  ;;  %v1778_v47 = vpop.eup %1777  ;;  %v579_v62 = vsub.f32 %v531_v44, %v371_v15  ;;  %1787 = vlog2.f32 %v2672_v12 }
 0x1bc   :  { %vm2769_vm4 = vmor %vm3995_vm2, %vm1076_vm1  ;;  %v1023_v38 = vsel %vm1006_vm3, %v2748_v25, -1e+30  ;;  %v1780_v51 = vpop.eup %1779  ;;  %v533_v10 = vsub.f32 %v2512_v40, %v514_v41  ;;  %v358_v33 = vmul.f32 0.6931472, %v1778_v47 }
 0x1bd   :  { %vm2777_vm5 = vmor %vm1006_vm3, %vm1076_vm1  ;;  %1039 = vmax.xlane.f32.xlu1 %v1023_v38  ;;  %v1094_v56 = vsel %vm2769_vm4, 1e+30, %v2753_v6  ;;  %v1782_v17 = vpop.eup %1781  ;;  %v2797_v28 = vmul.f32 %v579_v62, %v563_v36  ;;  %v565_v44 = vmul.f32 %v1780_v51, %v2545_v59  ;;  %v4098_v36 = vld [vmem:[#allocation51_spill] sm:$0xff] }
 0x1be   :  { %v962_v52 = vpop.permute.xlu1 %961  ;;  %v2787_v57 = vpop.permute.xlu0 %982  ;;  %v1093_v34 = vsel %vm2777_vm5, 1e+30, %v2748_v25  ;;  %v518_v40 = vmul.f32 0.6931472, %v1782_v17  ;;  %v581_v2 = vsub.f32 %v533_v10, %v373_v37  ;;  %v375_v62 = vsub.f32 %v2439_v42, %v358_v33  ;;  %v4140_v25 = vld [vmem:[#allocation42_spill] sm:$0xff] }
 0x1bf   :  { %vm1008_vm6 = vcmp.eq.s32.totalorder %v962_v52, %v2736_v31  ;;  %vm1015_vm7 = vcmp.eq.s32.totalorder %v2787_v57, %v2736_v31  ;;  %v1784_v15 = vpop.eup %1783  ;;  %v2846_v42 = vsub.f32 %v917_v32, %v933_v19  ;;  %v2860_v10 = vsub.f32 %v910_v30, %v926_v45 }
 0x1c0   :  { %vm2802_vm8 = vmor %vm1008_vm6, %vm1076_vm1  ;;  %v1025_v22 = vsel %vm1008_vm6, %v2789_v24, -1e+30  ;;  %v535_v47 = vsub.f32 %v2526_v46, %v518_v40  ;;  %v2834_v59 = vmul.f32 %v581_v2, %v565_v44  ;;  %v919_v46 = vadd.f32 %v2725_v54, %v2664_v27 }
 0x1c1   :  { %vm2816_vm9 = vmor %vm1015_vm7, %vm1076_vm1  ;;  %1043 = vmax.xlane.f32.xlu0 %v1025_v22  ;;  %v1095_v14 = vsel %vm2802_vm8, 1e+30, %v2789_v24  ;;  %v567_v39 = vmul.f32 %v1784_v15, %v2551_v3  ;;  %v911_v32 = vadd.f32 %v2725_v54, %v2639_v26  ;;  %v927_v19 = vmul.f32 2.0, %v2619_v13  ;;  %v4143_v24 = vld [vmem:[#allocation21_spill] sm:$0xff] }
 0x1c2   :  { %v965_v41 = vpop.permute.xlu1 %964  ;;  %v989_v38 = vpop.permute.xlu0 %988  ;;  %v583_v37 = vsub.f32 %v535_v47, %v375_v62  ;;  %v937_v40 = vmul.f32 2.0, %v2625_v7  ;;  %v921_v26 = vadd.f32 %v2725_v54, %v2668_v0  ;;  %v2890_v30 = vsub.f32 %v919_v46, %v935_v16 }
 0x1c3   :  { %vm1009_vm10 = vcmp.eq.s32.totalorder %v965_v41, %v2736_v31  ;;  %vm1017_vm11 = vcmp.eq.s32.totalorder %v989_v38, %v2736_v31  ;;  %v4079_v7 = vmov 0  ;;  %v912_v44 = vadd.f32 %v2725_v54, %v2644_v35 }
 0x1c4   :  { %v1026_v8 = vsel %vm1009_vm10, %v2826_v63, -1e+30  ;;  %vm2842_vm12 = vmor %vm1009_vm10, %vm1076_vm1  ;;  %v2873_v3 = vmul.f32 %v583_v37, %v567_v39  ;;  %v1034_v22 = vsel %vm1017_vm11, %v2846_v42, -1e+30  ;;  %v928_v47 = vmul.f32 2.0, %v2606_v5  ;;  %v4097_v39 = vld [vmem:[#allocation48_spill] sm:$0xff] }
 0x1c5   :  { %vm2852_vm13 = vmor %vm1017_vm11, %vm1076_vm1  ;;  %1045 = vmax.xlane.f32.xlu1 %v1026_v8  ;;  %v1096_v27 = vsel %vm2842_vm12, 1e+30, %v2826_v63  ;;  %v2909_v41 = vsub.f32 %v911_v32, %v927_v19  ;;  %v1032_v38 = vsel %vm1015_vm7, %v2806_v21, -1e+30  ;;  %v2925_v5 = vsub.f32 %v921_v26, %v937_v40 }
 0x1c6   :  { %v2864_v52 = vpop.permute.xlu1 %967  ;;  %v995_v17 = vpop.permute.xlu0 %994  ;;  %v4083_v62 = vmov 0  ;;  %v929_v16 = vmul.f32 2.0, %v2617_v49  ;;  %v913_v46 = vadd.f32 %v2725_v54, %v2649_v11  ;;  %v2946_v37 = vsub.f32 %v912_v44, %v928_v47 }
 0x1c7   :  { %vm3994_vm14 = vcmp.eq.s32.totalorder %v2864_v52, %v2736_v31  ;;  %vm3998_vm15 = vcmp.eq.s32.totalorder %v995_v17, %v2736_v31  ;;  %v914_v40 = vadd.f32 %v2725_v54, %v2651_v60  ;;  %v930_v26 = vmul.f32 2.0, %v2594_v58 }
 0x1c8   :  { %vm2886_vm0 = vmor %vm3994_vm14, %vm1076_vm1  ;;  %v2962_v32 = vsub.f32 %v913_v46, %v929_v16  ;;  %v916_v60 = vadd.f32 %v2725_v54, %v2658_v18  ;;  %v936_v45 = vmul.f32 2.0, %v4097_v39  ;;  %v4104_v39 = vld [vmem:[#allocation53_spill] sm:$0xff]  ;;  %vm4118_vm4 = vcmp.eq.s32.totalorder %v2864_v52, %v2736_v31  ;;  %v4123_v18 = vld [vmem:[#allocation27_spill] sm:$0xff] }
 0x1c9   :  { %vm2896_vm3 = vmor %vm3998_vm15, %vm1076_vm1  ;;  %1061 = vmax.xlane.f32.xlu1 %v1034_v22  ;;  %v2982_v16 = vsub.f32 %v914_v40, %v930_v26  ;;  %v934_v26 = vmul.f32 2.0, %v2623_v20  ;;  %v4095_v20 = vld [vmem:[#allocation49_spill] sm:$0xff]  ;;  %v1027_v61 = vsel %vm4118_vm4, %v2860_v10, -1e+30  ;;  %vm649_vm4 = vcmask 7168  }
 0x1ca   :  { %v4080_v7 = vsel %vm2896_vm3, 4294967295, %v4079_v7  ;;  %v971_v2 = vpop.permute.xlu1 %970  ;;  %v1001_v15 = vpop.permute.xlu0 %1000 }
 0x1cb   :  { %vm1011_vm6 = vcmp.eq.s32.totalorder %v971_v2, %v2736_v31  ;;  %vm3996_vm10 = vcmp.eq.s32.totalorder %v1001_v15, %v2736_v31  ;;  %v918_v2 = vadd.f32 %v2725_v54, %v2662_v48  ;;  %v920_v48 = vadd.f32 %v2725_v54, %v4095_v20  ;;  %v1928_v54 = vld [vmem:[%s3935_s0 + $0x10] sm:$0xff] }
 0x1cc   :  { %vm2921_vm11 = vmor %vm1011_vm6, %vm1076_vm1  ;;  %v1028_v46 = vsel %vm1011_vm6, %v2909_v41, -1e+30 }
 0x1cd   :  { %vm2931_vm14 = vmor %vm3996_vm10, %vm1076_vm1  ;;  %1057 = vmax.xlane.f32.xlu1 %v1032_v38  ;;  %v1098_v57 = vsel %vm2921_vm11, 1e+30, %v2909_v41  ;;  %v932_v38 = vmul.f32 2.0, %v2590_v23  ;;  %v3026_v33 = vsub.f32 %v918_v2, %v934_v26  ;;  %v4105_v2 = vld [vmem:[#allocation65_spill] sm:$0xff]  ;;  %v3055_v20 = vsub.f32 %v920_v48, %v936_v45  ;;  %v4110_v48 = vld [vmem:[#allocation55_spill] sm:$0xff] }
 0x1ce   :  { %v4084_v62 = vsel %vm2931_vm14, 4294967295, %v4083_v62  ;;  %v2941_v8 = vpop.permute.xlu1 %973 }
 0x1cf   :  { %vm3997_vm7 = vcmp.eq.s32.totalorder %v2941_v8, %v2736_v31  ;;  %v2999_v40 = vsub.f32 %v916_v60, %v932_v38  ;;  %v4094_v60 = vld [vmem:[#allocation50_spill] sm:$0xff]  ;;  %vm4171_vm5 = vnez %v4084_v62  ;;  %v1484_v62 = vld [vmem:[#allocation4 + $0x38] sm:$0xff] }
 0x1d0   :  { %vm2955_vm2 = vmor %vm3997_vm7, %vm1076_vm1  ;;  %1789 = vlog2.f32 %v4094_v60  ;;  %v4106_v60 = vld [vmem:[#allocation54_spill] sm:$0xff] }
 0x1d2   :  { %v977_v19 = vpop.permute.xlu1 %976 }
 0x1d3   :  { %vm1013_vm10 = vcmp.eq.s32.totalorder %v977_v19, %v2736_v31  ;;  %v4161_v19 = vld [vmem:[#allocation35_spill] sm:$0xff] }
 0x1d4   :  { %v1030_v22 = vsel %vm1013_vm10, %v2962_v32, -1e+30  ;;  %vm2971_vm7 = vmor %vm1013_vm10, %vm1076_vm1 }
 0x1d5   :  { %1053 = vmax.xlane.f32.xlu1 %v1030_v22  ;;  %v1100_v47 = vsel %vm2971_vm7, 1e+30, %v2962_v32 }
 0x1d6   :  { %v980_v58 = vpop.permute.xlu1 %979 }
 0x1d7   :  { %vm3999_vm15 = vcmp.eq.s32.totalorder %v980_v58, %v2736_v31  ;;  %vm4103_vm3 = vcmp.eq.s32.totalorder %v980_v58, %v2736_v31  ;;  %v1786_v58 = vpop.eup %1785 }
 0x1d8   :  { %vm2991_vm10 = vmor %vm3999_vm15, %vm1076_vm1  ;;  %vm4091_vm15 = vcmp.eq.s32.totalorder %v995_v17, %v2736_v31  ;;  %v4096_v17 = vld [vmem:[#allocation63_spill] sm:$0xff] }
 0x1d9   :  { %1049 = vmax.xlane.f32.xlu1 %v1028_v46  ;;  %v1036_v22 = vsel %vm4091_vm15, %v2890_v30, -1e+30  ;;  %v4092_v46 = vmov 0  ;;  %1791 = vlog2.f32 %v4096_v17 }
 0x1da   :  { %v986_v23 = vpop.permute.xlu1 %985  ;;  %1793 = vlog2.f32 %v4098_v36  ;;  %v1031_v36 = vsel %vm4103_vm3, %v2982_v16, -1e+30 }
 0x1db   :  { %vm1016_vm6 = vcmp.eq.s32.totalorder %v986_v23, %v2736_v31 }
 0x1dc   :  { %vm3011_vm14 = vmor %vm1016_vm6, %vm1076_vm1  ;;  %v1033_v38 = vsel %vm1016_vm6, %v2999_v40, -1e+30  ;;  %vm4100_vm6 = vcmp.eq.s32.totalorder %v1001_v15, %v2736_v31 }
 0x1dd   :  { %v4093_v46 = vsel %vm3011_vm14, 4294967295, %v4092_v46  ;;  %1059 = vmax.xlane.f32.xlu0 %v1033_v38  ;;  %1065 = vmax.xlane.f32.xlu1 %v1036_v22  ;;  %v4099_v22 = vld [vmem:[#allocation52_spill] sm:$0xff]  ;;  %v1038_v38 = vsel %vm4100_vm6, %v2925_v5, -1e+30 }
 0x1de   :  { %v3023_v23 = vpop.permute.xlu1 %991  ;;  %1795 = vlog2.f32 %v4099_v22  ;;  %vm4173_vm8 = vnez %v4093_v46  ;;  %v1926_v46 = vld [vmem:[%s3935_s0] sm:$0xff] }
 0x1df   :  { %vm4003_vm15 = vcmp.eq.s32.totalorder %v3023_v23, %v2736_v31  ;;  %1797 = vlog2.f32 %v4104_v39  ;;  %v4112_v39 = vld [vmem:[#allocation56_spill] sm:$0xff]  ;;  %vm4124_vm12 = vcmp.eq.s32.totalorder %v3023_v23, %v2736_v31  ;;  %v4129_v23 = vld [vmem:[#allocation29_spill] sm:$0xff] }
 0x1e0   :  { %vm3040_vm14 = vmor %vm4003_vm15, %vm1076_vm1  ;;  %1799 = vlog2.f32 %v4105_v2  ;;  %vm4109_vm15 = vcmp.eq.s32.totalorder %v2751_v53, %v2736_v31  ;;  %v492_v53 = vmul.f32 0.6931472, %v1786_v58  ;;  %v1035_v41 = vsel %vm4124_vm12, %v3026_v33, -1e+30 }
 0x1e1   :  { %1055 = vmax.xlane.f32.xlu0 %v1031_v36  ;;  %1069 = vmax.xlane.f32.xlu1 %v1038_v38  ;;  %1801 = vlog2.f32 %v4106_v60  ;;  %v1024_v45 = vsel %vm4109_vm15, %v2753_v6, -1e+30  ;;  %v4111_v38 = vld [vmem:[#allocation67_spill] sm:$0xff] }
 0x1e2   :  { %v3052_v26 = vpop.permute.xlu1 %997  ;;  %1803 = vrcp.f32 %v2696_v50  ;;  %v1788_v50 = vpop.eup %1787  ;;  %v522_v15 = vsub.f32 %v4117_v1, %v492_v53  ;;  %v4121_v53 = vld [vmem:[#allocation69_spill] sm:$0xff] }
 0x1e3   :  { %vm1020_vm6 = vcmp.eq.s32.totalorder %v3052_v26, %v2736_v31  ;;  %1805 = vlog2.f32 %v4110_v48  ;;  %v3082_v36 = vpop.eup %1789  ;;  %v4115_v48 = vld [vmem:[#allocation68_spill] sm:$0xff] }
 0x1e4   :  { %vm3065_vm3 = vmor %vm1020_vm6, %vm1076_vm1  ;;  %1807 = vlog2.f32 %v4111_v38  ;;  %v1792_v60 = vpop.eup %1791  ;;  %vm4113_vm1 = vcmp.eq.s32.totalorder %v2941_v8, %v2736_v31  ;;  %v1037_v32 = vsel %vm1020_vm6, %v3055_v20, -1e+30 }
 0x1e5   :  { %1041 = vmax.xlane.f32.xlu0 %v1024_v45  ;;  %1111 = vmin.xlane.f32.xlu1 %v1094_v56  ;;  %1809 = vlog2.f32 %v4112_v39  ;;  %v1029_v6 = vsel %vm4113_vm1, %v2946_v37, -1e+30  ;;  %v3090_v9 = vpop.eup %1793  ;;  %v332_v56 = vmul.f32 0.6931472, %v1788_v50  ;;  %v4114_v45 = vld [vmem:[#allocation57_spill] sm:$0xff]  ;;  %v4116_v39 = vld [vmem:[#allocation58_spill] sm:$0xff] }
 0x1e6   :  { %1811 = vrcp.f32 %v4096_v17  ;;  %v496_v8 = vmul.f32 0.6931472, %v1792_v60  ;;  %v4122_v60 = vld [vmem:[#allocation60_spill] sm:$0xff]  ;;  %v334_v13 = vmul.f32 0.6931472, %v3090_v9  ;;  %v4153_v9 = vld [vmem:[#allocation43_spill] sm:$0xff] }
 0x1e7   :  { %1813 = vlog2.f32 %v4114_v45  ;;  %v4120_v45 = vld [vmem:[#allocation59_spill] sm:$0xff] }
 0x1e8   :  { %v1796_v58 = vpop.eup %1795  ;;  %1815 = vlog2.f32 %v4115_v48 }
 0x1e9   :  { %1051 = vmax.xlane.f32.xlu0 %v1029_v6  ;;  %1115 = vmin.xlane.f32.xlu1 %v1096_v27  ;;  %v3098_v17 = vpop.eup %1797  ;;  %1817 = vlog2.f32 %v4116_v39  ;;  %v4119_v27 = vld [vmem:[#allocation14_spill] sm:$0xff]  ;;  %v336_v6 = vmul.f32 0.6931472, %v1796_v58 }
 0x1ea   :  { %v1800_v12 = vpop.eup %1799  ;;  %1819 = vrcp.f32 %v4105_v2  ;;  %v362_v50 = vsub.f32 %v4119_v27, %v332_v56  ;;  %v524_v56 = vsub.f32 %v4123_v18, %v496_v8  ;;  %v4127_v18 = vld [vmem:[#allocation33_spill] sm:$0xff] }
 0x1eb   :  { %v1802_v63 = vpop.eup %1801  ;;  %1821 = vlog2.f32 %v4120_v45  ;;  %v500_v52 = vmul.f32 0.6931472, %v1800_v12  ;;  %v4126_v45 = vld [vmem:[#allocation61_spill] sm:$0xff] }
 0x1ec   :  { %v1804_v1 = vpop.eup %1803  ;;  %1823 = vlog2.f32 %v4121_v53  ;;  %v570_v39 = vsub.f32 %v522_v15, %v362_v50  ;;  %v340_v27 = vmul.f32 0.6931472, %v1802_v63 }
 0x1ed   :  { %1047 = vmax.xlane.f32.xlu0 %v1027_v61  ;;  %1119 = vmin.xlane.f32.xlu1 %v1098_v57  ;;  %v3114_v2 = vpop.eup %1805  ;;  %1825 = vlog2.f32 %v4122_v60  ;;  %v4125_v57 = vld [vmem:[#allocation15_spill] sm:$0xff]  ;;  %v554_v12 = vmul.f32 %v1804_v1, %v4127_v18  ;;  %v526_v50 = vsub.f32 %v4129_v23, %v500_v52  ;;  %v4132_v52 = vld [vmem:[#allocation36_spill] sm:$0xff] }
 0x1ee   :  { %v1808_v58 = vpop.eup %1807  ;;  %1827 = vrcp.f32 %v4111_v38  ;;  %v364_v61 = vsub.f32 %v4125_v57, %v336_v6  ;;  %v4128_v38 = vld [vmem:[#allocation70_spill] sm:$0xff] }
 0x1ef   :  { %v1810_v35 = vpop.eup %1809  ;;  %1829 = vlog2.f32 %v4126_v45  ;;  %v504_v60 = vmul.f32 0.6931472, %v1808_v58  ;;  %v586_v11 = vmul.f32 %v570_v39, %v554_v12  ;;  %v4131_v57 = vld [vmem:[#allocation62_spill] sm:$0xff] }
 0x1f0   :  { %v1812_v15 = vpop.eup %1811  ;;  %1831 = vlog2.f32 %v4128_v38  ;;  %v572_v6 = vsub.f32 %v524_v56, %v364_v61  ;;  %v4133_v56 = vld [vmem:[#allocation71_spill] sm:$0xff] }
 0x1f1   :  { %1063 = vmax.xlane.f32.xlu0 %v1035_v41  ;;  %1123 = vmin.xlane.f32.xlu1 %v1100_v47  ;;  %v1814_v8 = vpop.eup %1813  ;;  %1833 = vrcp.f32 %v4115_v48  ;;  %v4130_v47 = vld [vmem:[#allocation17_spill] sm:$0xff]  ;;  %v344_v41 = vmul.f32 0.6931472, %v1810_v35  ;;  %v556_v58 = vmul.f32 %v1812_v15, %v4132_v52  ;;  %v4134_v48 = vld [vmem:[#allocation31_spill] sm:$0xff] }
 0x1f2   :  { %v1816_v63 = vpop.eup %1815  ;;  %v366_v1 = vsub.f32 %v4130_v47, %v340_v27  ;;  %1835 = vlog2.f32 %v4131_v57  ;;  %v528_v18 = vsub.f32 %v4134_v48, %v504_v60  ;;  %v4135_v35 = vld [vmem:[#allocation19_spill] sm:$0xff]  ;;  %v348_v0 = vmul.f32 0.6931472, %v1814_v8  ;;  %v4141_v48 = vld [vmem:[#allocation66_spill] sm:$0xff] }
 0x1f3   :  { %v1818_v44 = vpop.eup %1817  ;;  %1837 = vlog2.f32 %v4133_v56  ;;  %v508_v12 = vmul.f32 0.6931472, %v1816_v63  ;;  %v588_v23 = vmul.f32 %v572_v6, %v556_v58  ;;  %v368_v47 = vsub.f32 %v4135_v35, %v344_v41  ;;  %v4137_v6 = vld [vmem:[#allocation64_spill] sm:$0xff]  ;;  %v4138_v63 = vld [vmem:[#allocation34_spill] sm:$0xff] }
 0x1f4   :  { %v1820_v39 = vpop.eup %1819  ;;  %v574_v31 = vsub.f32 %v526_v50, %v366_v1  ;;  %1839 = vrcp.f32 %v4121_v53  ;;  %v352_v52 = vmul.f32 0.6931472, %v1818_v44  ;;  %v4145_v35 = vld [vmem:[#allocation44_spill] sm:$0xff] }
 0x1f5   :  { %1067 = vmax.xlane.f32.xlu0 %v1037_v32  ;;  %603 = vadd.xlane.f32.xlu1 %v586_v11  ;;  %v1822_v61 = vpop.eup %1821  ;;  %1841 = vrcp.f32 %v4126_v45  ;;  %v4136_v11 = vld [vmem:[#allocation39_spill] sm:$0xff]  ;;  %v530_v53 = vsub.f32 %v4138_v63, %v508_v12  ;;  %v576_v41 = vsub.f32 %v528_v18, %v368_v47  ;;  %v4139_v45 = vld [vmem:[#allocation20_spill] sm:$0xff]  ;;  %v4142_v12 = vld [vmem:[#allocation37_spill] sm:$0xff] }
 0x1f6   :  { %v1824_v26 = vpop.eup %1823  ;;  %v558_v15 = vmul.f32 %v1820_v39, %v4136_v11  ;;  %1843 = vlog2.f32 %v4137_v6  ;;  %v370_v55 = vsub.f32 %v4139_v45, %v348_v0  ;;  %v372_v29 = vsub.f32 %v4143_v24, %v352_v52 }
 0x1f7   :  { %v1826_v27 = vpop.eup %1825  ;;  %v512_v32 = vmul.f32 0.6931472, %v1824_v26  ;;  %1845 = vrcp.f32 %v4128_v38  ;;  %v4144_v26 = vsel %vm2886_vm0, 1e+30, %v2860_v10  ;;  %v4149_v10 = vld [vmem:[#allocation22_spill] sm:$0xff] }
 0x1f8   :  { %v1828_v60 = vpop.eup %1827  ;;  %v590_v1 = vmul.f32 %v574_v31, %v558_v15  ;;  %1847 = vrcp.f32 %v4131_v57  ;;  %v578_v44 = vsub.f32 %v530_v53, %v370_v55  ;;  %v330_v57 = vmul.f32 0.6931472, %v3082_v36  ;;  %v4146_v15 = vld [vmem:[#allocation24_spill] sm:$0xff] }
 0x1f9   :  { %1109 = vmin.xlane.f32.xlu0 %v1093_v34  ;;  %607 = vadd.xlane.f32.xlu1 %v588_v23  ;;  %v1830_v50 = vpop.eup %1829  ;;  %v560_v34 = vmul.f32 %v1828_v60, %v4140_v25  ;;  %1849 = vlog2.f32 %v4141_v48  ;;  %v532_v38 = vsub.f32 %v4142_v12, %v512_v32  ;;  %v4147_v53 = vld [vmem:[#allocation40_spill] sm:$0xff]  ;;  %v360_v55 = vmul.f32 0.6931472, %v1826_v27  ;;  %v4151_v25 = vld [vmem:[#allocation45_spill] sm:$0xff] }
 0x1fa   :  { %v1832_v8 = vpop.eup %1831  ;;  %v490_v39 = vmul.f32 0.6931472, %v1830_v50  ;;  %1851 = vrcp.f32 %v4133_v56  ;;  %v4150_v52 = vsel %vm2955_vm2, 1e+30, %v2946_v37  ;;  %v4154_v27 = vld [vmem:[#allocation13_spill] sm:$0xff]  ;;  %v4155_v37 = vld [vmem:[#allocation32_spill] sm:$0xff]  ;;  %vm4169_vm2 = vnez %v4080_v7 }
 0x1fb   :  { %v1834_v58 = vpop.eup %1833  ;;  %v516_v23 = vmul.f32 0.6931472, %v1832_v8  ;;  %v592_v0 = vmul.f32 %v576_v41, %v560_v34  ;;  %1853 = vrcp.f32 %v4137_v6  ;;  %v338_v24 = vmul.f32 0.6931472, %v3098_v17  ;;  %v1482_v7 = vld [vmem:[#allocation4 + $0x28] sm:$0xff] }
 0x1fc   :  { %v1836_v18 = vpop.eup %1835  ;;  %v562_v47 = vmul.f32 %v1834_v58, %v4145_v35  ;;  %v521_v60 = vsub.f32 %v4146_v15, %v490_v39  ;;  %v4152_v39 = vld [vmem:[#allocation26_spill] sm:$0xff]  ;;  %1855 = vrcp.f32 %v4141_v48 }
 0x1fd   :  { %1113 = vmin.xlane.f32.xlu0 %v1095_v14  ;;  %611 = vadd.xlane.f32.xlu1 %v590_v1  ;;  %v1838_v31 = vpop.eup %1837  ;;  %v356_v14 = vmul.f32 0.6931472, %v1822_v61  ;;  %v494_v50 = vmul.f32 0.6931472, %v1836_v18  ;;  %v534_v36 = vsub.f32 %v4147_v53, %v516_v23  ;;  %v580_v1 = vsub.f32 %v532_v38, %v372_v29  ;;  %v4148_v61 = vld [vmem:[#allocation12_spill] sm:$0xff]  ;;  %v4156_v29 = vld [vmem:[#allocation23_spill] sm:$0xff] }
 0x1fe   :  { %v1840_v11 = vpop.eup %1839  ;;  %v520_v32 = vmul.f32 0.6931472, %v1838_v31  ;;  %v594_v56 = vmul.f32 %v578_v44, %v562_v47  ;;  %v361_v8 = vsub.f32 %v4148_v61, %v330_v57  ;;  %v363_v57 = vsub.f32 %v4154_v27, %v334_v13  ;;  %v4158_v35 = vld [vmem:[#allocation46_spill] sm:$0xff] }
 0x1ff   :  { %v1842_v63 = vpop.eup %1841  ;;  %v374_v45 = vsub.f32 %v4149_v10, %v356_v14  ;;  %v564_v34 = vmul.f32 %v1840_v11, %v4151_v25  ;;  %v523_v18 = vsub.f32 %v4152_v39, %v494_v50  ;;  %v376_v14 = vsub.f32 %v4156_v29, %v360_v55  ;;  %v4159_v50 = vld [vmem:[#allocation28_spill] sm:$0xff] }
 0x200   :  { %v1844_v41 = vpop.eup %1843  ;;  %v569_v12 = vsub.f32 %v521_v60, %v361_v8  ;;  %v553_v49 = vmul.f32 %v1842_v63, %v4155_v37  ;;  %v4163_v8 = vld [vmem:[#allocation30_spill] sm:$0xff]  ;;  %v1924_v37 = vld [vmem:[%s3935_s0 + $0x38] sm:$0xff] }
 0x201   :  { %1117 = vmin.xlane.f32.xlu0 %v4144_v26  ;;  %615 = vadd.xlane.f32.xlu1 %v592_v0  ;;  %v1846_v58 = vpop.eup %1845  ;;  %v498_v23 = vmul.f32 0.6931472, %v1844_v41  ;;  %v536_v0 = vsub.f32 %v4153_v9, %v520_v32  ;;  %v596_v6 = vmul.f32 %v580_v1, %v564_v34  ;;  %v582_v44 = vsub.f32 %v534_v36, %v374_v45  ;;  %v4160_v32 = vld [vmem:[#allocation16_spill] sm:$0xff]  ;;  %v4162_v1 = vld [vmem:[#allocation47_spill] sm:$0xff]  ;;  %v4165_v34 = vld [vmem:[#allocation38_spill] sm:$0xff] }
 0x202   :  { %v1848_v38 = vpop.eup %1847  ;;  %v4157_v26 = vsel %vm2991_vm10, 1e+30, %v2982_v16  ;;  %v566_v47 = vmul.f32 %v1846_v58, %v4158_v35  ;;  %v585_v15 = vmul.f32 %v569_v12, %v553_v49  ;;  %v571_v60 = vsub.f32 %v523_v18, %v363_v57  ;;  %v1488_v35 = vld [vmem:[#allocation4 + $0x58] sm:$0xff] }
 0x203   :  { %v1850_v31 = vpop.eup %1849  ;;  %v525_v53 = vsub.f32 %v4159_v50, %v498_v23  ;;  %v584_v63 = vsub.f32 %v536_v0, %v376_v14  ;;  %v365_v17 = vsub.f32 %v4160_v32, %v338_v24  ;;  %v555_v16 = vmul.f32 %v1848_v38, %v4161_v19  ;;  %v4167_v38 = vld [vmem:[#allocation41_spill] sm:$0xff]  ;;  %v1492_v19 = vld [vmem:[#allocation4 + $0x78] sm:$0xff] }
 0x204   :  { %v1852_v11 = vpop.eup %1851  ;;  %v502_v48 = vmul.f32 0.6931472, %v1850_v31  ;;  %v598_v36 = vmul.f32 %v582_v44, %v566_v47  ;;  %v4166_v12 = vsel %vm2816_vm9, 1e+30, %v2806_v21  ;;  %v4168_v0 = vsel %vm2852_vm13, 1e+30, %v2846_v42 }
 0x205   :  { %1121 = vmin.xlane.f32.xlu0 %v4150_v52  ;;  %619 = vadd.xlane.f32.xlu1 %v594_v56  ;;  %v342_v56 = vmul.f32 0.6931472, %v3114_v2  ;;  %v568_v41 = vmul.f32 %v1852_v11, %v4162_v1  ;;  %v1854_v61 = vpop.eup %1853  ;;  %v587_v10 = vmul.f32 %v571_v60, %v555_v16  ;;  %v573_v55 = vsub.f32 %v525_v53, %v365_v17  ;;  %v4164_v52 = vld [vmem:[#allocation18_spill] sm:$0xff]  ;;  %v1921_v21 = vld [vmem:[%s3935_s0 + $0x8] sm:$0xff]  ;;  %v1480_v31 = vld [vmem:[#allocation4 + $0x18] sm:$0xff] }
 0x206   :  { %v527_v13 = vsub.f32 %v4163_v8, %v502_v48  ;;  %v557_v58 = vmul.f32 %v1854_v61, %v4165_v34  ;;  %v1856_v39 = vpop.eup %1855  ;;  %v4170_v44 = vsel %vm4169_vm2, 1e+30, %v2890_v30  ;;  %v4172_v42 = vsel %vm4171_vm5, 1e+30, %v2925_v5  ;;  %v1486_v24 = vld [vmem:[#allocation4 + $0x48] sm:$0xff]  ;;  %v1479_v11 = vld [vmem:[#allocation4 + $0x10] sm:$0xff] }
 0x207   :  { %v600_v45 = vmul.f32 %v584_v63, %v568_v41  ;;  %v367_v25 = vsub.f32 %v4164_v52, %v342_v56  ;;  %v559_v23 = vmul.f32 %v1856_v39, %v4167_v38  ;;  %v1500_v49 = vsub.f32 %v1924_v37, %v1484_v62  ;;  %v1925_v14 = vld [vmem:[%s3935_s0 + $0x48] sm:$0xff]  ;;  %v1927_v60 = vld [vmem:[%s3935_s0 + $0x58] sm:$0xff]  ;;  %v1481_v56 = vld [vmem:[#allocation4 + $0x20] sm:$0xff] }
 0x208   :  { %v589_v2 = vmul.f32 %v573_v55, %v557_v58  ;;  %v4175_v47 = vsel %vm3040_vm14, 1e+30, %v3026_v33  ;;  %v1504_v50 = vsub.f32 %v1927_v60, %v1488_v35  ;;  %v1490_v53 = vld [vmem:[#allocation4 + $0x68] sm:$0xff]  ;;  %v1495_v33 = vsub.f32 %v1928_v54, %v1479_v11  ;;  %v1930_v1 = vld [vmem:[%s3935_s0 + $0x20] sm:$0xff]  ;;  %v1931_v41 = vld [vmem:[%s3935_s0 + $0x78] sm:$0xff] }
 0x209   :  { %1125 = vmin.xlane.f32.xlu0 %v4157_v26  ;;  %623 = vadd.xlane.f32.xlu1 %v596_v6  ;;  %v575_v18 = vsub.f32 %v527_v13, %v367_v25  ;;  %v1478_v6 = vld [vmem:[#allocation4 + $0x8] sm:$0xff]  ;;  %v1516_v29 = vmul.f32 %v1500_v49, %v1500_v49  ;;  %v1477_v26 = vld [vmem:[#allocation4] sm:$0xff]  ;;  %v4176_v48 = vsel %vm3065_vm3, 1e+30, %v3055_v20  ;;  %v1497_v22 = vsub.f32 %v1930_v1, %v1481_v56  ;;  %v1483_v8 = vld [vmem:[#allocation4 + $0x30] sm:$0xff] }
 0x20a   :  { %v1494_v4 = vsub.f32 %v1921_v21, %v1478_v6  ;;  %v1520_v63 = vmul.f32 %v1504_v50, %v1504_v50  ;;  %v1929_v32 = vld [vmem:[%s3935_s0 + $0x68] sm:$0xff]  ;;  %v1511_v16 = vmul.f32 %v1495_v33, %v1495_v33  ;;  %v1508_v61 = vsub.f32 %v1931_v41, %v1492_v19  ;;  %v1485_v52 = vld [vmem:[#allocation4 + $0x40] sm:$0xff]  ;;  %v1487_v39 = vld [vmem:[#allocation4 + $0x50] sm:$0xff] }
 0x20b   :  { %v591_v9 = vmul.f32 %v575_v18, %v559_v23  ;;  %v1506_v17 = vsub.f32 %v1929_v32, %v1490_v53  ;;  %v1513_v13 = vmul.f32 %v1497_v22, %v1497_v22  ;;  %v1933_v34 = vld [vmem:[%s3935_s0 + $0x40] sm:$0xff]  ;;  %v1934_v18 = vld [vmem:[%s3935_s0 + $0x50] sm:$0xff]  ;;  %v1937_v35 = vld [vmem:[%s3941_s6 + $0x8] sm:$0xff]  ;;  %v2056_v53 = vmov 0.0  }
 0x20c   :  { %v1510_v51 = vmul.f32 %v1494_v4, %v1494_v4  ;;  %v1524_v55 = vmul.f32 %v1508_v61, %v1508_v61  ;;  %v1501_v58 = vsub.f32 %v1933_v34, %v1485_v52  ;;  %v1489_v38 = vld [vmem:[#allocation4 + $0x60] sm:$0xff]  ;;  %v1491_v6 = vld [vmem:[#allocation4 + $0x70] sm:$0xff]  ;;  %vm106_vm9 = vcmp.ge.s32.totalorder %v1937_v35, 0  ;;  %v1942_v32 = vld [vmem:[%s3941_s6 + $0x58] sm:$0xff] }
 0x20d   :  { %601 = vadd.xlane.f32.xlu0 %v585_v15  ;;  %627 = vadd.xlane.f32.xlu1 %v598_v36  ;;  %v1522_v20 = vmul.f32 %v1506_v17, %v1506_v17  ;;  %v1936_v21 = vld [vmem:[%s3935_s0 + $0x70] sm:$0xff]  ;;  %v3327_v54 = vsel %vm106_vm9, 1.0, %v2056_v53  ;;  %vm116_vm7 = vcmp.ge.s32.totalorder %v1942_v32, 0  ;;  %v1943_v19 = vld [vmem:[%s3941_s6 + $0x68] sm:$0xff]  ;;  %v1945_v1 = vld [vmem:[%s3941_s6 + $0x78] sm:$0xff] }
 0x20e   :  { %v1507_v4 = vsub.f32 %v1936_v21, %v1491_v6  ;;  %vm118_vm10 = vcmp.ge.s32.totalorder %v1943_v19, 0  ;;  %vm120_vm6 = vcmp.ge.s32.totalorder %v1945_v1, 0  ;;  %v1946_v22 = vld [vmem:[%s3941_s6 + $0x10] sm:$0xff] }
 0x20f   :  { %vm107_vm3 = vcmp.ge.s32.totalorder %v1946_v22, 0  ;;  %v3385_v34 = vsel %vm118_vm10, 1.0, %v2056_v53 }
 0x211   :  { %605 = vadd.xlane.f32.xlu0 %v587_v10  ;;  %631 = vadd.xlane.f32.xlu1 %v600_v45  ;;  %v1932_v10 = vld [vmem:[%s3935_s0 + $0x30] sm:$0xff] }
 0x212   :  { %v1499_v45 = vsub.f32 %v1932_v10, %v1483_v8 }
 0x214   :  { %v1515_v25 = vmul.f32 %v1499_v45, %v1499_v45  ;;  %v3375_v45 = vsel %vm116_vm7, 1.0, %v2056_v53 }
 0x215   :  { %609 = vadd.xlane.f32.xlu0 %v589_v2  ;;  %1127 = vmin.xlane.f32.xlu1 %v4166_v12  ;;  %v1517_v2 = vmul.f32 %v1501_v58, %v1501_v58  ;;  %v1503_v12 = vsub.f32 %v1934_v18, %v1487_v39  ;;  %v3398_v18 = vsel %vm107_vm3, 1.0, %v2056_v53 }
 0x217   :  { %v1519_v23 = vmul.f32 %v1503_v12, %v1503_v12 }
 0x219   :  { %613 = vadd.xlane.f32.xlu0 %v591_v9  ;;  %1131 = vmin.xlane.f32.xlu1 %v4168_v0  ;;  %v1935_v9 = vld [vmem:[%s3935_s0 + $0x60] sm:$0xff] }
 0x21a   :  { %v1505_v0 = vsub.f32 %v1935_v9, %v1489_v38 }
 0x21d   :  { %617 = vadd.xlane.f32.xlu0 %v2759_v43  ;;  %1135 = vmin.xlane.f32.xlu1 %v4170_v44  ;;  %v1922_v43 = vld [vmem:[%s3935_s0 + $0x18] sm:$0xff]  ;;  %v1521_v44 = vmul.f32 %v1505_v0, %v1505_v0 }
 0x21e   :  { %v1496_v30 = vsub.f32 %v1922_v43, %v1480_v31 }
 0x220   :  { %v1512_v27 = vmul.f32 %v1496_v30, %v1496_v30 }
 0x221   :  { %621 = vadd.xlane.f32.xlu0 %v2797_v28  ;;  %1139 = vmin.xlane.f32.xlu1 %v4172_v42  ;;  %v1923_v28 = vld [vmem:[%s3935_s0 + $0x28] sm:$0xff]  ;;  %v1523_v42 = vmul.f32 %v1507_v4, %v1507_v4 }
 0x222   :  { %v1498_v57 = vsub.f32 %v1923_v28, %v1482_v7 }
 0x224   :  { %v1514_v5 = vmul.f32 %v1498_v57, %v1498_v57 }
 0x225   :  { %625 = vadd.xlane.f32.xlu0 %v2834_v59  ;;  %1527 = vadd.xlane.f32.xlu1 %v1510_v51  ;;  %v4174_v59 = vsel %vm4173_vm8, 1e+30, %v2999_v40  ;;  %v1493_v40 = vsub.f32 %v1926_v46, %v1477_v26 }
 0x227   :  { %v1509_v36 = vmul.f32 %v1493_v40, %v1493_v40  ;;  %v1938_v40 = vld [vmem:[%s3941_s6 + $0x18] sm:$0xff] }
 0x228   :  { %vm108_vm13 = vcmp.ge.s32.totalorder %v1938_v40, 0 }
 0x229   :  { %629 = vadd.xlane.f32.xlu0 %v2873_v3  ;;  %1531 = vadd.xlane.f32.xlu1 %v1512_v27  ;;  %v1502_v3 = vsub.f32 %v1925_v14, %v1486_v24  ;;  %v3330_v33 = vsel %vm108_vm13, 1.0, %v2056_v53 }
 0x22b   :  { %v1518_v15 = vmul.f32 %v1502_v3, %v1502_v3 }
 0x22d   :  { %1129 = vmin.xlane.f32.xlu0 %v4174_v59  ;;  %1535 = vadd.xlane.f32.xlu1 %v1514_v5 }
 0x231   :  { %1133 = vmin.xlane.f32.xlu0 %v4175_v47  ;;  %1539 = vadd.xlane.f32.xlu1 %v1516_v29 }
 0x235   :  { %1137 = vmin.xlane.f32.xlu0 %v4176_v48  ;;  %1543 = vadd.xlane.f32.xlu1 %v1518_v15  ;;  %v1939_v15 = vld [vmem:[%s3941_s6 + $0x28] sm:$0xff] }
 0x236   :  { %vm110_vm14 = vcmp.ge.s32.totalorder %v1939_v15, 0 }
 0x237   :  { %v3345_v56 = vsel %vm110_vm14, 1.0, %v2056_v53 }
 0x239   :  { %1525 = vadd.xlane.f32.xlu0 %v1509_v36  ;;  %1547 = vadd.xlane.f32.xlu1 %v1520_v63  ;;  %v1940_v36 = vld [vmem:[%s3941_s6 + $0x38] sm:$0xff]  ;;  %v1941_v63 = vld [vmem:[%s3941_s6 + $0x48] sm:$0xff] }
 0x23a   :  { %vm112_vm0 = vcmp.ge.s32.totalorder %v1940_v36, 0  ;;  %vm114_vm11 = vcmp.ge.s32.totalorder %v1941_v63, 0 }
 0x23b   :  { %v3371_v10 = vsel %vm114_vm11, 1.0, %v2056_v53 }
 0x23d   :  { %1529 = vadd.xlane.f32.xlu0 %v1511_v16  ;;  %1551 = vadd.xlane.f32.xlu1 %v1522_v20  ;;  %v1944_v16 = vld [vmem:[%s3941_s6] sm:$0xff] }
 0x23e   :  { %vm105_vm15 = vcmp.ge.s32.totalorder %v1944_v16, 0  ;;  %v1947_v20 = vld [vmem:[%s3941_s6 + $0x20] sm:$0xff] }
 0x23f   :  { %vm109_vm1 = vcmp.ge.s32.totalorder %v1947_v20, 0  ;;  %v3389_v58 = vsel %vm105_vm15, 1.0, %v2056_v53 }
 0x240   :  { %v3402_v12 = vsel %vm109_vm1, 1.0, %v2056_v53 }
 0x241   :  { %1533 = vadd.xlane.f32.xlu0 %v1513_v13  ;;  %1555 = vadd.xlane.f32.xlu1 %v1524_v55  ;;  %v3367_v13 = vsel %vm112_vm0, 1.0, %v2056_v53  ;;  %v1948_v55 = vld [vmem:[%s3941_s6 + $0x30] sm:$0xff] }
 0x242   :  { %vm111_vm12 = vcmp.ge.s32.totalorder %v1948_v55, 0 }
 0x243   :  { %v3408_v0 = vsel %vm111_vm12, 1.0, %v2056_v53 }
 0x245   :  { %1537 = vadd.xlane.f32.xlu0 %v1515_v25 }
 0x249   :  { %1541 = vadd.xlane.f32.xlu0 %v1517_v2  ;;  %v3394_v2 = vsel %vm120_vm6, 1.0, %v2056_v53 }
 0x24a   :  { %v1040_v31 = vpop.xlane.xlu1 %1039 }
 0x24b   :  { %v3293_v37 = vmax.f32 %v1040_v31, 1e-12 }
 0x24d   :  { %1545 = vadd.xlane.f32.xlu0 %v1519_v23  ;;  %v1162_v9 = vand.u32 2147483648, %v3293_v37  ;;  %vm1159_vm3 = vcmp.eq.f32.partialorder %v3293_v37, inf }
 0x24e   :  { %v1044_v27 = vpop.xlane.xlu0 %1043 }
 0x24f   :  { %v3295_v49 = vmax.f32 %v1044_v27, 1e-12 }
 0x251   :  { %1549 = vadd.xlane.f32.xlu0 %v1521_v44 }
 0x252   :  { %v1046_v51 = vpop.xlane.xlu1 %1045 }
 0x253   :  { %v3286_v57 = vmax.f32 %v1046_v51, 1e-12 }
 0x255   :  { %1553 = vadd.xlane.f32.xlu0 %v1523_v42  ;;  %1857 = vrsqrt.f32 %v3286_v57  ;;  %vm1180_vm2 = vcmp.eq.f32.partialorder %v3286_v57, inf  ;;  %v1183_v23 = vand.u32 2147483648, %v3286_v57  ;;  %vm1182_vm5 = vcmp.eq.f32.partialorder %v3286_v57, 0.0 }
 0x256   :  { %v3282_v43 = vpop.xlane.xlu1 %1061  ;;  %1859 = vrsqrt.f32 %v3293_v37 }
 0x257   :  { %1861 = vrsqrt.f32 %v3295_v49  ;;  %v3411_v44 = vmax.f32 %v3282_v43, 1e-12 }
 0x25a   :  { %v3284_v30 = vpop.xlane.xlu1 %1057 }
 0x25f   :  { %v1858_v11 = vpop.eup %1857 }
 0x260   :  { %v1179_v17 = vmul.f32 %v1858_v11, %v3286_v57  ;;  %v1860_v41 = vpop.eup %1859 }
 0x261   :  { %v1862_v52 = vpop.eup %1861  ;;  %v3417_v31 = vmul.f32 %v1860_v41, %v3293_v37 }
 0x262   :  { %v1054_v7 = vpop.xlane.xlu1 %1053  ;;  %v1181_v39 = vsel %vm1180_vm2, %v3286_v57, %v1179_v17  ;;  %v3420_v42 = vmul.f32 %v1862_v52, %v3295_v49  ;;  %vm1161_vm2 = vcmp.eq.f32.partialorder %v3293_v37, 0.0 }
 0x263   :  { %v3301_v29 = vmax.f32 %v1054_v7, 1e-12  ;;  %v1184_v27 = vsel %vm1182_vm5, %v1183_v23, %v1181_v39 }
 0x265   :  { %1863 = vrsqrt.f32 %v3301_v29  ;;  %vm1208_vm9 = vcmp.eq.f32.partialorder %v3301_v29, inf  ;;  %vm1210_vm6 = vcmp.eq.f32.partialorder %v3301_v29, 0.0 }
 0x266   :  { %v1050_v28 = vpop.xlane.xlu1 %1049 }
 0x267   :  { %v3304_v14 = vmax.f32 %v1050_v28, 1e-12 }
 0x269   :  { %1865 = vrsqrt.f32 %v3304_v14  ;;  %vm1194_vm8 = vcmp.eq.f32.partialorder %v3304_v14, inf  ;;  %vm1196_vm13 = vcmp.eq.f32.partialorder %v3304_v14, 0.0 }
 0x26a   :  { %v3288_v62 = vpop.xlane.xlu1 %1065  ;;  %v3290_v5 = vpop.xlane.xlu0 %1059 }
 0x26e   :  { %v3297_v24 = vpop.xlane.xlu1 %1069  ;;  %v3299_v59 = vpop.xlane.xlu0 %1055 }
 0x26f   :  { %v1864_v38 = vpop.eup %1863  ;;  %v3427_v28 = vmax.f32 %v3299_v59, 1e-12 }
 0x270   :  { %v1207_v35 = vmul.f32 %v1864_v38, %v3301_v29 }
 0x272   :  { %v1112_v3 = vpop.xlane.xlu1 %1111  ;;  %v1042_v26 = vpop.xlane.xlu0 %1041 }
 0x273   :  { %v3311_v47 = vmax.f32 %v1112_v3, 1e-12  ;;  %v3313_v46 = vmax.f32 %v1042_v26, 1e-12  ;;  %v1866_v6 = vpop.eup %1865  ;;  %v1197_v3 = vand.u32 2147483648, %v3304_v14 }
 0x275   :  { %1867 = vrsqrt.f32 %v3311_v47  ;;  %vm1294_vm14 = vcmp.eq.f32.partialorder %v3311_v47, inf  ;;  %v1297_v26 = vand.u32 2147483648, %v3311_v47  ;;  %vm1296_vm0 = vcmp.eq.f32.partialorder %v3311_v47, 0.0 }
 0x276   :  { %1869 = vrsqrt.f32 %v3313_v46  ;;  %v1116_v60 = vpop.xlane.xlu1 %1115  ;;  %v3324_v50 = vpop.xlane.xlu0 %1051  ;;  %vm1166_vm11 = vcmp.eq.f32.partialorder %v3313_v46, inf  ;;  %v1169_v17 = vand.u32 2147483648, %v3313_v46  ;;  %vm1168_vm7 = vcmp.eq.f32.partialorder %v3313_v46, 0.0 }
 0x277   :  { %v3332_v48 = vmax.f32 %v1116_v60, 1e-12  ;;  %v1193_v60 = vmul.f32 %v1866_v6, %v3304_v14  ;;  %v3446_v19 = vmax.f32 %v3324_v50, 1e-12  ;;  %v1209_v50 = vsel %vm1208_vm9, %v3301_v29, %v1207_v35 }
 0x278   :  { %vm1173_vm9 = vcmp.eq.f32.partialorder %v3295_v49, inf }
 0x279   :  { %1871 = vrsqrt.f32 %v3332_v48  ;;  %vm1308_vm10 = vcmp.eq.f32.partialorder %v3332_v48, inf  ;;  %v1311_v22 = vand.u32 2147483648, %v3332_v48  ;;  %vm1310_vm15 = vcmp.eq.f32.partialorder %v3332_v48, 0.0 }
 0x27a   :  { %v1120_v61 = vpop.xlane.xlu1 %1119  ;;  %v3363_v8 = vpop.xlane.xlu0 %1047  ;;  %v1195_v55 = vsel %vm1194_vm8, %v3304_v14, %v1193_v60 }
 0x27b   :  { %v3380_v25 = vmax.f32 %v1120_v61, 1e-12  ;;  %v3467_v39 = vmax.f32 %v3363_v8, 1e-12  ;;  %v1198_v8 = vsel %vm1196_vm13, %v1197_v3, %v1195_v55  ;;  %v3514_v55 = vmax.f32 %v3284_v30, 1e-12 }
 0x27c   :  { %v1160_v30 = vsel %vm1159_vm3, %v3293_v37, %v3417_v31  ;;  %vm1175_vm13 = vcmp.eq.f32.partialorder %v3295_v49, 0.0  ;;  %vm1215_vm3 = vcmp.eq.f32.partialorder %v3427_v28, inf }
 0x27d   :  { %1873 = vrsqrt.f32 %v3380_v25  ;;  %vm1322_vm1 = vcmp.eq.f32.partialorder %v3380_v25, inf  ;;  %vm1324_vm12 = vcmp.eq.f32.partialorder %v3380_v25, 0.0 }
 0x27e   :  { %v1124_v21 = vpop.xlane.xlu1 %1123  ;;  %v3413_v4 = vpop.xlane.xlu0 %1063 }
 0x27f   :  { %v1868_v51 = vpop.eup %1867  ;;  %v3422_v7 = vmax.f32 %v1124_v21, 1e-12 }
 0x280   :  { %v1870_v43 = vpop.eup %1869  ;;  %v1293_v57 = vmul.f32 %v1868_v51, %v3311_v47 }
 0x281   :  { %1875 = vrsqrt.f32 %v3422_v7  ;;  %v1165_v11 = vmul.f32 %v1870_v43, %v3313_v46  ;;  %v1325_v43 = vand.u32 2147483648, %v3380_v25  ;;  %vm1336_vm5 = vcmp.eq.f32.partialorder %v3422_v7, inf }
 0x282   :  { %v1295_v40 = vsel %vm1294_vm14, %v3311_v47, %v1293_v57  ;;  %v604_v59 = vpop.xlane.xlu1 %603  ;;  %v3439_v15 = vpop.xlane.xlu0 %1067  ;;  %1877 = vrsqrt.f32 %v3446_v19  ;;  %vm1338_vm8 = vcmp.eq.f32.partialorder %v3422_v7, 0.0 }
 0x283   :  { %v1872_v36 = vpop.eup %1871  ;;  %v1298_v63 = vsel %vm1296_vm0, %v1297_v26, %v1295_v40  ;;  %v634_v32 = vmul.f32 %v3327_v54, %v604_v59  ;;  %v1167_v47 = vsel %vm1166_vm11, %v3313_v46, %v1165_v11  ;;  %vm1201_vm11 = vcmp.eq.f32.partialorder %v3446_v19, inf }
 0x284   :  { %v1307_v16 = vmul.f32 %v1872_v36, %v3332_v48  ;;  %v1170_v1 = vsel %vm1168_vm7, %v1169_v17, %v1167_v47  ;;  %v1339_v17 = vand.u32 2147483648, %v3422_v7 }
 0x285   :  { %651 = vst.msk [vmem:[%s3943_s8 + $0x8] sm:$0xff] %vm649_vm4, %v634_v32  ;;  %v1398_v20 = vsub.f32 %v1170_v1, %v1298_v63 }
 0x286   :  { %v1309_v41 = vsel %vm1308_vm10, %v3332_v48, %v1307_v16  ;;  %v608_v46 = vpop.xlane.xlu1 %607  ;;  %v1110_v61 = vpop.xlane.xlu0 %1109  ;;  %vm1187_vm10 = vcmp.eq.f32.partialorder %v3467_v39, inf }
 0x287   :  { %v1874_v52 = vpop.eup %1873  ;;  %v1312_v38 = vsel %vm1310_vm15, %v1311_v22, %v1309_v41  ;;  %v636_v23 = vmul.f32 %v3330_v33, %v608_v46  ;;  %v3470_v6 = vmax.f32 %v1110_v61, 1e-12  ;;  %v1414_v48 = vadd.f32 0.3, %v1398_v20 }
 0x288   :  { %v1400_v21 = vsub.f32 %v1184_v27, %v1312_v38  ;;  %v1321_v51 = vmul.f32 %v1874_v52, %v3380_v25 }
 0x289   :  { %653 = vst.msk [vmem:[%s3943_s8 + $0x18] sm:$0xff] %vm649_vm4, %v636_v23  ;;  %1879 = vrsqrt.f32 %v3470_v6  ;;  %v1430_v57 = vmax.f32 %v1414_v48, 0.0  ;;  %vm1287_vm14 = vcmp.eq.f32.partialorder %v3470_v6, inf  ;;  %vm1289_vm0 = vcmp.eq.f32.partialorder %v3470_v6, 0.0 }
 0x28a   :  { %v1416_v27 = vadd.f32 0.3, %v1400_v21  ;;  %v1323_v26 = vsel %vm1322_vm1, %v3380_v25, %v1321_v51  ;;  %v612_v35 = vpop.xlane.xlu1 %611  ;;  %v1114_v40 = vpop.xlane.xlu0 %1113  ;;  %1881 = vrsqrt.f32 %v3467_v39  ;;  %v1211_v25 = vand.u32 2147483648, %v3301_v29 }
 0x28b   :  { %v1876_v59 = vpop.eup %1875  ;;  %v1326_v11 = vsel %vm1324_vm12, %v1325_v43, %v1323_v26  ;;  %v638_v60 = vmul.f32 %v3345_v56, %v612_v35  ;;  %v3488_v14 = vmax.f32 %v1114_v40, 1e-12  ;;  %v1446_v3 = vmul.f32 %v3327_v54, %v1430_v57 }
 0x28c   :  { %v1432_v36 = vmax.f32 %v1416_v27, 0.0  ;;  %v1402_v63 = vsub.f32 %v1198_v8, %v1326_v11  ;;  %v1335_v32 = vmul.f32 %v1876_v59, %v3422_v7  ;;  %v1212_v20 = vsel %vm1210_vm6, %v1211_v25, %v1209_v50  ;;  %v1878_v29 = vpop.eup %1877 }
 0x28d   :  { %655 = vst.msk [vmem:[%s3943_s8 + $0x28] sm:$0xff] %vm649_vm4, %v638_v60  ;;  %1883 = vrsqrt.f32 %v3488_v14  ;;  %1462 = vst.msk [vmem:[%s3944_s9 + $0x8] sm:$0xff] %vm649_vm4, %v1446_v3  ;;  %v3533_v50 = vmax.f32 %v3288_v62, 1e-12  ;;  %v1174_v21 = vsel %vm1173_vm9, %v3295_v49, %v3420_v42  ;;  %v1176_v43 = vand.u32 2147483648, %v3295_v49 }
 0x28e   :  { %v1448_v54 = vmul.f32 %v3330_v33, %v1432_v36  ;;  %v1418_v47 = vadd.f32 0.3, %v1402_v63  ;;  %v1337_v16 = vsel %vm1336_vm5, %v3422_v7, %v1335_v32  ;;  %v616_v1 = vpop.xlane.xlu1 %615  ;;  %v1118_v22 = vpop.xlane.xlu0 %1117  ;;  %1885 = vrsqrt.f32 %v3427_v28 }
 0x28f   :  { %v1340_v41 = vsel %vm1338_vm8, %v1339_v17, %v1337_v16  ;;  %v640_v46 = vmul.f32 %v3367_v13, %v616_v1  ;;  %v3511_v61 = vmax.f32 %v1118_v22, 1e-12  ;;  %v1290_v27 = vand.u32 2147483648, %v3470_v6 }
 0x290   :  { %1464 = vst.msk [vmem:[%s3944_s9 + $0x18] sm:$0xff] %vm649_vm4, %v1448_v54  ;;  %v1434_v33 = vmax.f32 %v1418_v47, 0.0  ;;  %v1404_v7 = vsub.f32 %v1212_v20, %v1340_v41  ;;  %v1177_v26 = vsel %vm1175_vm13, %v1176_v43, %v1174_v21  ;;  %v3567_v11 = vmax.f32 %v3297_v24, 1e-12 }
 0x291   :  { %657 = vst.msk [vmem:[%s3943_s8 + $0x38] sm:$0xff] %vm649_vm4, %v640_v46  ;;  %1887 = vrsqrt.f32 %v3511_v61  ;;  %vm1301_vm7 = vcmp.eq.f32.partialorder %v3488_v14, inf  ;;  %v1304_v24 = vand.u32 2147483648, %v3488_v14  ;;  %vm1303_vm15 = vcmp.eq.f32.partialorder %v3488_v14, 0.0 }
 0x292   :  { %v1450_v52 = vmul.f32 %v3345_v56, %v1434_v33  ;;  %v1420_v38 = vadd.f32 0.3, %v1404_v7  ;;  %v620_v23 = vpop.xlane.xlu1 %619  ;;  %v1122_v48 = vpop.xlane.xlu0 %1121  ;;  %1889 = vrsqrt.f32 %v3411_v44  ;;  %v1163_v56 = vsel %vm1161_vm2, %v1162_v9, %v1160_v30 }
 0x293   :  { %v1880_v51 = vpop.eup %1879  ;;  %v642_v31 = vmul.f32 %v3371_v10, %v620_v23  ;;  %v3540_v8 = vmax.f32 %v1122_v48, 1e-12  ;;  %1891 = vrsqrt.f32 %v3514_v55  ;;  %vm1189_vm6 = vcmp.eq.f32.partialorder %v3467_v39, 0.0 }
 0x294   :  { %1466 = vst.msk [vmem:[%s3944_s9 + $0x28] sm:$0xff] %vm649_vm4, %v1450_v52  ;;  %v1436_v62 = vmax.f32 %v1420_v38, 0.0  ;;  %v1286_v42 = vmul.f32 %v1880_v51, %v3470_v6  ;;  %v1882_v57 = vpop.eup %1881  ;;  %v1200_v20 = vmul.f32 %v1878_v29, %v3446_v19  ;;  %v1190_v30 = vand.u32 2147483648, %v3467_v39  ;;  %v1949_v52 = vld [vmem:[%s3941_s6 + $0x40] sm:$0xff] }
 0x295   :  { %659 = vst.msk [vmem:[%s3943_s8 + $0x48] sm:$0xff] %vm649_vm4, %v642_v31  ;;  %1893 = vrsqrt.f32 %v3540_v8  ;;  %v1186_v63 = vmul.f32 %v1882_v57, %v3467_v39  ;;  %vm1315_vm1 = vcmp.eq.f32.partialorder %v3511_v61, inf  ;;  %v1318_v29 = vand.u32 2147483648, %v3511_v61 }
 0x296   :  { %1895 = vrsqrt.f32 %v3533_v50  ;;  %v1452_v37 = vmul.f32 %v3367_v13, %v1436_v62  ;;  %v624_v9 = vpop.xlane.xlu1 %623  ;;  %v1126_v35 = vpop.xlane.xlu0 %1125  ;;  %v1288_v40 = vsel %vm1287_vm14, %v3470_v6, %v1286_v42  ;;  %vm113_vm12 = vcmp.ge.s32.totalorder %v1949_v52, 0  ;;  %v1951_v52 = vld [vmem:[%s3941_s6 + $0x60] sm:$0xff] }
 0x297   :  { %v1884_v59 = vpop.eup %1883  ;;  %v644_v60 = vmul.f32 %v3375_v45, %v624_v9  ;;  %v3570_v3 = vmax.f32 %v1126_v35, 1e-12  ;;  %v1291_v49 = vsel %vm1289_vm0, %v1290_v27, %v1288_v40  ;;  %v1188_v33 = vsel %vm1187_vm10, %v3467_v39, %v1186_v63 }
 0x298   :  { %1468 = vst.msk [vmem:[%s3944_s9 + $0x38] sm:$0xff] %vm649_vm4, %v1452_v37  ;;  %v1397_v13 = vsub.f32 %v1163_v56, %v1291_v49  ;;  %v1300_v36 = vmul.f32 %v1884_v59, %v3488_v14  ;;  %v1886_v6 = vpop.eup %1885  ;;  %vm1317_vm2 = vcmp.eq.f32.partialorder %v3511_v61, 0.0  ;;  %vm1217_vm5 = vcmp.eq.f32.partialorder %v3427_v28, 0.0 }
 0x299   :  { %661 = vst.msk [vmem:[%s3943_s8 + $0x58] sm:$0xff] %vm649_vm4, %v644_v60  ;;  %1897 = vrsqrt.f32 %v3570_v3  ;;  %v1214_v38 = vmul.f32 %v1886_v6, %v3427_v28  ;;  %v1191_v57 = vsel %vm1189_vm6, %v1190_v30, %v1188_v33  ;;  %v1202_v37 = vsel %vm1201_vm11, %v3446_v19, %v1200_v20 }
 0x29a   :  { %v628_v32 = vpop.xlane.xlu1 %627  ;;  %v1413_v25 = vadd.f32 0.3, %v1397_v13  ;;  %v602_v17 = vpop.xlane.xlu0 %601  ;;  %v1302_v54 = vsel %vm1301_vm7, %v3488_v14, %v1300_v36  ;;  %vm1203_vm8 = vcmp.eq.f32.partialorder %v3446_v19, 0.0  ;;  %v1204_v39 = vand.u32 2147483648, %v3446_v19 }
 0x29b   :  { %v1888_v47 = vpop.eup %1887  ;;  %v646_v16 = vmul.f32 %v3385_v34, %v628_v32  ;;  %v633_v1 = vmul.f32 %v3389_v58, %v602_v17  ;;  %v1305_v22 = vsel %vm1303_vm15, %v1304_v24, %v1302_v54  ;;  %vm1329_vm9 = vcmp.eq.f32.partialorder %v3540_v8, inf }
 0x29c   :  { %v1429_v41 = vmax.f32 %v1413_v25, 0.0  ;;  %v1399_v46 = vsub.f32 %v1177_v26, %v1305_v22  ;;  %v1314_v14 = vmul.f32 %v1888_v47, %v3511_v61  ;;  %v3598_v7 = vpop.eup %1889  ;;  %v1332_v35 = vand.u32 2147483648, %v3540_v8 }
 0x29d   :  { %663 = vst.msk [vmem:[%s3943_s8 + $0x68] sm:$0xff] %vm649_vm4, %v646_v16  ;;  %650 = vst.msk [vmem:[%s3943_s8] sm:$0xff] %vm649_vm4, %v633_v1  ;;  %v3615_v23 = vpop.eup %1891  ;;  %vm1331_vm13 = vcmp.eq.f32.partialorder %v3540_v8, 0.0  ;;  %v1205_v6 = vsel %vm1203_vm8, %v1204_v39, %v1202_v37  ;;  %v1216_v25 = vsel %vm1215_vm3, %v3427_v28, %v1214_v38  ;;  %v1218_v17 = vand.u32 2147483648, %v3427_v28  ;;  %v1950_v28 = vld [vmem:[%s3941_s6 + $0x50] sm:$0xff] }
 0x29e   :  { %v1445_v48 = vmul.f32 %v3389_v58, %v1429_v41  ;;  %v632_v21 = vpop.xlane.xlu1 %631  ;;  %v1415_v51 = vadd.f32 0.3, %v1399_v46  ;;  %v606_v31 = vpop.xlane.xlu0 %605  ;;  %v1316_v43 = vsel %vm1315_vm1, %v3511_v61, %v1314_v14  ;;  %vm1343_vm14 = vcmp.eq.f32.partialorder %v3570_v3, inf }
 0x29f   :  { %v1894_v62 = vpop.eup %1893  ;;  %v648_v56 = vmul.f32 %v3394_v2, %v632_v21  ;;  %v635_v42 = vmul.f32 %v3398_v18, %v606_v31  ;;  %v1319_v27 = vsel %vm1317_vm2, %v1318_v29, %v1316_v43  ;;  %v1346_v54 = vand.u32 2147483648, %v3570_v3  ;;  %v1952_v43 = vld [vmem:[%s3941_s6 + $0x70] sm:$0xff] }
 0x2a0   :  { %v3625_v26 = vpop.eup %1895  ;;  %1461 = vst.msk [vmem:[%s3944_s9] sm:$0xff] %vm649_vm4, %v1445_v48  ;;  %v1431_v58 = vmax.f32 %v1415_v51, 0.0  ;;  %v1401_v61 = vsub.f32 %v1191_v57, %v1319_v27  ;;  %v1328_v9 = vmul.f32 %v1894_v62, %v3540_v8  ;;  %vm1345_vm0 = vcmp.eq.f32.partialorder %v3570_v3, 0.0 }
 0x2a1   :  { %665 = vst.msk [vmem:[%s3943_s8 + $0x78] sm:$0xff] %vm649_vm4, %v648_v56  ;;  %652 = vst.msk [vmem:[%s3943_s8 + $0x10] sm:$0xff] %vm649_vm4, %v635_v42  ;;  %v1219_v33 = vsel %vm1217_vm5, %v1218_v17, %v1216_v25  ;;  %v1596_v30 = vsel %vm113_vm12, 1.0, %v2056_v53  ;;  %vm115_vm11 = vcmp.ge.s32.totalorder %v1950_v28, 0  ;;  %vm117_vm7 = vcmp.ge.s32.totalorder %v1951_v52, 0 }
 0x2a2   :  { %v1447_v40 = vmul.f32 %v3398_v18, %v1431_v58  ;;  %v1128_v59 = vpop.xlane.xlu1 %1127  ;;  %v1417_v60 = vadd.f32 0.3, %v1401_v61  ;;  %v610_v49 = vpop.xlane.xlu0 %609  ;;  %v1330_v13 = vsel %vm1329_vm9, %v3540_v8, %v1328_v9  ;;  %vm119_vm10 = vcmp.ge.s32.totalorder %v1952_v43, 0 }
 0x2a3   :  { %v1898_v36 = vpop.eup %1897  ;;  %v3650_v63 = vmax.f32 %v1128_v59, 1e-12  ;;  %v637_v24 = vmul.f32 %v3402_v12, %v610_v49  ;;  %v1333_v19 = vsel %vm1331_vm13, %v1332_v35, %v1330_v13  ;;  %v1221_v62 = vmul.f32 %v3615_v23, %v3514_v55 }
 0x2a4   :  { %1463 = vst.msk [vmem:[%s3944_s9 + $0x10] sm:$0xff] %vm649_vm4, %v1447_v40  ;;  %v1433_v18 = vmax.f32 %v1417_v60, 0.0  ;;  %v1403_v32 = vsub.f32 %v1205_v6, %v1333_v19  ;;  %v1342_v8 = vmul.f32 %v1898_v36, %v3570_v3  ;;  %v3711_v42 = vsel %vm115_vm11, 1.0, %v2056_v53 }
 0x2a5   :  { %1899 = vrsqrt.f32 %v3650_v63  ;;  %654 = vst.msk [vmem:[%s3943_s8 + $0x20] sm:$0xff] %vm649_vm4, %v637_v24  ;;  %vm1236_vm15 = vcmp.eq.f32.partialorder %v3411_v44, inf  ;;  %vm1238_vm6 = vcmp.eq.f32.partialorder %v3411_v44, 0.0  ;;  %v3724_v58 = vsel %vm119_vm10, 1.0, %v2056_v53 }
 0x2a6   :  { %v1449_v47 = vmul.f32 %v3402_v12, %v1433_v18  ;;  %v1132_v16 = vpop.xlane.xlu1 %1131  ;;  %v1419_v1 = vadd.f32 0.3, %v1403_v32  ;;  %v614_v22 = vpop.xlane.xlu0 %613  ;;  %v1344_v20 = vsel %vm1343_vm14, %v3570_v3, %v1342_v8  ;;  %v1239_v37 = vand.u32 2147483648, %v3411_v44 }
 0x2a7   :  { %v3672_v41 = vmax.f32 %v1132_v16, 1e-12  ;;  %v639_v46 = vmul.f32 %v3408_v0, %v614_v22  ;;  %v1347_v14 = vsel %vm1345_vm0, %v1346_v54, %v1344_v20  ;;  %vm1222_vm3 = vcmp.eq.f32.partialorder %v3514_v55, inf }
 0x2a8   :  { %1465 = vst.msk [vmem:[%s3944_s9 + $0x20] sm:$0xff] %vm649_vm4, %v1449_v47  ;;  %v1435_v12 = vmax.f32 %v1419_v1, 0.0  ;;  %v1405_v29 = vsub.f32 %v1219_v33, %v1347_v14  ;;  %v1223_v40 = vsel %vm1222_vm3, %v3514_v55, %v1221_v62  ;;  %v1225_v59 = vand.u32 2147483648, %v3514_v55 }
 0x2a9   :  { %1901 = vrsqrt.f32 %v3672_v41  ;;  %656 = vst.msk [vmem:[%s3943_s8 + $0x30] sm:$0xff] %vm649_vm4, %v639_v46  ;;  %vm1350_vm1 = vcmp.eq.f32.partialorder %v3650_v63, inf  ;;  %v1353_v49 = vand.u32 2147483648, %v3650_v63  ;;  %vm1224_vm12 = vcmp.eq.f32.partialorder %v3514_v55, 0.0 }
 0x2aa   :  { %v1451_v3 = vmul.f32 %v3408_v0, %v1435_v12  ;;  %v1136_v38 = vpop.xlane.xlu1 %1135  ;;  %v1421_v48 = vadd.f32 0.3, %v1405_v29  ;;  %v618_v21 = vpop.xlane.xlu0 %617  ;;  %1903 = vrsqrt.f32 %v3567_v11  ;;  %v1235_v0 = vmul.f32 %v3598_v7, %v3411_v44 }
 0x2ab   :  { %v3696_v51 = vmax.f32 %v1136_v38, 1e-12  ;;  %v641_v31 = vmul.f32 %v1596_v30, %v618_v21  ;;  %v3719_v7 = vsel %vm117_vm7, 1.0, %v2056_v53  ;;  %v3740_v53 = vmax.f32 %v3290_v5, 1e-12 }
 0x2ac   :  { %1467 = vst.msk [vmem:[%s3944_s9 + $0x30] sm:$0xff] %vm649_vm4, %v1451_v3  ;;  %v1437_v56 = vmax.f32 %v1421_v48, 0.0  ;;  %v1237_v35 = vsel %vm1236_vm15, %v3411_v44, %v1235_v0  ;;  %v1249_v13 = vmul.f32 %v3625_v26, %v3533_v50  ;;  %vm1352_vm2 = vcmp.eq.f32.partialorder %v3650_v63, 0.0 }
 0x2ad   :  { %1905 = vrsqrt.f32 %v3696_v51  ;;  %658 = vst.msk [vmem:[%s3943_s8 + $0x40] sm:$0xff] %vm649_vm4, %v641_v31  ;;  %v1240_v19 = vsel %vm1238_vm6, %v1239_v37, %v1237_v35  ;;  %v1226_v18 = vsel %vm1224_vm12, %v1225_v59, %v1223_v40  ;;  %vm1250_vm5 = vcmp.eq.f32.partialorder %v3533_v50, inf }
 0x2ae   :  { %v1453_v23 = vmul.f32 %v1596_v30, %v1437_v56  ;;  %v1140_v57 = vpop.xlane.xlu1 %1139  ;;  %v622_v27 = vpop.xlane.xlu0 %621  ;;  %vm1252_vm8 = vcmp.eq.f32.partialorder %v3533_v50, 0.0  ;;  %v1253_v44 = vand.u32 2147483648, %v3533_v50  ;;  %vm1364_vm9 = vcmp.eq.f32.partialorder %v3672_v41, inf }
 0x2af   :  { %v1900_v61 = vpop.eup %1899  ;;  %v3728_v9 = vmax.f32 %v1140_v57, 1e-12  ;;  %v643_v39 = vmul.f32 %v3711_v42, %v622_v27  ;;  %v1367_v8 = vand.u32 2147483648, %v3672_v41  ;;  %v1251_v17 = vsel %vm1250_vm5, %v3533_v50, %v1249_v13 }
 0x2b0   :  { %v1349_v60 = vmul.f32 %v1900_v61, %v3650_v63  ;;  %1469 = vst.msk [vmem:[%s3944_s9 + $0x40] sm:$0xff] %vm649_vm4, %v1453_v23  ;;  %vm1366_vm13 = vcmp.eq.f32.partialorder %v3672_v41, 0.0  ;;  %vm1264_vm14 = vcmp.eq.f32.partialorder %v3567_v11, inf  ;;  %v3777_v20 = vmax.f32 %v3413_v4, 1e-12 }
 0x2b1   :  { %1907 = vrsqrt.f32 %v3728_v9  ;;  %660 = vst.msk [vmem:[%s3943_s8 + $0x50] sm:$0xff] %vm649_vm4, %v643_v39  ;;  %v1254_v29 = vsel %vm1252_vm8, %v1253_v44, %v1251_v17  ;;  %vm1266_vm0 = vcmp.eq.f32.partialorder %v3567_v11, 0.0  ;;  %vm1378_vm11 = vcmp.eq.f32.partialorder %v3696_v51, inf }
 0x2b2   :  { %v1351_v36 = vsel %vm1350_vm1, %v3650_v63, %v1349_v60  ;;  %v626_v5 = vpop.xlane.xlu0 %625  ;;  %v1528_v24 = vpop.xlane.xlu1 %1527  ;;  %1909 = vrsqrt.f32 %v3740_v53  ;;  %v1381_v4 = vand.u32 2147483648, %v3696_v51  ;;  %vm1380_vm7 = vcmp.eq.f32.partialorder %v3696_v51, 0.0 }
 0x2b3   :  { %v1902_v6 = vpop.eup %1901  ;;  %v1354_v32 = vsel %vm1352_vm2, %v1353_v49, %v1351_v36  ;;  %v645_v25 = vmul.f32 %v3719_v7, %v626_v5  ;;  %1558 = vst.msk [vmem:[%s3945_s10 + $0x8] sm:$0xff] %vm649_vm4, %v1528_v24  ;;  %1911 = vrsqrt.f32 %v3777_v20  ;;  %v3800_v52 = vmax.f32 %v3439_v15, 1e-12 }
 0x2b4   :  { %v1406_v55 = vsub.f32 %v1226_v18, %v1354_v32  ;;  %v1363_v26 = vmul.f32 %v1902_v6, %v3672_v41  ;;  %v1904_v63 = vpop.eup %1903  ;;  %v1267_v62 = vand.u32 2147483648, %v3567_v11  ;;  %vm1392_vm10 = vcmp.eq.f32.partialorder %v3728_v9, inf }
 0x2b5   :  { %662 = vst.msk [vmem:[%s3943_s8 + $0x60] sm:$0xff] %vm649_vm4, %v645_v25  ;;  %v1263_v14 = vmul.f32 %v1904_v63, %v3567_v11  ;;  %v1395_v56 = vand.u32 2147483648, %v3728_v9  ;;  %vm1394_vm15 = vcmp.eq.f32.partialorder %v3728_v9, 0.0  ;;  %vm1229_vm6 = vcmp.eq.f32.partialorder %v3740_v53, inf }
 0x2b6   :  { %v1422_v54 = vadd.f32 0.3, %v1406_v55  ;;  %v1365_v47 = vsel %vm1364_vm9, %v3672_v41, %v1363_v26  ;;  %v630_v16 = vpop.xlane.xlu0 %629  ;;  %v1532_v1 = vpop.xlane.xlu1 %1531  ;;  %v1232_v63 = vand.u32 2147483648, %v3740_v53  ;;  %vm1231_vm1 = vcmp.eq.f32.partialorder %v3740_v53, 0.0 }
 0x2b7   :  { %v1906_v22 = vpop.eup %1905  ;;  %v1368_v46 = vsel %vm1366_vm13, %v1367_v8, %v1365_v47  ;;  %v647_v33 = vmul.f32 %v3724_v58, %v630_v16  ;;  %1560 = vst.msk [vmem:[%s3945_s10 + $0x18] sm:$0xff] %vm649_vm4, %v1532_v1  ;;  %vm1243_vm2 = vcmp.eq.f32.partialorder %v3777_v20, inf  ;;  %vm1245_vm8 = vcmp.eq.f32.partialorder %v3777_v20, 0.0 }
 0x2b8   :  { %v1438_v12 = vmax.f32 %v1422_v54, 0.0  ;;  %v1408_v41 = vsub.f32 %v1240_v19, %v1368_v46  ;;  %v1377_v30 = vmul.f32 %v1906_v22, %v3696_v51  ;;  %vm1257_vm13 = vcmp.eq.f32.partialorder %v3800_v52, inf }
 0x2b9   :  { %664 = vst.msk [vmem:[%s3943_s8 + $0x70] sm:$0xff] %vm649_vm4, %v647_v33 }
 0x2ba   :  { %v1454_v28 = vmul.f32 %v3371_v10, %v1438_v12  ;;  %v1424_v3 = vadd.f32 0.3, %v1408_v41  ;;  %v1379_v38 = vsel %vm1378_vm11, %v3696_v51, %v1377_v30  ;;  %v1130_v50 = vpop.xlane.xlu0 %1129  ;;  %v1536_v48 = vpop.xlane.xlu1 %1535  ;;  %v1265_v10 = vsel %vm1264_vm14, %v3567_v11, %v1263_v14 }
 0x2bb   :  { %v1908_v21 = vpop.eup %1907  ;;  %v1382_v31 = vsel %vm1380_vm7, %v1381_v4, %v1379_v38  ;;  %v3802_v43 = vmax.f32 %v1130_v50, 1e-12  ;;  %1562 = vst.msk [vmem:[%s3945_s10 + $0x28] sm:$0xff] %vm649_vm4, %v1536_v48  ;;  %v1268_v35 = vsel %vm1266_vm0, %v1267_v62, %v1265_v10  ;;  %v1246_v14 = vand.u32 2147483648, %v3777_v20 }
 0x2bc   :  { %1470 = vst.msk [vmem:[%s3944_s9 + $0x48] sm:$0xff] %vm649_vm4, %v1454_v28  ;;  %v1440_v51 = vmax.f32 %v1424_v3, 0.0  ;;  %v1410_v15 = vsub.f32 %v1254_v29, %v1382_v31  ;;  %v1391_v0 = vmul.f32 %v1908_v21, %v3728_v9  ;;  %v1910_v39 = vpop.eup %1909  ;;  %vm1259_vm14 = vcmp.eq.f32.partialorder %v3800_v52, 0.0 }
 0x2bd   :  { %1913 = vrsqrt.f32 %v3802_v43  ;;  %v1228_v5 = vmul.f32 %v1910_v39, %v3740_v53  ;;  %v1912_v6 = vpop.eup %1911  ;;  %vm1357_vm3 = vcmp.eq.f32.partialorder %v3802_v43, inf  ;;  %v1360_v44 = vand.u32 2147483648, %v3802_v43 }
 0x2be   :  { %v1456_v23 = vmul.f32 %v3375_v45, %v1440_v51  ;;  %v1426_v57 = vadd.f32 0.3, %v1410_v15  ;;  %v1393_v27 = vsel %vm1392_vm10, %v3728_v9, %v1391_v0  ;;  %v1134_v61 = vpop.xlane.xlu0 %1133  ;;  %v1540_v37 = vpop.xlane.xlu1 %1539  ;;  %1915 = vrsqrt.f32 %v3800_v52 }
 0x2bf   :  { %v1396_v40 = vsel %vm1394_vm15, %v1395_v56, %v1393_v27  ;;  %v1281_v59 = vmax.f32 %v1134_v61, 1e-12  ;;  %1564 = vst.msk [vmem:[%s3945_s10 + $0x38] sm:$0xff] %vm649_vm4, %v1540_v37  ;;  %v1230_v25 = vsel %vm1229_vm6, %v3740_v53, %v1228_v5  ;;  %v1242_v55 = vmul.f32 %v1912_v6, %v3777_v20 }
 0x2c0   :  { %1472 = vst.msk [vmem:[%s3944_s9 + $0x58] sm:$0xff] %vm649_vm4, %v1456_v23  ;;  %v1442_v45 = vmax.f32 %v1426_v57, 0.0  ;;  %v1412_v9 = vsub.f32 %v1268_v35, %v1396_v40  ;;  %vm1359_vm12 = vcmp.eq.f32.partialorder %v3802_v43, 0.0  ;;  %v1233_v16 = vsel %vm1231_vm1, %v1232_v63, %v1230_v25 }
 0x2c1   :  { %1917 = vrsqrt.f32 %v1281_v59  ;;  %v1244_v53 = vsel %vm1243_vm2, %v3777_v20, %v1242_v55  ;;  %vm1371_vm5 = vcmp.eq.f32.partialorder %v1281_v59, inf  ;;  %v1374_v12 = vand.u32 2147483648, %v1281_v59 }
 0x2c2   :  { %v1458_v11 = vmul.f32 %v3385_v34, %v1442_v45  ;;  %v1428_v60 = vadd.f32 0.3, %v1412_v9  ;;  %v1138_v49 = vpop.xlane.xlu0 %1137  ;;  %v1544_v13 = vpop.xlane.xlu1 %1543  ;;  %vm1373_vm9 = vcmp.eq.f32.partialorder %v1281_v59, 0.0  ;;  %v1247_v3 = vsel %vm1245_vm8, %v1246_v14, %v1244_v53 }
 0x2c3   :  { %v3835_v36 = vmax.f32 %v1138_v49, 1e-12  ;;  %1566 = vst.msk [vmem:[%s3945_s10 + $0x48] sm:$0xff] %vm649_vm4, %v1544_v13  ;;  %v1260_v31 = vand.u32 2147483648, %v3800_v52 }
 0x2c4   :  { %1474 = vst.msk [vmem:[%s3944_s9 + $0x68] sm:$0xff] %vm649_vm4, %v1458_v11  ;;  %v1444_v24 = vmax.f32 %v1428_v60, 0.0 }
 0x2c5   :  { %1919 = vrsqrt.f32 %v3835_v36  ;;  %vm1385_vm0 = vcmp.eq.f32.partialorder %v3835_v36, inf  ;;  %vm1387_vm11 = vcmp.eq.f32.partialorder %v3835_v36, 0.0 }
 0x2c6   :  { %v1460_v34 = vmul.f32 %v3394_v2, %v1444_v24  ;;  %v1526_v19 = vpop.xlane.xlu0 %1525  ;;  %v1548_v18 = vpop.xlane.xlu1 %1547 }
 0x2c7   :  { %v1914_v32 = vpop.eup %1913  ;;  %1557 = vst.msk [vmem:[%s3945_s10] sm:$0xff] %vm649_vm4, %v1526_v19  ;;  %1568 = vst.msk [vmem:[%s3945_s10 + $0x58] sm:$0xff] %vm649_vm4, %v1548_v18 }
 0x2c8   :  { %1476 = vst.msk [vmem:[%s3944_s9 + $0x78] sm:$0xff] %vm649_vm4, %v1460_v34  ;;  %v1356_v2 = vmul.f32 %v1914_v32, %v3802_v43  ;;  %v1916_v26 = vpop.eup %1915 }
 0x2c9   :  { %v1256_v22 = vmul.f32 %v1916_v26, %v3800_v52 }
 0x2ca   :  { %v1358_v8 = vsel %vm1357_vm3, %v3802_v43, %v1356_v2  ;;  %v1530_v17 = vpop.xlane.xlu0 %1529  ;;  %v1552_v54 = vpop.xlane.xlu1 %1551  ;;  %v1388_v43 = vand.u32 2147483648, %v3835_v36 }
 0x2cb   :  { %v1918_v47 = vpop.eup %1917  ;;  %v1361_v1 = vsel %vm1359_vm12, %v1360_v44, %v1358_v8  ;;  %1559 = vst.msk [vmem:[%s3945_s10 + $0x10] sm:$0xff] %vm649_vm4, %v1530_v17  ;;  %1570 = vst.msk [vmem:[%s3945_s10 + $0x68] sm:$0xff] %vm649_vm4, %v1552_v54  ;;  %v1258_v20 = vsel %vm1257_vm13, %v3800_v52, %v1256_v22 }
 0x2cc   :  { %v1407_v46 = vsub.f32 %v1233_v16, %v1361_v1  ;;  %v1370_v33 = vmul.f32 %v1918_v47, %v1281_v59  ;;  %v1261_v62 = vsel %vm1259_vm14, %v1260_v31, %v1258_v20 }
 0x2ce   :  { %v1423_v41 = vadd.f32 0.3, %v1407_v46  ;;  %v1372_v30 = vsel %vm1371_vm5, %v1281_v59, %v1370_v33  ;;  %v1534_v29 = vpop.xlane.xlu0 %1533  ;;  %v1556_v4 = vpop.xlane.xlu1 %1555 }
 0x2cf   :  { %v1920_v28 = vpop.eup %1919  ;;  %v1375_v38 = vsel %vm1373_vm9, %v1374_v12, %v1372_v30  ;;  %1561 = vst.msk [vmem:[%s3945_s10 + $0x20] sm:$0xff] %vm649_vm4, %v1534_v29  ;;  %1572 = vst.msk [vmem:[%s3945_s10 + $0x78] sm:$0xff] %vm649_vm4, %v1556_v4 }
 0x2d0   :  { %v1439_v50 = vmax.f32 %v1423_v41, 0.0  ;;  %v1409_v48 = vsub.f32 %v1247_v3, %v1375_v38  ;;  %v1384_v21 = vmul.f32 %v1920_v28, %v3835_v36 }
 0x2d2   :  { %v1455_v10 = vmul.f32 %v3711_v42, %v1439_v50  ;;  %v1425_v51 = vadd.f32 0.3, %v1409_v48  ;;  %v1386_v15 = vsel %vm1385_vm0, %v3835_v36, %v1384_v21  ;;  %v1538_v0 = vpop.xlane.xlu0 %1537 }
 0x2d3   :  { %v1389_v56 = vsel %vm1387_vm11, %v1388_v43, %v1386_v15  ;;  %1563 = vst.msk [vmem:[%s3945_s10 + $0x30] sm:$0xff] %vm649_vm4, %v1538_v0 }
 0x2d4   :  { %1471 = vst.msk [vmem:[%s3944_s9 + $0x50] sm:$0xff] %vm649_vm4, %v1455_v10  ;;  %v1441_v52 = vmax.f32 %v1425_v51, 0.0  ;;  %v1411_v42 = vsub.f32 %v1261_v62, %v1389_v56 }
 0x2d6   :  { %v1457_v23 = vmul.f32 %v3719_v7, %v1441_v52  ;;  %v1427_v57 = vadd.f32 0.3, %v1411_v42  ;;  %v1542_v27 = vpop.xlane.xlu0 %1541 }
 0x2d7   :  { %1565 = vst.msk [vmem:[%s3945_s10 + $0x40] sm:$0xff] %vm649_vm4, %v1542_v27 }
 0x2d8   :  { %1473 = vst.msk [vmem:[%s3944_s9 + $0x60] sm:$0xff] %vm649_vm4, %v1457_v23  ;;  %v1443_v61 = vmax.f32 %v1427_v57, 0.0 }
 0x2da   :  { %v1459_v37 = vmul.f32 %v3724_v58, %v1443_v61  ;;  %v1546_v39 = vpop.xlane.xlu0 %1545 }
 0x2db   :  { %1567 = vst.msk [vmem:[%s3945_s10 + $0x50] sm:$0xff] %vm649_vm4, %v1546_v39 }
 0x2dc   :  { %1475 = vst.msk [vmem:[%s3944_s9 + $0x70] sm:$0xff] %vm649_vm4, %v1459_v37 }
 0x2de   :  { %v1550_v7 = vpop.xlane.xlu0 %1549 }
 0x2df   :  { %1569 = vst.msk [vmem:[%s3945_s10 + $0x60] sm:$0xff] %vm649_vm4, %v1550_v7 }
 0x2e2   :  { %v1554_v35 = vpop.xlane.xlu0 %1553 }
 0x2e3   :  { %1571 = vst.msk [vmem:[%s3945_s10 + $0x70] sm:$0xff] %vm649_vm4, %v1554_v35 }
 0x2e4   :  { %1585 = vsyncpa [#allocation3], 1 }
 0x2e5   :  { %1586 = vsyncpa [#allocation5], 1 }
 0x2e6   :  { %1587 = vsyncpa [#allocation8], 1 }

</bundles_post_ra>
